<compile_context>
chip_gen: v5e
topology: v5e:2x2
jax: 0.10.0
libtpu: 0.0.40
codegen_flags: <defaults>
</compile_context>

<pallas_src>
import functools

import jax
import jax.numpy as jnp
from jax.experimental import pallas as pl
from jax.experimental.pallas import tpu as pltpu


# ---------------------------------------------------------------------------
# Fused BasicBlock kernel (bsz images per grid step)
# ---------------------------------------------------------------------------
def _basic_block_kernel(x_ref, w1_ref, b1_ref, w2_ref, b2_ref, *rest,
                        stride, bsz, ho, wo, hq, has_proj):
    if has_proj:
        ws_ref, bs_ref, o_ref, h1_ref = rest
    else:
        o_ref, h1_ref = rest
    coutp = w1_ref.shape[-1]
    m = bsz * ho * wo

    def x_tap(dh, dw):
        """3x3 tap (dh, dw) of the phase-split bf16 input as (M, Cin).

        Phase-splitting in the wrapper makes every tap a contiguous slice
        even when stride > 1 (phase p occupies rows [p*hq, (p+1)*hq))."""
        p = (dh % stride) * stride + (dw % stride)
        r = p * hq + dh // stride
        t = x_ref[:, r:r + ho, dw // stride:dw // stride + wo, :]
        return t.reshape(m, t.shape[-1])

    # ---- conv1 (bn1 scale pre-folded into w1) + bias + relu -----------------
    # 9 accumulating (M, Cin) x (Cin, Cout) MXU dots over shifted VMEM views.
    acc = jnp.zeros((m, coutp), jnp.float32)
    for k in range(9):
        dh, dw = divmod(k, 3)
        acc += jnp.dot(x_tap(dh, dw), w1_ref[k],
                       preferred_element_type=jnp.float32)
    h1 = jnp.maximum(acc + b1_ref[...], 0.0)

    # ---- stage the hidden activation in bf16 VMEM (never hits HBM) ----------
    # Zero only the 1-pixel halo ring; the interior is fully rewritten.
    # (Re-zeroed every step: the scratch is per-TensorCore on multi-TC chips,
    #  so a pl.when(program_id==0) guard would miss the second core.)
    zrow = jnp.zeros((bsz, wo + 2, coutp), jnp.bfloat16)
    zcol = jnp.zeros((bsz, ho, coutp), jnp.bfloat16)
    h1_ref[:, 0, :, :] = zrow
    h1_ref[:, ho + 1, :, :] = zrow
    h1_ref[:, 1:ho + 1, 0, :] = zcol
    h1_ref[:, 1:ho + 1, wo + 1, :] = zcol
    h1_ref[:, 1:ho + 1, 1:wo + 1, :] = (
        h1.reshape(bsz, ho, wo, coutp).astype(jnp.bfloat16))

    # ---- conv2 (bn2 scale pre-folded into w2) + bias ------------------------
    acc2 = jnp.zeros((m, coutp), jnp.float32)
    for k in range(9):
        dh, dw = divmod(k, 3)
        t = h1_ref[:, dh:dh + ho, dw:dw + wo, :].reshape(m, coutp)
        acc2 += jnp.dot(t, w2_ref[k], preferred_element_type=jnp.float32)
    acc2 = acc2 + b2_ref[...]

    # ---- shortcut (1x1 conv + bn projection, or identity) + add + relu ------
    if has_proj:
        sc = jnp.dot(x_tap(1, 1), ws_ref[...],
                     preferred_element_type=jnp.float32) + bs_ref[...]
    else:
        sc = x_tap(1, 1).astype(jnp.float32)  # (1,1) tap == x[::s, ::s]
    out = jnp.maximum(acc2 + sc, 0.0)
    o_ref[...] = out.reshape(bsz, ho, wo, coutp).astype(o_ref.dtype)


# ---------------------------------------------------------------------------
# Wrapper helpers: BN folding, weight packing, sizing heuristics
# ---------------------------------------------------------------------------
def fold_bn(gamma, beta, mean, var, eps=1e-5):
    scale = gamma / jnp.sqrt(var + eps)
    bias = beta - mean * scale
    return scale, bias


def _round_up(x, m):
    return ((x + m - 1) // m) * m


def _conv3x3_weight(w_oihw, scale, cinp, coutp):
    """torch (Cout, Cin, 3, 3) -> (9, Cinp, Coutp) BN-folded, channel-padded, bf16."""
    co, ci, kh, kw = w_oihw.shape
    w = jnp.transpose(w_oihw, (2, 3, 1, 0)).reshape(kh * kw, ci, co)
    w = w * scale[None, None, :]
    w = jnp.pad(w, ((0, 0), (0, cinp - ci), (0, coutp - co)))
    return w.astype(jnp.bfloat16)


def _pad_bias(bias, coutp):
    c = bias.shape[0]
    return jnp.pad(bias, (0, coutp - c)).reshape(1, coutp).astype(jnp.float32)


def _vmem_limit_bytes():
    """Per-generation scoped-VMEM limit (~96 MiB v5e/v6e, ~48 MiB v7x)."""
    try:
        cap = int(pltpu.get_tpu_info().vmem_capacity_bytes)
    except Exception:
        cap = 64 * 1024 * 1024
    return int(min(cap * 3 // 4, 100 * 1024 * 1024))


def _pick_imgs_per_step(n, ho, wo):
    """Largest divisor of n keeping M = bsz*ho*wo <= 1024 and >= 2 grid steps."""
    best = 1
    for b in range(1, n + 1):
        if n % b == 0 and b * ho * wo <= 1024 and n // b >= 2:
            best = b
    return best


# ---------------------------------------------------------------------------
# Wrapper: layout prep + pallas_call
# ---------------------------------------------------------------------------
def basic_block_forward(x_nchw, params, stride, imgs_per_step=None,
                        out_dtype=jnp.float32):
    s = stride
    n, cin, h, w = x_nchw.shape
    cout = params["w1"].shape[0]
    cinp, coutp = _round_up(cin, 128), _round_up(cout, 128)
    ho, wo = (h - 1) // s + 1, (w - 1) // s + 1
    hq, wq = -(-(h + 2) // s), -(-(w + 2) // s)

    # NHWC, bf16, channels padded to a lane-dense multiple of 128.
    x = jnp.transpose(x_nchw, (0, 2, 3, 1)).astype(jnp.bfloat16)
    x = jnp.pad(x, ((0, 0), (0, 0), (0, 0), (0, cinp - cin)))

    # +1 spatial halo pad, split into s*s phases so every in-kernel conv tap
    # is a contiguous slice; phases are flattened along the row axis so the
    # kernel only ever sees 4-D refs.
    xp = jnp.pad(x, ((0, 0), (1, 1), (1, 1), (0, 0)))
    phases = []
    for a in range(s):
        for b in range(s):
            ph = xp[:, a::s, b::s, :]
            ph = jnp.pad(ph, ((0, 0), (0, hq - ph.shape[1]),
                              (0, wq - ph.shape[2]), (0, 0)))
            phases.append(ph)
    x_ph = jnp.stack(phases, axis=1).reshape(n, s * s * hq, wq, cinp)

    sc1, bi1 = fold_bn(*params["bn1"])
    sc2, bi2 = fold_bn(*params["bn2"])
    w1 = _conv3x3_weight(params["w1"], sc1, cinp, coutp)
    w2 = _conv3x3_weight(params["w2"], sc2, coutp, coutp)
    b1 = _pad_bias(bi1, coutp)
    b2 = _pad_bias(bi2, coutp)

    if imgs_per_step is None:
        imgs_per_step = _pick_imgs_per_step(n, ho, wo)
    bsz = int(imgs_per_step)
    assert n % bsz == 0, (n, bsz)

    has_proj = (s != 1) or (cin != cout)
    args = [x_ph, w1, b1, w2, b2]
    in_specs = [
        pl.BlockSpec((bsz, s * s * hq, wq, cinp), lambda i: (i, 0, 0, 0)),
        pl.BlockSpec((9, cinp, coutp), lambda i: (0, 0, 0)),
        pl.BlockSpec((1, coutp), lambda i: (0, 0)),
        pl.BlockSpec((9, coutp, coutp), lambda i: (0, 0, 0)),
        pl.BlockSpec((1, coutp), lambda i: (0, 0)),
    ]
    if has_proj:
        scs, bis = fold_bn(*params["bns"])
        ws = params["ws"][:, :, 0, 0].T * scs[None, :]
        ws = jnp.pad(ws, ((0, cinp - cin), (0, coutp - cout))).astype(jnp.bfloat16)
        bs = _pad_bias(bis, coutp)
        args += [ws, bs]
        in_specs += [pl.BlockSpec((cinp, coutp), lambda i: (0, 0)),
                     pl.BlockSpec((1, coutp), lambda i: (0, 0))]

    kernel = functools.partial(_basic_block_kernel, stride=s, bsz=bsz,
                               ho=ho, wo=wo, hq=hq, has_proj=has_proj)
    out = pl.pallas_call(
        kernel,
        out_shape=jax.ShapeDtypeStruct((n, ho, wo, coutp), out_dtype),
        grid_spec=pltpu.PrefetchScalarGridSpec(
            num_scalar_prefetch=0,
            grid=(n // bsz,),
            in_specs=in_specs,
            out_specs=pl.BlockSpec((bsz, ho, wo, coutp),
                                   lambda i: (i, 0, 0, 0)),
            scratch_shapes=[
                pltpu.VMEM((bsz, ho + 2, wo + 2, coutp), jnp.bfloat16)],
        ),
        compiler_params=pltpu.CompilerParams(
            dimension_semantics=("parallel",),
            vmem_limit_bytes=_vmem_limit_bytes(),
        ),
    )(*args)
    # Drop channel padding, back to NCHW.  (When chaining blocks in a full
    # network, keep NHWC/bf16 between blocks and skip this transpose.)
    return jnp.transpose(out[..., :cout], (0, 3, 1, 2))


# ---------------------------------------------------------------------------
# Pure-JAX (XLA) f32 reference for verification
# ---------------------------------------------------------------------------
def reference_forward(x_nchw, params, stride):
    def conv(x, w, s):
        return jax.lax.conv_general_dilated(
            x, w, window_strides=(s, s), padding=((w.shape[2] // 2,) * 2,) * 2,
            dimension_numbers=("NCHW", "OIHW", "NCHW"))

    def bn(x, bn_params):
        g, b, m, v = bn_params
        sc, bi = fold_bn(g, b, m, v)
        return x * sc[None, :, None, None] + bi[None, :, None, None]

    out = jax.nn.relu(bn(conv(x_nchw, params["w1"], stride), params["bn1"]))
    out = bn(conv(out, params["w2"], 1), params["bn2"])
    cin = params["w1"].shape[1]
    cout = params["w1"].shape[0]
    if stride != 1 or cin != cout:
        sc = bn(conv(x_nchw, params["ws"], stride), params["bns"])
    else:
        sc = x_nchw
    return jax.nn.relu(out + sc)


def init_params(key, in_channels, out_channels, stride):
    k1, k2, k3 = jax.random.split(key, 3)

    def bn_params(c, seed):
        i = jnp.arange(c, dtype=jnp.float32)
        gamma = 1.0 + 0.1 * jnp.sin(i + seed)
        beta = 0.05 * jnp.cos(i + seed)
        mean = 0.02 * jnp.sin(2.0 * i + seed)
        var = 1.0 + 0.1 * jnp.abs(jnp.cos(3.0 * i + seed))
        return (gamma, beta, mean, var)

    std1 = (2.0 / (9 * in_channels)) ** 0.5
    std2 = (2.0 / (9 * out_channels)) ** 0.5
    params = {
        "w1": std1 * jax.random.normal(k1, (out_channels, in_channels, 3, 3), jnp.float32),
        "bn1": bn_params(out_channels, 0.0),
        "w2": std2 * jax.random.normal(k2, (out_channels, out_channels, 3, 3), jnp.float32),
        "bn2": bn_params(out_channels, 1.0),
    }
    if stride != 1 or in_channels != out_channels:
        stds = (2.0 / in_channels) ** 0.5
        params["ws"] = stds * jax.random.normal(
            k3, (out_channels, in_channels, 1, 1), jnp.float32)
        params["bns"] = bn_params(out_channels, 2.0)
    return params


if __name__ == "__main__":
    key = jax.random.PRNGKey(0)
    kx, kp1, kp2 = jax.random.split(key, 3)
    fwd = jax.jit(basic_block_forward, static_argnums=2)

    # Tolerances sized for bf16 MXU operands (f32 accumulation / f32 reference).
    ATOL = RTOL = 1e-1
    MEAN_TOL = 3e-2

    # Config 1: downsampling block (stride=2, channel change -> conv shortcut)
    N, Cin, Cout, H, W, stride = 2, 4, 8, 16, 16, 2
    x = jax.random.normal(kx, (N, Cin, H, W), jnp.float32)
    params = init_params(kp1, Cin, Cout, stride)

    out = jax.block_until_ready(fwd(x, params, stride))
    ref = reference_forward(x, params, stride)
    assert out.shape == (N, Cout, H // stride, W // stride), out.shape
    err = float(jnp.max(jnp.abs(out - ref)))
    assert jnp.allclose(out, ref, atol=ATOL, rtol=RTOL), err
    assert float(jnp.mean(jnp.abs(out - ref))) < MEAN_TOL, err

    # Config 2: identity shortcut (stride=1, same channels), N=4 so the
    # multi-image-per-step (bsz=2) path is exercised.
    N2 = 4
    params2 = init_params(kp2, Cout, Cout, 1)
    x2 = jax.random.normal(jax.random.PRNGKey(0), (N2, Cout, H, W), jnp.float32)
    out2 = jax.block_until_ready(fwd(x2, params2, 1))
    ref2 = reference_forward(x2, params2, 1)
    assert out2.shape == (N2, Cout, H, W), out2.shape
    err2 = float(jnp.max(jnp.abs(out2 - ref2)))
    assert jnp.allclose(out2, ref2, atol=ATOL, rtol=RTOL), err2
    assert float(jnp.mean(jnp.abs(out2 - ref2))) < MEAN_TOL, err2

    print("KERNEL_OK")
</pallas_src>

<mosaic_0001>
module attributes {stable_mosaic.version = 11 : i64} {
  func.func @_basic_block_kernel(%arg0: i32, %arg1: memref<1x36x9x128xbf16, #tpu.memory_space<vmem>>, %arg2: memref<9x128x128xbf16, #tpu.memory_space<vmem>>, %arg3: memref<1x128xf32, #tpu.memory_space<vmem>>, %arg4: memref<9x128x128xbf16, #tpu.memory_space<vmem>>, %arg5: memref<1x128xf32, #tpu.memory_space<vmem>>, %arg6: memref<128x128xbf16, #tpu.memory_space<vmem>>, %arg7: memref<1x128xf32, #tpu.memory_space<vmem>>, %arg8: memref<1x8x8x128xf32, #tpu.memory_space<vmem>>, %arg9: memref<1x10x10x128xbf16, #tpu.memory_space<vmem>>) attributes {dimension_semantics = [#tpu.dimension_semantics<parallel>], iteration_bounds = array<i64: 2>, scalar_prefetch = 0 : i64, scratch_operands = 1 : i64, tpu.core_type = #tpu.core_type<tc>, window_params = [{transform_indices = @transform_0, window_bounds = array<i64: 1, 36, 9, 128>}, {pipeline_mode = #tpu.pipeline_mode<synchronous>, transform_indices = @transform_1, window_bounds = array<i64: 9, 128, 128>}, {pipeline_mode = #tpu.pipeline_mode<synchronous>, transform_indices = @transform_2, window_bounds = array<i64: 1, 128>}, {pipeline_mode = #tpu.pipeline_mode<synchronous>, transform_indices = @transform_3, window_bounds = array<i64: 9, 128, 128>}, {pipeline_mode = #tpu.pipeline_mode<synchronous>, transform_indices = @transform_4, window_bounds = array<i64: 1, 128>}, {pipeline_mode = #tpu.pipeline_mode<synchronous>, transform_indices = @transform_5, window_bounds = array<i64: 128, 128>}, {pipeline_mode = #tpu.pipeline_mode<synchronous>, transform_indices = @transform_6, window_bounds = array<i64: 1, 128>}, {transform_indices = @transform_7, window_bounds = array<i64: 1, 8, 8, 128>}]} {
    %cst = arith.constant 0.000000e+00 : f32
    %0 = vector.broadcast %cst : f32 to vector<64x128xf32>
    %c0 = arith.constant 0 : index
    %c0_0 = arith.constant 0 : index
    %c0_1 = arith.constant 0 : index
    %c0_2 = arith.constant 0 : index
    %1 = vector.load %arg1[%c0, %c0_0, %c0_1, %c0_2] : memref<1x36x9x128xbf16, #tpu.memory_space<vmem>>, vector<1x8x8x128xbf16>
    %2 = vector.shape_cast %1 : vector<1x8x8x128xbf16> to vector<64x128xbf16>
    %c0_3 = arith.constant 0 : index
    %c0_4 = arith.constant 0 : index
    %c0_5 = arith.constant 0 : index
    %3 = vector.load %arg2[%c0_3, %c0_4, %c0_5] : memref<9x128x128xbf16, #tpu.memory_space<vmem>>, vector<1x128x128xbf16>
    %4 = vector.shape_cast %3 : vector<1x128x128xbf16> to vector<128x128xbf16>
    %cst_6 = arith.constant dense<0.000000e+00> : vector<64x128xf32>
    %5 = tpu.matmul %2, %4, %cst_6 {dimension_numbers = #tpu.dot_dimension_numbers<[1], [0], [0], [1], [0, 0, 1, 1], [], []>} : vector<64x128xbf16>, vector<128x128xbf16>, vector<64x128xf32> -> vector<64x128xf32>
    %6 = arith.addf %0, %5 : vector<64x128xf32>
    %c0_7 = arith.constant 0 : index
    %c9 = arith.constant 9 : index
    %c0_8 = arith.constant 0 : index
    %c0_9 = arith.constant 0 : index
    %7 = vector.load %arg1[%c0_7, %c9, %c0_8, %c0_9] : memref<1x36x9x128xbf16, #tpu.memory_space<vmem>>, vector<1x8x8x128xbf16>
    %8 = vector.shape_cast %7 : vector<1x8x8x128xbf16> to vector<64x128xbf16>
    %c1 = arith.constant 1 : index
    %c0_10 = arith.constant 0 : index
    %c0_11 = arith.constant 0 : index
    %9 = vector.load %arg2[%c1, %c0_10, %c0_11] : memref<9x128x128xbf16, #tpu.memory_space<vmem>>, vector<1x128x128xbf16>
    %10 = vector.shape_cast %9 : vector<1x128x128xbf16> to vector<128x128xbf16>
    %cst_12 = arith.constant dense<0.000000e+00> : vector<64x128xf32>
    %11 = tpu.matmul %8, %10, %cst_12 {dimension_numbers = #tpu.dot_dimension_numbers<[1], [0], [0], [1], [0, 0, 1, 1], [], []>} : vector<64x128xbf16>, vector<128x128xbf16>, vector<64x128xf32> -> vector<64x128xf32>
    %12 = arith.addf %6, %11 : vector<64x128xf32>
    %c0_13 = arith.constant 0 : index
    %c0_14 = arith.constant 0 : index
    %c1_15 = arith.constant 1 : index
    %c0_16 = arith.constant 0 : index
    %13 = vector.load %arg1[%c0_13, %c0_14, %c1_15, %c0_16] : memref<1x36x9x128xbf16, #tpu.memory_space<vmem>>, vector<1x8x8x128xbf16>
    %14 = vector.shape_cast %13 : vector<1x8x8x128xbf16> to vector<64x128xbf16>
    %c2 = arith.constant 2 : index
    %c0_17 = arith.constant 0 : index
    %c0_18 = arith.constant 0 : index
    %15 = vector.load %arg2[%c2, %c0_17, %c0_18] : memref<9x128x128xbf16, #tpu.memory_space<vmem>>, vector<1x128x128xbf16>
    %16 = vector.shape_cast %15 : vector<1x128x128xbf16> to vector<128x128xbf16>
    %cst_19 = arith.constant dense<0.000000e+00> : vector<64x128xf32>
    %17 = tpu.matmul %14, %16, %cst_19 {dimension_numbers = #tpu.dot_dimension_numbers<[1], [0], [0], [1], [0, 0, 1, 1], [], []>} : vector<64x128xbf16>, vector<128x128xbf16>, vector<64x128xf32> -> vector<64x128xf32>
    %18 = arith.addf %12, %17 : vector<64x128xf32>
    %c0_20 = arith.constant 0 : index
    %c18 = arith.constant 18 : index
    %c0_21 = arith.constant 0 : index
    %c0_22 = arith.constant 0 : index
    %19 = vector.load %arg1[%c0_20, %c18, %c0_21, %c0_22] : memref<1x36x9x128xbf16, #tpu.memory_space<vmem>>, vector<1x8x8x128xbf16>
    %20 = vector.shape_cast %19 : vector<1x8x8x128xbf16> to vector<64x128xbf16>
    %c3 = arith.constant 3 : index
    %c0_23 = arith.constant 0 : index
    %c0_24 = arith.constant 0 : index
    %21 = vector.load %arg2[%c3, %c0_23, %c0_24] : memref<9x128x128xbf16, #tpu.memory_space<vmem>>, vector<1x128x128xbf16>
    %22 = vector.shape_cast %21 : vector<1x128x128xbf16> to vector<128x128xbf16>
    %cst_25 = arith.constant dense<0.000000e+00> : vector<64x128xf32>
    %23 = tpu.matmul %20, %22, %cst_25 {dimension_numbers = #tpu.dot_dimension_numbers<[1], [0], [0], [1], [0, 0, 1, 1], [], []>} : vector<64x128xbf16>, vector<128x128xbf16>, vector<64x128xf32> -> vector<64x128xf32>
    %24 = arith.addf %18, %23 : vector<64x128xf32>
    %c0_26 = arith.constant 0 : index
    %c27 = arith.constant 27 : index
    %c0_27 = arith.constant 0 : index
    %c0_28 = arith.constant 0 : index
    %25 = vector.load %arg1[%c0_26, %c27, %c0_27, %c0_28] : memref<1x36x9x128xbf16, #tpu.memory_space<vmem>>, vector<1x8x8x128xbf16>
    %26 = vector.shape_cast %25 : vector<1x8x8x128xbf16> to vector<64x128xbf16>
    %c4 = arith.constant 4 : index
    %c0_29 = arith.constant 0 : index
    %c0_30 = arith.constant 0 : index
    %27 = vector.load %arg2[%c4, %c0_29, %c0_30] : memref<9x128x128xbf16, #tpu.memory_space<vmem>>, vector<1x128x128xbf16>
    %28 = vector.shape_cast %27 : vector<1x128x128xbf16> to vector<128x128xbf16>
    %cst_31 = arith.constant dense<0.000000e+00> : vector<64x128xf32>
    %29 = tpu.matmul %26, %28, %cst_31 {dimension_numbers = #tpu.dot_dimension_numbers<[1], [0], [0], [1], [0, 0, 1, 1], [], []>} : vector<64x128xbf16>, vector<128x128xbf16>, vector<64x128xf32> -> vector<64x128xf32>
    %30 = arith.addf %24, %29 : vector<64x128xf32>
    %c0_32 = arith.constant 0 : index
    %c18_33 = arith.constant 18 : index
    %c1_34 = arith.constant 1 : index
    %c0_35 = arith.constant 0 : index
    %31 = vector.load %arg1[%c0_32, %c18_33, %c1_34, %c0_35] : memref<1x36x9x128xbf16, #tpu.memory_space<vmem>>, vector<1x8x8x128xbf16>
    %32 = vector.shape_cast %31 : vector<1x8x8x128xbf16> to vector<64x128xbf16>
    %c5 = arith.constant 5 : index
    %c0_36 = arith.constant 0 : index
    %c0_37 = arith.constant 0 : index
    %33 = vector.load %arg2[%c5, %c0_36, %c0_37] : memref<9x128x128xbf16, #tpu.memory_space<vmem>>, vector<1x128x128xbf16>
    %34 = vector.shape_cast %33 : vector<1x128x128xbf16> to vector<128x128xbf16>
    %cst_38 = arith.constant dense<0.000000e+00> : vector<64x128xf32>
    %35 = tpu.matmul %32, %34, %cst_38 {dimension_numbers = #tpu.dot_dimension_numbers<[1], [0], [0], [1], [0, 0, 1, 1], [], []>} : vector<64x128xbf16>, vector<128x128xbf16>, vector<64x128xf32> -> vector<64x128xf32>
    %36 = arith.addf %30, %35 : vector<64x128xf32>
    %c0_39 = arith.constant 0 : index
    %c1_40 = arith.constant 1 : index
    %c0_41 = arith.constant 0 : index
    %c0_42 = arith.constant 0 : index
    %37 = vector.load %arg1[%c0_39, %c1_40, %c0_41, %c0_42] : memref<1x36x9x128xbf16, #tpu.memory_space<vmem>>, vector<1x8x8x128xbf16>
    %38 = vector.shape_cast %37 : vector<1x8x8x128xbf16> to vector<64x128xbf16>
    %c6 = arith.constant 6 : index
    %c0_43 = arith.constant 0 : index
    %c0_44 = arith.constant 0 : index
    %39 = vector.load %arg2[%c6, %c0_43, %c0_44] : memref<9x128x128xbf16, #tpu.memory_space<vmem>>, vector<1x128x128xbf16>
    %40 = vector.shape_cast %39 : vector<1x128x128xbf16> to vector<128x128xbf16>
    %cst_45 = arith.constant dense<0.000000e+00> : vector<64x128xf32>
    %41 = tpu.matmul %38, %40, %cst_45 {dimension_numbers = #tpu.dot_dimension_numbers<[1], [0], [0], [1], [0, 0, 1, 1], [], []>} : vector<64x128xbf16>, vector<128x128xbf16>, vector<64x128xf32> -> vector<64x128xf32>
    %42 = arith.addf %36, %41 : vector<64x128xf32>
    %c0_46 = arith.constant 0 : index
    %c10 = arith.constant 10 : index
    %c0_47 = arith.constant 0 : index
    %c0_48 = arith.constant 0 : index
    %43 = vector.load %arg1[%c0_46, %c10, %c0_47, %c0_48] : memref<1x36x9x128xbf16, #tpu.memory_space<vmem>>, vector<1x8x8x128xbf16>
    %44 = vector.shape_cast %43 : vector<1x8x8x128xbf16> to vector<64x128xbf16>
    %c7 = arith.constant 7 : index
    %c0_49 = arith.constant 0 : index
    %c0_50 = arith.constant 0 : index
    %45 = vector.load %arg2[%c7, %c0_49, %c0_50] : memref<9x128x128xbf16, #tpu.memory_space<vmem>>, vector<1x128x128xbf16>
    %46 = vector.shape_cast %45 : vector<1x128x128xbf16> to vector<128x128xbf16>
    %cst_51 = arith.constant dense<0.000000e+00> : vector<64x128xf32>
    %47 = tpu.matmul %44, %46, %cst_51 {dimension_numbers = #tpu.dot_dimension_numbers<[1], [0], [0], [1], [0, 0, 1, 1], [], []>} : vector<64x128xbf16>, vector<128x128xbf16>, vector<64x128xf32> -> vector<64x128xf32>
    %48 = arith.addf %42, %47 : vector<64x128xf32>
    %c0_52 = arith.constant 0 : index
    %c1_53 = arith.constant 1 : index
    %c1_54 = arith.constant 1 : index
    %c0_55 = arith.constant 0 : index
    %49 = vector.load %arg1[%c0_52, %c1_53, %c1_54, %c0_55] : memref<1x36x9x128xbf16, #tpu.memory_space<vmem>>, vector<1x8x8x128xbf16>
    %50 = vector.shape_cast %49 : vector<1x8x8x128xbf16> to vector<64x128xbf16>
    %c8 = arith.constant 8 : index
    %c0_56 = arith.constant 0 : index
    %c0_57 = arith.constant 0 : index
    %51 = vector.load %arg2[%c8, %c0_56, %c0_57] : memref<9x128x128xbf16, #tpu.memory_space<vmem>>, vector<1x128x128xbf16>
    %52 = vector.shape_cast %51 : vector<1x128x128xbf16> to vector<128x128xbf16>
    %cst_58 = arith.constant dense<0.000000e+00> : vector<64x128xf32>
    %53 = tpu.matmul %50, %52, %cst_58 {dimension_numbers = #tpu.dot_dimension_numbers<[1], [0], [0], [1], [0, 0, 1, 1], [], []>} : vector<64x128xbf16>, vector<128x128xbf16>, vector<64x128xf32> -> vector<64x128xf32>
    %54 = arith.addf %48, %53 : vector<64x128xf32>
    %c0_59 = arith.constant 0 : index
    %c0_60 = arith.constant 0 : index
    %55 = vector.load %arg3[%c0_59, %c0_60] : memref<1x128xf32, #tpu.memory_space<vmem>>, vector<1x128xf32>
    %56 = vector.broadcast %55 : vector<1x128xf32> to vector<64x128xf32>
    %57 = arith.addf %54, %56 : vector<64x128xf32>
    %cst_61 = arith.constant 0.000000e+00 : f32
    %58 = vector.broadcast %cst_61 : f32 to vector<64x128xf32>
    %59 = arith.maximumf %57, %58 : vector<64x128xf32>
    %cst_62 = arith.constant 0.000000e+00 : bf16
    %60 = vector.broadcast %cst_62 : bf16 to vector<1x10x128xbf16>
    %cst_63 = arith.constant 0.000000e+00 : bf16
    %61 = vector.broadcast %cst_63 : bf16 to vector<1x8x128xbf16>
    %c0_64 = arith.constant 0 : index
    %c0_65 = arith.constant 0 : index
    %c0_66 = arith.constant 0 : index
    %c0_67 = arith.constant 0 : index
    %62 = vector.load %arg9[%c0_64, %c0_65, %c0_66, %c0_67] : memref<1x10x10x128xbf16, #tpu.memory_space<vmem>>, vector<1x1x10x128xbf16>
    %63 = vector.shape_cast %62 : vector<1x1x10x128xbf16> to vector<1x10x128xbf16>
    %64 = vector.shape_cast %60 : vector<1x10x128xbf16> to vector<1x1x10x128xbf16>
    tpu.vector_store %arg9[%c0_64, %c0_65, %c0_66, %c0_67], %64 {strides = array<i32>} : memref<1x10x10x128xbf16, #tpu.memory_space<vmem>>, vector<1x1x10x128xbf16>,
    %c0_68 = arith.constant 0 : index
    %c9_69 = arith.constant 9 : index
    %c0_70 = arith.constant 0 : index
    %c0_71 = arith.constant 0 : index
    %65 = vector.load %arg9[%c0_68, %c9_69, %c0_70, %c0_71] : memref<1x10x10x128xbf16, #tpu.memory_space<vmem>>, vector<1x1x10x128xbf16>
    %66 = vector.shape_cast %65 : vector<1x1x10x128xbf16> to vector<1x10x128xbf16>
    %67 = vector.shape_cast %60 : vector<1x10x128xbf16> to vector<1x1x10x128xbf16>
    tpu.vector_store %arg9[%c0_68, %c9_69, %c0_70, %c0_71], %67 {strides = array<i32>} : memref<1x10x10x128xbf16, #tpu.memory_space<vmem>>, vector<1x1x10x128xbf16>,
    %c0_72 = arith.constant 0 : index
    %c1_73 = arith.constant 1 : index
    %c0_74 = arith.constant 0 : index
    %c0_75 = arith.constant 0 : index
    %68 = vector.load %arg9[%c0_72, %c1_73, %c0_74, %c0_75] : memref<1x10x10x128xbf16, #tpu.memory_space<vmem>>, vector<1x8x1x128xbf16>
    %69 = vector.shape_cast %68 : vector<1x8x1x128xbf16> to vector<1x8x128xbf16>
    %70 = vector.shape_cast %61 : vector<1x8x128xbf16> to vector<1x8x1x128xbf16>
    tpu.vector_store %arg9[%c0_72, %c1_73, %c0_74, %c0_75], %70 {strides = array<i32>} : memref<1x10x10x128xbf16, #tpu.memory_space<vmem>>, vector<1x8x1x128xbf16>,
    %c0_76 = arith.constant 0 : index
    %c1_77 = arith.constant 1 : index
    %c9_78 = arith.constant 9 : index
    %c0_79 = arith.constant 0 : index
    %71 = vector.load %arg9[%c0_76, %c1_77, %c9_78, %c0_79] : memref<1x10x10x128xbf16, #tpu.memory_space<vmem>>, vector<1x8x1x128xbf16>
    %72 = vector.shape_cast %71 : vector<1x8x1x128xbf16> to vector<1x8x128xbf16>
    %73 = vector.shape_cast %61 : vector<1x8x128xbf16> to vector<1x8x1x128xbf16>
    tpu.vector_store %arg9[%c0_76, %c1_77, %c9_78, %c0_79], %73 {strides = array<i32>} : memref<1x10x10x128xbf16, #tpu.memory_space<vmem>>, vector<1x8x1x128xbf16>,
    %74 = vector.shape_cast %59 : vector<64x128xf32> to vector<1x8x8x128xf32>
    %75 = arith.truncf %74 : vector<1x8x8x128xf32> to vector<1x8x8x128xbf16>
    %c0_80 = arith.constant 0 : index
    %c1_81 = arith.constant 1 : index
    %c1_82 = arith.constant 1 : index
    %c0_83 = arith.constant 0 : index
    %76 = vector.load %arg9[%c0_80, %c1_81, %c1_82, %c0_83] : memref<1x10x10x128xbf16, #tpu.memory_space<vmem>>, vector<1x8x8x128xbf16>
    tpu.vector_store %arg9[%c0_80, %c1_81, %c1_82, %c0_83], %75 {strides = array<i32>} : memref<1x10x10x128xbf16, #tpu.memory_space<vmem>>, vector<1x8x8x128xbf16>,
    %cst_84 = arith.constant 0.000000e+00 : f32
    %77 = vector.broadcast %cst_84 : f32 to vector<64x128xf32>
    %c0_85 = arith.constant 0 : index
    %c0_86 = arith.constant 0 : index
    %c0_87 = arith.constant 0 : index
    %c0_88 = arith.constant 0 : index
    %78 = vector.load %arg9[%c0_85, %c0_86, %c0_87, %c0_88] : memref<1x10x10x128xbf16, #tpu.memory_space<vmem>>, vector<1x8x8x128xbf16>
    %79 = vector.shape_cast %78 : vector<1x8x8x128xbf16> to vector<64x128xbf16>
    %c0_89 = arith.constant 0 : index
    %c0_90 = arith.constant 0 : index
    %c0_91 = arith.constant 0 : index
    %80 = vector.load %arg4[%c0_89, %c0_90, %c0_91] : memref<9x128x128xbf16, #tpu.memory_space<vmem>>, vector<1x128x128xbf16>
    %81 = vector.shape_cast %80 : vector<1x128x128xbf16> to vector<128x128xbf16>
    %cst_92 = arith.constant dense<0.000000e+00> : vector<64x128xf32>
    %82 = tpu.matmul %79, %81, %cst_92 {dimension_numbers = #tpu.dot_dimension_numbers<[1], [0], [0], [1], [0, 0, 1, 1], [], []>} : vector<64x128xbf16>, vector<128x128xbf16>, vector<64x128xf32> -> vector<64x128xf32>
    %83 = arith.addf %77, %82 : vector<64x128xf32>
    %c0_93 = arith.constant 0 : index
    %c0_94 = arith.constant 0 : index
    %c1_95 = arith.constant 1 : index
    %c0_96 = arith.constant 0 : index
    %84 = vector.load %arg9[%c0_93, %c0_94, %c1_95, %c0_96] : memref<1x10x10x128xbf16, #tpu.memory_space<vmem>>, vector<1x8x8x128xbf16>
    %85 = vector.shape_cast %84 : vector<1x8x8x128xbf16> to vector<64x128xbf16>
    %c1_97 = arith.constant 1 : index
    %c0_98 = arith.constant 0 : index
    %c0_99 = arith.constant 0 : index
    %86 = vector.load %arg4[%c1_97, %c0_98, %c0_99] : memref<9x128x128xbf16, #tpu.memory_space<vmem>>, vector<1x128x128xbf16>
    %87 = vector.shape_cast %86 : vector<1x128x128xbf16> to vector<128x128xbf16>
    %cst_100 = arith.constant dense<0.000000e+00> : vector<64x128xf32>
    %88 = tpu.matmul %85, %87, %cst_100 {dimension_numbers = #tpu.dot_dimension_numbers<[1], [0], [0], [1], [0, 0, 1, 1], [], []>} : vector<64x128xbf16>, vector<128x128xbf16>, vector<64x128xf32> -> vector<64x128xf32>
    %89 = arith.addf %83, %88 : vector<64x128xf32>
    %c0_101 = arith.constant 0 : index
    %c0_102 = arith.constant 0 : index
    %c2_103 = arith.constant 2 : index
    %c0_104 = arith.constant 0 : index
    %90 = vector.load %arg9[%c0_101, %c0_102, %c2_103, %c0_104] : memref<1x10x10x128xbf16, #tpu.memory_space<vmem>>, vector<1x8x8x128xbf16>
    %91 = vector.shape_cast %90 : vector<1x8x8x128xbf16> to vector<64x128xbf16>
    %c2_105 = arith.constant 2 : index
    %c0_106 = arith.constant 0 : index
    %c0_107 = arith.constant 0 : index
    %92 = vector.load %arg4[%c2_105, %c0_106, %c0_107] : memref<9x128x128xbf16, #tpu.memory_space<vmem>>, vector<1x128x128xbf16>
    %93 = vector.shape_cast %92 : vector<1x128x128xbf16> to vector<128x128xbf16>
    %cst_108 = arith.constant dense<0.000000e+00> : vector<64x128xf32>
    %94 = tpu.matmul %91, %93, %cst_108 {dimension_numbers = #tpu.dot_dimension_numbers<[1], [0], [0], [1], [0, 0, 1, 1], [], []>} : vector<64x128xbf16>, vector<128x128xbf16>, vector<64x128xf32> -> vector<64x128xf32>
    %95 = arith.addf %89, %94 : vector<64x128xf32>
    %c0_109 = arith.constant 0 : index
    %c1_110 = arith.constant 1 : index
    %c0_111 = arith.constant 0 : index
    %c0_112 = arith.constant 0 : index
    %96 = vector.load %arg9[%c0_109, %c1_110, %c0_111, %c0_112] : memref<1x10x10x128xbf16, #tpu.memory_space<vmem>>, vector<1x8x8x128xbf16>
    %97 = vector.shape_cast %96 : vector<1x8x8x128xbf16> to vector<64x128xbf16>
    %c3_113 = arith.constant 3 : index
    %c0_114 = arith.constant 0 : index
    %c0_115 = arith.constant 0 : index
    %98 = vector.load %arg4[%c3_113, %c0_114, %c0_115] : memref<9x128x128xbf16, #tpu.memory_space<vmem>>, vector<1x128x128xbf16>
    %99 = vector.shape_cast %98 : vector<1x128x128xbf16> to vector<128x128xbf16>
    %cst_116 = arith.constant dense<0.000000e+00> : vector<64x128xf32>
    %100 = tpu.matmul %97, %99, %cst_116 {dimension_numbers = #tpu.dot_dimension_numbers<[1], [0], [0], [1], [0, 0, 1, 1], [], []>} : vector<64x128xbf16>, vector<128x128xbf16>, vector<64x128xf32> -> vector<64x128xf32>
    %101 = arith.addf %95, %100 : vector<64x128xf32>
    %c0_117 = arith.constant 0 : index
    %c1_118 = arith.constant 1 : index
    %c1_119 = arith.constant 1 : index
    %c0_120 = arith.constant 0 : index
    %102 = vector.load %arg9[%c0_117, %c1_118, %c1_119, %c0_120] : memref<1x10x10x128xbf16, #tpu.memory_space<vmem>>, vector<1x8x8x128xbf16>
    %103 = vector.shape_cast %102 : vector<1x8x8x128xbf16> to vector<64x128xbf16>
    %c4_121 = arith.constant 4 : index
    %c0_122 = arith.constant 0 : index
    %c0_123 = arith.constant 0 : index
    %104 = vector.load %arg4[%c4_121, %c0_122, %c0_123] : memref<9x128x128xbf16, #tpu.memory_space<vmem>>, vector<1x128x128xbf16>
    %105 = vector.shape_cast %104 : vector<1x128x128xbf16> to vector<128x128xbf16>
    %cst_124 = arith.constant dense<0.000000e+00> : vector<64x128xf32>
    %106 = tpu.matmul %103, %105, %cst_124 {dimension_numbers = #tpu.dot_dimension_numbers<[1], [0], [0], [1], [0, 0, 1, 1], [], []>} : vector<64x128xbf16>, vector<128x128xbf16>, vector<64x128xf32> -> vector<64x128xf32>
    %107 = arith.addf %101, %106 : vector<64x128xf32>
    %c0_125 = arith.constant 0 : index
    %c1_126 = arith.constant 1 : index
    %c2_127 = arith.constant 2 : index
    %c0_128 = arith.constant 0 : index
    %108 = vector.load %arg9[%c0_125, %c1_126, %c2_127, %c0_128] : memref<1x10x10x128xbf16, #tpu.memory_space<vmem>>, vector<1x8x8x128xbf16>
    %109 = vector.shape_cast %108 : vector<1x8x8x128xbf16> to vector<64x128xbf16>
    %c5_129 = arith.constant 5 : index
    %c0_130 = arith.constant 0 : index
    %c0_131 = arith.constant 0 : index
    %110 = vector.load %arg4[%c5_129, %c0_130, %c0_131] : memref<9x128x128xbf16, #tpu.memory_space<vmem>>, vector<1x128x128xbf16>
    %111 = vector.shape_cast %110 : vector<1x128x128xbf16> to vector<128x128xbf16>
    %cst_132 = arith.constant dense<0.000000e+00> : vector<64x128xf32>
    %112 = tpu.matmul %109, %111, %cst_132 {dimension_numbers = #tpu.dot_dimension_numbers<[1], [0], [0], [1], [0, 0, 1, 1], [], []>} : vector<64x128xbf16>, vector<128x128xbf16>, vector<64x128xf32> -> vector<64x128xf32>
    %113 = arith.addf %107, %112 : vector<64x128xf32>
    %c0_133 = arith.constant 0 : index
    %c2_134 = arith.constant 2 : index
    %c0_135 = arith.constant 0 : index
    %c0_136 = arith.constant 0 : index
    %114 = vector.load %arg9[%c0_133, %c2_134, %c0_135, %c0_136] : memref<1x10x10x128xbf16, #tpu.memory_space<vmem>>, vector<1x8x8x128xbf16>
    %115 = vector.shape_cast %114 : vector<1x8x8x128xbf16> to vector<64x128xbf16>
    %c6_137 = arith.constant 6 : index
    %c0_138 = arith.constant 0 : index
    %c0_139 = arith.constant 0 : index
    %116 = vector.load %arg4[%c6_137, %c0_138, %c0_139] : memref<9x128x128xbf16, #tpu.memory_space<vmem>>, vector<1x128x128xbf16>
    %117 = vector.shape_cast %116 : vector<1x128x128xbf16> to vector<128x128xbf16>
    %cst_140 = arith.constant dense<0.000000e+00> : vector<64x128xf32>
    %118 = tpu.matmul %115, %117, %cst_140 {dimension_numbers = #tpu.dot_dimension_numbers<[1], [0], [0], [1], [0, 0, 1, 1], [], []>} : vector<64x128xbf16>, vector<128x128xbf16>, vector<64x128xf32> -> vector<64x128xf32>
    %119 = arith.addf %113, %118 : vector<64x128xf32>
    %c0_141 = arith.constant 0 : index
    %c2_142 = arith.constant 2 : index
    %c1_143 = arith.constant 1 : index
    %c0_144 = arith.constant 0 : index
    %120 = vector.load %arg9[%c0_141, %c2_142, %c1_143, %c0_144] : memref<1x10x10x128xbf16, #tpu.memory_space<vmem>>, vector<1x8x8x128xbf16>
    %121 = vector.shape_cast %120 : vector<1x8x8x128xbf16> to vector<64x128xbf16>
    %c7_145 = arith.constant 7 : index
    %c0_146 = arith.constant 0 : index
    %c0_147 = arith.constant 0 : index
    %122 = vector.load %arg4[%c7_145, %c0_146, %c0_147] : memref<9x128x128xbf16, #tpu.memory_space<vmem>>, vector<1x128x128xbf16>
    %123 = vector.shape_cast %122 : vector<1x128x128xbf16> to vector<128x128xbf16>
    %cst_148 = arith.constant dense<0.000000e+00> : vector<64x128xf32>
    %124 = tpu.matmul %121, %123, %cst_148 {dimension_numbers = #tpu.dot_dimension_numbers<[1], [0], [0], [1], [0, 0, 1, 1], [], []>} : vector<64x128xbf16>, vector<128x128xbf16>, vector<64x128xf32> -> vector<64x128xf32>
    %125 = arith.addf %119, %124 : vector<64x128xf32>
    %c0_149 = arith.constant 0 : index
    %c2_150 = arith.constant 2 : index
    %c2_151 = arith.constant 2 : index
    %c0_152 = arith.constant 0 : index
    %126 = vector.load %arg9[%c0_149, %c2_150, %c2_151, %c0_152] : memref<1x10x10x128xbf16, #tpu.memory_space<vmem>>, vector<1x8x8x128xbf16>
    %127 = vector.shape_cast %126 : vector<1x8x8x128xbf16> to vector<64x128xbf16>
    %c8_153 = arith.constant 8 : index
    %c0_154 = arith.constant 0 : index
    %c0_155 = arith.constant 0 : index
    %128 = vector.load %arg4[%c8_153, %c0_154, %c0_155] : memref<9x128x128xbf16, #tpu.memory_space<vmem>>, vector<1x128x128xbf16>
    %129 = vector.shape_cast %128 : vector<1x128x128xbf16> to vector<128x128xbf16>
    %cst_156 = arith.constant dense<0.000000e+00> : vector<64x128xf32>
    %130 = tpu.matmul %127, %129, %cst_156 {dimension_numbers = #tpu.dot_dimension_numbers<[1], [0], [0], [1], [0, 0, 1, 1], [], []>} : vector<64x128xbf16>, vector<128x128xbf16>, vector<64x128xf32> -> vector<64x128xf32>
    %131 = arith.addf %125, %130 : vector<64x128xf32>
    %c0_157 = arith.constant 0 : index
    %c0_158 = arith.constant 0 : index
    %132 = vector.load %arg5[%c0_157, %c0_158] : memref<1x128xf32, #tpu.memory_space<vmem>>, vector<1x128xf32>
    %133 = vector.broadcast %132 : vector<1x128xf32> to vector<64x128xf32>
    %134 = arith.addf %131, %133 : vector<64x128xf32>
    %c0_159 = arith.constant 0 : index
    %c27_160 = arith.constant 27 : index
    %c0_161 = arith.constant 0 : index
    %c0_162 = arith.constant 0 : index
    %135 = vector.load %arg1[%c0_159, %c27_160, %c0_161, %c0_162] : memref<1x36x9x128xbf16, #tpu.memory_space<vmem>>, vector<1x8x8x128xbf16>
    %136 = vector.shape_cast %135 : vector<1x8x8x128xbf16> to vector<64x128xbf16>
    %c0_163 = arith.constant 0 : index
    %c0_164 = arith.constant 0 : index
    %137 = vector.load %arg6[%c0_163, %c0_164] : memref<128x128xbf16, #tpu.memory_space<vmem>>, vector<128x128xbf16>
    %cst_165 = arith.constant dense<0.000000e+00> : vector<64x128xf32>
    %138 = tpu.matmul %136, %137, %cst_165 {dimension_numbers = #tpu.dot_dimension_numbers<[1], [0], [0], [1], [0, 0, 1, 1], [], []>} : vector<64x128xbf16>, vector<128x128xbf16>, vector<64x128xf32> -> vector<64x128xf32>
    %c0_166 = arith.constant 0 : index
    %c0_167 = arith.constant 0 : index
    %139 = vector.load %arg7[%c0_166, %c0_167] : memref<1x128xf32, #tpu.memory_space<vmem>>, vector<1x128xf32>
    %140 = vector.broadcast %139 : vector<1x128xf32> to vector<64x128xf32>
    %141 = arith.addf %138, %140 : vector<64x128xf32>
    %142 = arith.addf %134, %141 : vector<64x128xf32>
    %cst_168 = arith.constant 0.000000e+00 : f32
    %143 = vector.broadcast %cst_168 : f32 to vector<64x128xf32>
    %144 = arith.maximumf %142, %143 : vector<64x128xf32>
    %145 = vector.shape_cast %144 : vector<64x128xf32> to vector<1x8x8x128xf32>
    %c0_169 = arith.constant 0 : index
    %c0_170 = arith.constant 0 : index
    %c0_171 = arith.constant 0 : index
    %c0_172 = arith.constant 0 : index
    %146 = vector.load %arg8[%c0_169, %c0_170, %c0_171, %c0_172] : memref<1x8x8x128xf32, #tpu.memory_space<vmem>>, vector<1x8x8x128xf32>
    tpu.vector_store %arg8[%c0_169, %c0_170, %c0_171, %c0_172], %145 {strides = array<i32>} : memref<1x8x8x128xf32, #tpu.memory_space<vmem>>, vector<1x8x8x128xf32>,
    return
  }
  func.func @transform_0(%arg0: i32) -> (i32, i32, i32, i32) {
    %c0_i32 = arith.constant 0 : i32
    %c0_i32_0 = arith.constant 0 : i32
    %c0_i32_1 = arith.constant 0 : i32
    %c0_i32_2 = arith.constant 0 : i32
    return %arg0, %c0_i32, %c0_i32_0, %c0_i32_1 : i32, i32, i32, i32
  }
  func.func @transform_1(%arg0: i32) -> (i32, i32, i32) {
    %c0_i32 = arith.constant 0 : i32
    %c0_i32_0 = arith.constant 0 : i32
    %c0_i32_1 = arith.constant 0 : i32
    %c0_i32_2 = arith.constant 0 : i32
    return %c0_i32, %c0_i32_0, %c0_i32_1 : i32, i32, i32
  }
  func.func @transform_2(%arg0: i32) -> (i32, i32) {
    %c0_i32 = arith.constant 0 : i32
    %c0_i32_0 = arith.constant 0 : i32
    %c0_i32_1 = arith.constant 0 : i32
    return %c0_i32, %c0_i32_0 : i32, i32
  }
  func.func @transform_3(%arg0: i32) -> (i32, i32, i32) {
    %c0_i32 = arith.constant 0 : i32
    %c0_i32_0 = arith.constant 0 : i32
    %c0_i32_1 = arith.constant 0 : i32
    %c0_i32_2 = arith.constant 0 : i32
    return %c0_i32, %c0_i32_0, %c0_i32_1 : i32, i32, i32
  }
  func.func @transform_4(%arg0: i32) -> (i32, i32) {
    %c0_i32 = arith.constant 0 : i32
    %c0_i32_0 = arith.constant 0 : i32
    %c0_i32_1 = arith.constant 0 : i32
    return %c0_i32, %c0_i32_0 : i32, i32
  }
  func.func @transform_5(%arg0: i32) -> (i32, i32) {
    %c0_i32 = arith.constant 0 : i32
    %c0_i32_0 = arith.constant 0 : i32
    %c0_i32_1 = arith.constant 0 : i32
    return %c0_i32, %c0_i32_0 : i32, i32
  }
  func.func @transform_6(%arg0: i32) -> (i32, i32) {
    %c0_i32 = arith.constant 0 : i32
    %c0_i32_0 = arith.constant 0 : i32
    %c0_i32_1 = arith.constant 0 : i32
    return %c0_i32, %c0_i32_0 : i32, i32
  }
  func.func @transform_7(%arg0: i32) -> (i32, i32, i32, i32) {
    %c0_i32 = arith.constant 0 : i32
    %c0_i32_0 = arith.constant 0 : i32
    %c0_i32_1 = arith.constant 0 : i32
    %c0_i32_2 = arith.constant 0 : i32
    return %arg0, %c0_i32, %c0_i32_0, %c0_i32_1 : i32, i32, i32, i32
  }
}

</mosaic_0001>

<bundles_post_ra>
// kernel: basic_block_forward.1
= control target key start
LH: loop header
LB: loop body
LE: loop exit
PB: predicated region body
PF: predicated region fallthrough
CT: control target
= control target key end

     0   :  { %s5308_s24 = smov 0   ;;  %s6457_s0 = inlined_call_operand.vmem [shape: bf16[2,36,9,128], index: 0, kind: input, shape index: {}]   ;;  %s6458_s1 = inlined_call_operand.vmem [shape: bf16[9,128,128], index: 1, kind: input, shape index: {}]   ;;  %s6459_s2 = inlined_call_operand.vmem [shape: f32[1,128], index: 2, kind: input, shape index: {}]   ;;  %s6460_s3 = inlined_call_operand.vmem [shape: bf16[9,128,128], index: 3, kind: input, shape index: {}]   ;;  %s6461_s4 = inlined_call_operand.vmem [shape: f32[1,128], index: 4, kind: input, shape index: {}]   ;;  %s6462_s5 = inlined_call_operand.vmem [shape: bf16[128,128], index: 5, kind: input, shape index: {}]   ;;  %s6463_s6 = inlined_call_operand.vmem [shape: f32[1,128], index: 6, kind: input, shape index: {}]   ;;  %s6464_s7 = inlined_call_operand.vmem [shape: f32[2,8,8,128], index: 7, kind: output, shape index: {}]  }
   0x1 LB: > { %s3891_s25 = sadd.s32 4294967295, %s5265_s24   ;;  %p3895_p0 = scmp.ge.s32.totalorder %s5265_s24, 1  ;;  %s5265_s24 = sphi %s5308_s24, %s17_s24  }
   0x2   : > { %p237_p1 = scmp.lt.s32.totalorder %s5265_s24, 3 }
   0x4   : > { %p238_p2 = pnand %p3895_p0, %p237_p1 }
   0x5   : > { %p269_p3 = scmp.lt.s32.totalorder (!%p238_p2), %s3891_s25, 1 }
   0x6   : > { %241 = sbr.rel (%p238_p2) target bundleno = 616 (0x268), region = 48 }
   0xb   : > { %v5053_v0 = vld [vmem:[%s6458_s1 + $0x78] sm:$0xff]  ;;  %v5052_v3 = vld [vmem:[%s6458_s1 + $0x70] sm:$0xff]  ;;  %s6476_s25 = smov (!%p269_p3, %s3891_s25), 1  ;;  %v5051_v6 = vld [vmem:[%s6458_s1 + $0x68] sm:$0xff]  ;;  %vm548_vm0 = vsmask.f32 3328 }
   0xc   : > { %v5041_v1 = vld [vmem:[%s6458_s1 + $0x38] sm:$0xff]  ;;  %402 = vmatpush.bf16.msra.mxu0 %v5053_v0  ;;  %5222 = vmatpush.bf16.msra.mxu3 %v5053_v0  ;;  %v5040_v4 = vld [vmem:[%s6458_s1 + $0x30] sm:$0xff]  ;;  %s5246_s15 = smul.u32 288, %s6476_s25  ;;  %v5039_v7 = vld [vmem:[%s6458_s1 + $0x28] sm:$0xff]  ;;  %vm549_vm1 = vsmask.f32 7440 }
   0xd   : > { %v5061_v2 = vld [vmem:[%s6458_s1 + $0xb8] sm:$0xff]  ;;  %503 = vmatpush.bf16.msra.mxu1 %v5041_v1  ;;  %v5060_v5 = vld [vmem:[%s6458_s1 + $0xb0] sm:$0xff]  ;;  %v5059_v8 = vld [vmem:[%s6458_s1 + $0xa8] sm:$0xff]  ;;  %vm1839_vm3 = vcmask 1040384   ;;  %vm1840_vm4 = vsmask.f32 256 }
   0xe   : > { %744 = vmatpush.bf16.msra.mxu2 %v5061_v2  ;;  %s5349_s26 = scalar_lea.vmem %s6457_s0, %s5246_s15  ;;  %v5050_v9 = vld [vmem:[%s6458_s1 + $0x60] sm:$0xff]  ;;  %v5049_v23 = vld [vmem:[%s6458_s1 + $0x58] sm:$0xff]  ;;  %v5048_v31 = vld [vmem:[%s6458_s1 + $0x50] sm:$0xff]  ;;  %vm1866_vm6 = vsmask.f32 7938  ;;  %vm1980_vm8 = vcmask 1043456  }
   0xf   : > { %v532_v10 = vld [vmem:[%s5349_s26] sm:$0xf]  ;;  %v534_v11 = vld [vmem:[%s5349_s26 + $0x8] sm:$0xf]  ;;  %v533_v17 = vld [vmem:[%s5349_s26 + $0x4] sm:$0x1] }
  0x10   : > { %403 = vmatpush.bf16.msra.mxu0 %v5052_v3  ;;  %5223 = vmatpush.bf16.msra.mxu3 %v5052_v3  ;;  %v5038_v12 = vld [vmem:[%s6458_s1 + $0x20] sm:$0xff]  ;;  %v552_v14 = vshrl.u32 %v532_v10, 16  ;;  %v555_v15 = vshll.u32 %v532_v10, 16  ;;  %v566_v16 = vshrl.u32 %v534_v11, 16  ;;  %v535_v18 = vld [vmem:[%s5349_s26 + $0xc] sm:$0x1]  ;;  %vm5383_vm2 = vmor %vm548_vm0, %vm549_vm1 }
  0x11   : > { %504 = vmatpush.bf16.msra.mxu1 %v5040_v4  ;;  %v5058_v13 = vld [vmem:[%s6458_s1 + $0xa0] sm:$0xff]  ;;  %v569_v19 = vshll.u32 %v534_v11, 16  ;;  %v5037_v25 = vld [vmem:[%s6458_s1 + $0x18] sm:$0xff]  ;;  %v561_v28 = vshll.u32 %v533_v17, 16  ;;  %v575_v29 = vshll.u32 %v535_v18, 16  ;;  %v5036_v32 = vld [vmem:[%s6458_s1 + $0x10] sm:$0xff] }
  0x12   : > { %745 = vmatpush.bf16.msra.mxu2 %v5060_v5  ;;  %v554_v20 = vrot.slane %v552_v14, 4  ;;  %v557_v21 = vrot.slane %v555_v15, 5  ;;  %v568_v22 = vrot.slane %v566_v16, 4  ;;  %v5057_v26 = vld [vmem:[%s6458_s1 + $0x98] sm:$0xff]  ;;  %v5056_v33 = vld [vmem:[%s6458_s1 + $0x90] sm:$0xff]  ;;  %v5047_v41 = vld [vmem:[%s6458_s1 + $0x48] sm:$0xff] }
  0x13   : > { %v571_v24 = vrot.slane %v569_v19, 5  ;;  %v563_v35 = vrot.slane %v561_v28, 5  ;;  %v577_v37 = vrot.slane %v575_v29, 5  ;;  %v536_v38 = vld [vmem:[%s5349_s26 + $0x10] sm:$0xf]  ;;  %v5035_v42 = vld [vmem:[%s6458_s1 + $0x8] sm:$0xff]  ;;  %vm5795_vm5 = vmand %vm1839_vm3, %vm1840_vm4 }
  0x14   : > { %404 = vmatpush.bf16.msra.mxu0 %v5051_v6  ;;  %5224 = vmatpush.bf16.msra.mxu3 %v5051_v6  ;;  %v558_v27 = vor.u32 %v557_v21, %v554_v20  ;;  %v538_v40 = vld [vmem:[%s5349_s26 + $0x18] sm:$0xf]  ;;  %v5055_v43 = vld [vmem:[%s6458_s1 + $0x88] sm:$0xff]  ;;  %v580_v44 = vshrl.u32 %v536_v38, 16  ;;  %v583_v45 = vshll.u32 %v536_v38, 16  ;;  %v5046_v50 = vld [vmem:[%s6458_s1 + $0x40] sm:$0xff] }
  0x15   : > { %505 = vmatpush.bf16.msra.mxu1 %v5039_v7  ;;  %v572_v30 = vor.u32 %v571_v24, %v568_v22  ;;  %v594_v48 = vshrl.u32 %v538_v40, 16  ;;  %v597_v49 = vshll.u32 %v538_v40, 16  ;;  %v5034_v51 = vld [vmem:[%s6458_s1] sm:$0xff]  ;;  %v3925_v52 = vld [vmem:[%s5349_s26 + $0x48] sm:$0xf]  ;;  %v5073_v61 = vld [vmem:[%s6458_s1 + $0xf8] sm:$0xff] }
  0x16   : > { %746 = vmatpush.bf16.msra.mxu2 %v5059_v8  ;;  %v559_v34 = vrot.slane %v558_v27, 4  ;;  %v5042_v53 = vld [vmem:[%s5349_s26 + $0x4c] sm:$0xf0]  ;;  %v3933_v54 = vld [vmem:[%s5349_s26 + $0x68] sm:$0xf]  ;;  %v5054_v60 = vld [vmem:[%s6458_s1 + $0x80] sm:$0xff] }
  0x17   : > { %v573_v36 = vrot.slane %v572_v30, 4  ;;  %v5044_v55 = vld [vmem:[%s5349_s26 + $0x6c] sm:$0xf0]  ;;  %v3973_v56 = vld [vmem:[%s5349_s26] sm:$0xf]  ;;  %v582_v62 = vrot.slane %v580_v44, 4  ;;  %v3926_v5 = vor.u32 %v5042_v53, %v3925_v52  ;;  %vm5805_vm7 = vmand %vm1839_vm3, %vm1866_vm6 }
  0x18   : > { %405 = vmatpush.bf16.msra.mxu0 %v5050_v9  ;;  %5225 = vmatpush.bf16.msra.mxu3 %v5050_v9  ;;  %v564_v46 = vsel %vm5383_vm2, %v559_v34, %v563_v35  ;;  %v5030_v57 = vld [vmem:[%s5349_s26 + $0x4] sm:$0xf0]  ;;  %v585_v63 = vrot.slane %v583_v45, 5  ;;  %v596_v0 = vrot.slane %v594_v48, 4  ;;  %v599_v1 = vrot.slane %v597_v49, 5  ;;  %v5085_v2 = vld [vmem:[%s6458_s1 + $0x138] sm:$0xff]  ;;  %vm5936_vm9 = vmand %vm1980_vm8, %vm1866_vm6 }
  0x19   : > { %506 = vmatpush.bf16.msra.mxu1 %v5038_v12  ;;  %v578_v47 = vsel %vm5383_vm2, %v573_v36, %v577_v37  ;;  %v680_v58 = vunpack.c.l.b16 %v564_v46  ;;  %v537_v3 = vld [vmem:[%s5349_s26 + $0x14] sm:$0x1]  ;;  %v539_v4 = vld [vmem:[%s5349_s26 + $0x1c] sm:$0x1]  ;;  %v3934_v6 = vor.u32 %v5044_v55, %v3933_v54  ;;  %v3974_v7 = vor.u32 %v5030_v57, %v3973_v56  ;;  %v540_v17 = vld [vmem:[%s5349_s26 + $0x20] sm:$0xf] }
  0x1a   : > { %747 = vmatpush.bf16.msra.mxu2 %v5058_v13  ;;  %v681_v59 = vunpack.c.l.b16 %v578_v47  ;;  %v586_v9 = vor.u32 %v585_v63, %v582_v62  ;;  %v589_v10 = vshll.u32 %v537_v3, 16  ;;  %v600_v11 = vor.u32 %v599_v1, %v596_v0  ;;  %v5105_v13 = vld [vmem:[%s6458_s1 + $0x1b8] sm:$0xff]  ;;  %v5072_v14 = vld [vmem:[%s6458_s1 + $0xf0] sm:$0xff]  ;;  %v542_v18 = vld [vmem:[%s5349_s26 + $0x28] sm:$0xf]  ;;  %s5029_s15 = sshll.u32 %s6476_s25, 6 }
  0x1b   : > { %v603_v12 = vshll.u32 %v539_v4, 16  ;;  %v5084_v15 = vld [vmem:[%s6458_s1 + $0x130] sm:$0xff]  ;;  %v5093_v16 = vld [vmem:[%s6458_s1 + $0x178] sm:$0xff]  ;;  %v608_v27 = vshrl.u32 %v540_v17, 16  ;;  %v611_v28 = vshll.u32 %v540_v17, 16  ;;  %v622_v29 = vshrl.u32 %v542_v18, 16  ;;  %s6418_s18 = scalar_lea.vmem %s6464_s7, %s5029_s15 }
  0x1c   : > { %406 = vmatpush.bf16.msra.mxu0 %v5049_v23  ;;  %5226 = vmatpush.bf16.msra.mxu3 %v5049_v23  ;;  %v688_v8 = vpack.c.b16 %v681_v59, %v680_v58  ;;  %v587_v19 = vrot.slane %v586_v9, 4  ;;  %v591_v20 = vrot.slane %v589_v10, 5  ;;  %v601_v21 = vrot.slane %v600_v11, 4  ;;  %v5092_v23 = vld [vmem:[%s6458_s1 + $0x170] sm:$0xff]  ;;  %v5091_v35 = vld [vmem:[%s6458_s1 + $0x168] sm:$0xff]  ;;  %v5090_v52 = vld [vmem:[%s6458_s1 + $0x160] sm:$0xff] }
  0x1d   : > { %507 = vmatpush.bf16.msra.mxu1 %v5037_v25  ;;  %v605_v22 = vrot.slane %v603_v12, 5  ;;  %v5104_v24 = vld [vmem:[%s6458_s1 + $0x1b0] sm:$0xff]  ;;  %v5071_v25 = vld [vmem:[%s6458_s1 + $0xe8] sm:$0xff]  ;;  %v625_v30 = vshll.u32 %v542_v18, 16  ;;  %v3929_v37 = vld [vmem:[%s5349_s26 + $0x58] sm:$0xf] }
  0x1e   : > { %748 = vmatpush.bf16.msra.mxu2 %v5057_v26  ;;  %v5083_v26 = vld [vmem:[%s6458_s1 + $0x128] sm:$0xff]  ;;  %v5043_v38 = vld [vmem:[%s5349_s26 + $0x5c] sm:$0xf0]  ;;  %v3937_v40 = vld [vmem:[%s5349_s26 + $0x78] sm:$0xf]  ;;  %v624_v44 = vrot.slane %v622_v29, 4 }
  0x1f   : > { %v606_v34 = vsel %vm5383_vm2, %v601_v21, %v605_v22  ;;  %v5103_v36 = vld [vmem:[%s6458_s1 + $0x1a8] sm:$0xff]  ;;  %v627_v45 = vrot.slane %v625_v30, 5  ;;  %v3977_v46 = vld [vmem:[%s5349_s26 + $0x10] sm:$0xf]  ;;  %v541_v49 = vld [vmem:[%s5349_s26 + $0x24] sm:$0x1]  ;;  %v3930_v54 = vor.u32 %v5043_v38, %v3929_v37 }
  0x20   : > { %407 = vmatpush.bf16.msra.mxu0 %v5048_v31  ;;  %5227 = vmatpush.bf16.msra.mxu3 %v5048_v31  ;;  %v5070_v31 = vld [vmem:[%s6458_s1 + $0xe0] sm:$0xff]  ;;  %v683_v48 = vunpack.c.l.b16 %v606_v34  ;;  %v5069_v56 = vld [vmem:[%s6458_s1 + $0xd8] sm:$0xff]  ;;  %v617_v59 = vshll.u32 %v541_v49, 16  ;;  %v5068_v0 = vld [vmem:[%s6458_s1 + $0xd0] sm:$0xff]  ;;  %vm2409_vm10 = vcmask 1042432   ;;  %vm2410_vm11 = vcmask 1046532  }
  0x21   : > { %508 = vmatpush.bf16.msra.mxu1 %v5036_v32  ;;  %v5082_v32 = vld [vmem:[%s6458_s1 + $0x120] sm:$0xff]  ;;  %v5081_v57 = vld [vmem:[%s6458_s1 + $0x118] sm:$0xff]  ;;  %v5080_v1 = vld [vmem:[%s6458_s1 + $0x110] sm:$0xff] }
  0x22   : > { %749 = vmatpush.bf16.msra.mxu2 %v5056_v33  ;;  %v592_v33 = vsel %vm5383_vm2, %v587_v19, %v591_v20  ;;  %v5102_v53 = vld [vmem:[%s6458_s1 + $0x1a0] sm:$0xff]  ;;  %v619_v3 = vrot.slane %v617_v59, 5  ;;  %v546_v9 = vld [vmem:[%s5349_s26 + $0x38] sm:$0xf]  ;;  %v5088_v10 = vld [vmem:[%s6458_s1 + $0x150] sm:$0xff] }
  0x23   : > { %v682_v47 = vunpack.c.l.b16 %v592_v33  ;;  %v5100_v11 = vld [vmem:[%s6458_s1 + $0x190] sm:$0xff]  ;;  %v5067_v12 = vld [vmem:[%s6458_s1 + $0xc8] sm:$0xff]  ;;  %v5078_v17 = vld [vmem:[%s6458_s1 + $0x100] sm:$0xff]  ;;  %v650_v20 = vshrl.u32 %v546_v9, 16  ;;  %v653_v21 = vshll.u32 %v546_v9, 16 }
  0x24   : > { %408 = vmatpush.bf16.msra.mxu0 %v5047_v41  ;;  %5228 = vmatpush.bf16.msra.mxu3 %v5047_v41  ;;  %v5045_v41 = vld [vmem:[%s5349_s26 + $0x7c] sm:$0xf0]  ;;  %v5125_v33 = vld [vmem:[%s6458_s1 + $0x238] sm:$0xff]  ;;  %v545_v34 = vld [vmem:[%s5349_s26 + $0x34] sm:$0x1] }
  0x25   : > { %509 = vmatpush.bf16.msra.mxu1 %v5035_v42  ;;  %v610_v42 = vrot.slane %v608_v27, 4  ;;  %v3938_v55 = vor.u32 %v5045_v41, %v3937_v40  ;;  %v689_v63 = vpack.c.b16 %v683_v48, %v682_v47  ;;  %v3981_v22 = vld [vmem:[%s5349_s26 + $0x20] sm:$0xf]  ;;  %v5062_v27 = vld [vmem:[%s5349_s26 + $0x94] sm:$0xf0]  ;;  %v652_v37 = vrot.slane %v650_v20, 4  ;;  %vm5969_vm12 = vmor %vm2409_vm10, %vm2410_vm11 }
  0x26   : > { %750 = vmatpush.bf16.msra.mxu2 %v5055_v43  ;;  %v613_v43 = vrot.slane %v611_v28, 5  ;;  %v4165_v28 = vld [vmem:[%s5349_s26 + $0xd8] sm:$0xf]  ;;  %v655_v38 = vrot.slane %v653_v21, 5  ;;  %v547_v40 = vld [vmem:[%s5349_s26 + $0x3c] sm:$0x1] }
  0x27   : > { %v5086_v41 = vld [vmem:[%s6458_s1 + $0x140] sm:$0xff]  ;;  %v645_v48 = vshll.u32 %v545_v34, 16  ;;  %v4211_v59 = vld [vmem:[%s5349_s26 + $0x90] sm:$0xf]  ;;  %v4214_v20 = vld [vmem:[%s5349_s26 + $0x9c] sm:$0x1] }
  0x28   : > { %409 = vmatpush.bf16.msra.mxu0 %v5046_v50  ;;  %5229 = vmatpush.bf16.msra.mxu3 %v5046_v50  ;;  %v543_v50 = vld [vmem:[%s5349_s26 + $0x2c] sm:$0x1]  ;;  %v614_v58 = vor.u32 %v613_v43, %v610_v42  ;;  %v5098_v42 = vld [vmem:[%s6458_s1 + $0x180] sm:$0xff]  ;;  %v656_v49 = vor.u32 %v655_v38, %v652_v37 }
  0x29   : > { %510 = vmatpush.bf16.msra.mxu1 %v5034_v51  ;;  %v5031_v51 = vld [vmem:[%s5349_s26 + $0x14] sm:$0xf0]  ;;  %v5111_v37 = vld [vmem:[%s6458_s1 + $0x1c8] sm:$0xff] }
  0x2a   : > { %751 = vmatpush.bf16.msra.mxu2 %v5054_v60  ;;  %v628_v60 = vor.u32 %v627_v45, %v624_v44  ;;  %v3978_v62 = vor.u32 %v5031_v51, %v3977_v46  ;;  %v5116_v51 = vld [vmem:[%s6458_s1 + $0x1f0] sm:$0xff] }
  0x2b   : > { %410 = vmatmul.bf16.vlgmr.msra.gmra.mxu0 %v3926_v5  ;;  %420 = vmatmul.bf16.vlgmr.msra.gmra.mxu3 %v3934_v6  ;;  %v5089_v6 = vld [vmem:[%s6458_s1 + $0x158] sm:$0xff] }
  0x2c   : > { %879 = vmatpush.bf16.msrb.mxu3 %v5073_v61  ;;  %1014 = vmatpush.bf16.msrb.mxu0 %v5085_v2  ;;  %v631_v61 = vshll.u32 %v543_v50, 16  ;;  %v615_v2 = vrot.slane %v614_v58, 4  ;;  %v629_v4 = vrot.slane %v628_v60, 4  ;;  %v659_v50 = vshll.u32 %v547_v40, 16  ;;  %v5123_v58 = vld [vmem:[%s6458_s1 + $0x228] sm:$0xff] }
  0x2d   : > { %511 = vmatmul.bf16.vlgmr.msra.gmra.mxu1 %v3974_v7  ;;  %752 = vmatmul.bf16.vlgmr.msra.gmra.mxu2 %v688_v8  ;;  %v5101_v7 = vld [vmem:[%s6458_s1 + $0x198] sm:$0xff]  ;;  %v544_v8 = vld [vmem:[%s5349_s26 + $0x30] sm:$0xf] }
  0x2e   : > { %1395 = vmatpush.bf16.msrb.mxu2 %v5105_v13  ;;  %1260 = vmatpush.bf16.msrb.mxu1 %v5093_v16  ;;  %v633_v5 = vrot.slane %v631_v61, 5  ;;  %v5079_v13 = vld [vmem:[%s6458_s1 + $0x108] sm:$0xff]  ;;  %v5066_v16 = vld [vmem:[%s6458_s1 + $0xc0] sm:$0xff]  ;;  %v636_v18 = vshrl.u32 %v544_v8, 16  ;;  %v639_v19 = vshll.u32 %v544_v8, 16 }
  0x2f   : > { %v4213_v60 = vld [vmem:[%s5349_s26 + $0x98] sm:$0xf] }
  0x30   : > { %880 = vmatpush.bf16.msrb.mxu3 %v5072_v14  ;;  %1015 = vmatpush.bf16.msrb.mxu0 %v5084_v15  ;;  %v620_v14 = vsel %vm5383_vm2, %v615_v2, %v619_v3  ;;  %v634_v15 = vsel %vm5383_vm2, %v629_v4, %v633_v5  ;;  %v1082_v2 = vshrl.u32 %v4213_v60, 16  ;;  %v1085_v3 = vshll.u32 %v4213_v60, 16  ;;  %v5122_v4 = vld [vmem:[%s6458_s1 + $0x220] sm:$0xff]  ;;  %v3985_v5 = vld [vmem:[%s5349_s26 + $0x30] sm:$0xf] }
  0x31   : > { %v684_v29 = vunpack.c.l.b16 %v620_v14  ;;  %v685_v30 = vunpack.c.l.b16 %v634_v15  ;;  %v4301_v60 = vld [vmem:[%s5349_s26 + $0x8] sm:$0xf] }
  0x32   : > { %1261 = vmatpush.bf16.msrb.mxu1 %v5092_v23  ;;  %1396 = vmatpush.bf16.msrb.mxu2 %v5104_v24  ;;  %v5032_v23 = vld [vmem:[%s5349_s26 + $0x24] sm:$0xf0]  ;;  %v1084_v15 = vrot.slane %v1082_v2, 4 }
  0x33   : > { %v5087_v24 = vld [vmem:[%s6458_s1 + $0x148] sm:$0xff]  ;;  %v3982_v43 = vor.u32 %v5032_v23, %v3981_v22  ;;  %v690_v44 = vpack.c.b16 %v685_v30, %v684_v29  ;;  %v5112_v29 = vld [vmem:[%s6458_s1 + $0x1d0] sm:$0xff]  ;;  %v4215_v30 = vld [vmem:[%s5349_s26 + $0xa0] sm:$0xf] }
  0x34   : > { %881 = vmatpush.bf16.msrb.mxu3 %v5071_v25  ;;  %1016 = vmatpush.bf16.msrb.mxu0 %v5083_v26  ;;  %v5099_v25 = vld [vmem:[%s6458_s1 + $0x188] sm:$0xff]  ;;  %v4093_v26 = vld [vmem:[%s5349_s26 + $0x90] sm:$0xf]  ;;  %v1096_v38 = vshrl.u32 %v4215_v30, 16  ;;  %v1099_v40 = vshll.u32 %v4215_v30, 16 }
  0x35   : > { %v4094_v45 = vor.u32 %v5062_v27, %v4093_v26  ;;  %v4305_v30 = vld [vmem:[%s5349_s26 + $0x18] sm:$0xf] }
  0x36   : > { %1262 = vmatpush.bf16.msrb.mxu1 %v5091_v35  ;;  %1397 = vmatpush.bf16.msrb.mxu2 %v5103_v36  ;;  %v638_v35 = vrot.slane %v636_v18, 4  ;;  %v641_v36 = vrot.slane %v639_v19, 5  ;;  %v5121_v18 = vld [vmem:[%s6458_s1 + $0x218] sm:$0xff]  ;;  %v4212_v19 = vld [vmem:[%s5349_s26 + $0x94] sm:$0x1] }
  0x37   : > { %v1077_v26 = vshll.u32 %v4212_v19, 16 }
  0x38   : > { %882 = vmatpush.bf16.msrb.mxu3 %v5070_v31  ;;  %1017 = vmatpush.bf16.msrb.mxu0 %v5082_v32  ;;  %v5074_v31 = vld [vmem:[%s5349_s26 + $0xdc] sm:$0xf0]  ;;  %v5117_v32 = vld [vmem:[%s6458_s1 + $0x1f8] sm:$0xff]  ;;  %v642_v47 = vor.u32 %v641_v36, %v638_v35 }
  0x39   : > { %v4166_v46 = vor.u32 %v5074_v31, %v4165_v28  ;;  %v1091_v28 = vshll.u32 %v4214_v20, 16  ;;  %v4217_v31 = vld [vmem:[%s5349_s26 + $0xa8] sm:$0xf]  ;;  %v1079_v34 = vrot.slane %v1077_v26, 5 }
  0x3a   : > { %1263 = vmatpush.bf16.msrb.mxu1 %v5090_v52  ;;  %1398 = vmatpush.bf16.msrb.mxu2 %v5102_v53  ;;  %v5124_v52 = vld [vmem:[%s6458_s1 + $0x230] sm:$0xff]  ;;  %v643_v53 = vrot.slane %v642_v47, 4  ;;  %v1098_v47 = vrot.slane %v1096_v38, 4  ;;  %v4177_v26 = vld [vmem:[%s5349_s26 + $0x108] sm:$0xf] }
  0x3b   : > { %415 = vmatmul.bf16.gmra.mxu0 %v3930_v54  ;;  %425 = vmatmul.bf16.gmra.mxu3 %v3938_v55  ;;  %v647_v54 = vrot.slane %v645_v48, 5  ;;  %v657_v55 = vrot.slane %v656_v49, 4  ;;  %v1093_v36 = vrot.slane %v1091_v28, 5  ;;  %v1101_v48 = vrot.slane %v1099_v40, 5  ;;  %v4420_v38 = vld [vmem:[%s5349_s26 + $0xc] sm:$0x1] }
  0x3c   : > { %883 = vmatpush.bf16.msrb.mxu3 %v5069_v56  ;;  %1018 = vmatpush.bf16.msrb.mxu0 %v5081_v57  ;;  %v661_v56 = vrot.slane %v659_v50, 5  ;;  %v5115_v57 = vld [vmem:[%s6458_s1 + $0x1e8] sm:$0xff] }
  0x3d   : > { %516 = vmatmul.bf16.gmra.mxu1 %v3978_v62  ;;  %757 = vmatmul.bf16.gmra.mxu2 %v689_v63  ;;  %v648_v61 = vsel %vm5383_vm2, %v643_v53, %v647_v54  ;;  %v5114_v63 = vld [vmem:[%s6458_s1 + $0x1e0] sm:$0xff]  ;;  %v4218_v54 = vld [vmem:[%s5349_s26 + $0xac] sm:$0x1] }
  0x3e   : > { %1264 = vmatpush.bf16.msrb.mxu1 %v5089_v6  ;;  %1399 = vmatpush.bf16.msrb.mxu2 %v5101_v7  ;;  %v662_v62 = vsel %vm5383_vm2, %v657_v55, %v661_v56  ;;  %v5033_v6 = vld [vmem:[%s5349_s26 + $0x34] sm:$0xf0]  ;;  %v4097_v7 = vld [vmem:[%s5349_s26 + $0xa0] sm:$0xf]  ;;  %v686_v8 = vunpack.c.l.b16 %v648_v61  ;;  %v4216_v53 = vld [vmem:[%s5349_s26 + $0xa4] sm:$0x1] }
  0x3f   : > { %v687_v9 = vunpack.c.l.b16 %v662_v62  ;;  %v3986_v23 = vor.u32 %v5033_v6, %v3985_v5  ;;  %v5064_v55 = vld [vmem:[%s5349_s26 + $0xb4] sm:$0xf0]  ;;  %v5094_v61 = vld [vmem:[%s5349_s26 + $0xc] sm:$0xf0]  ;;  %v1102_v62 = vor.u32 %v1101_v48, %v1098_v47 }
  0x40   : > { %884 = vmatpush.bf16.msrb.mxu3 %v5068_v0  ;;  %1019 = vmatpush.bf16.msrb.mxu0 %v5080_v1  ;;  %v1068_v0 = vshrl.u32 %v4211_v59, 16  ;;  %v1071_v1 = vshll.u32 %v4211_v59, 16  ;;  %v4173_v56 = vld [vmem:[%s5349_s26 + $0xf8] sm:$0xf]  ;;  %v4302_v5 = vor.u32 %v5094_v61, %v4301_v60 }
  0x41   : > { %v1103_v6 = vrot.slane %v1102_v62, 4  ;;  %v4423_v61 = vld [vmem:[%s5349_s26 + $0x18] sm:$0xf]  ;;  %v4425_v62 = vld [vmem:[%s5349_s26 + $0x20] sm:$0xf] }
  0x42   : > { %1265 = vmatpush.bf16.msrb.mxu1 %v5088_v10  ;;  %1400 = vmatpush.bf16.msrb.mxu2 %v5100_v11  ;;  %v5063_v10 = vld [vmem:[%s5349_s26 + $0xa4] sm:$0xf0]  ;;  %v1073_v14 = vrot.slane %v1071_v1, 5  ;;  %v1119_v1 = vshll.u32 %v4218_v54, 16 }
  0x43   : > { %v4169_v11 = vld [vmem:[%s5349_s26 + $0xe8] sm:$0xf]  ;;  %v4098_v21 = vor.u32 %v5063_v10, %v4097_v7  ;;  %v4219_v10 = vld [vmem:[%s5349_s26 + $0xb0] sm:$0xf] }
  0x44   : > { %885 = vmatpush.bf16.msrb.mxu3 %v5067_v12  ;;  %1020 = vmatpush.bf16.msrb.mxu0 %v5079_v13  ;;  %v5075_v12 = vld [vmem:[%s5349_s26 + $0xec] sm:$0xf0]  ;;  %v1070_v13 = vrot.slane %v1068_v0, 4 }
  0x45   : > { %v4170_v22 = vor.u32 %v5075_v12, %v4169_v11  ;;  %v4221_v11 = vld [vmem:[%s5349_s26 + $0xb8] sm:$0xf]  ;;  %v4419_v12 = vld [vmem:[%s5349_s26 + $0x8] sm:$0xf] }
  0x46   : > { %1266 = vmatpush.bf16.msrb.mxu1 %v5087_v24  ;;  %1401 = vmatpush.bf16.msrb.mxu2 %v5099_v25  ;;  %v691_v24 = vpack.c.b16 %v687_v9, %v686_v8  ;;  %v1074_v25 = vor.u32 %v1073_v14, %v1070_v13  ;;  %v1121_v9 = vrot.slane %v1119_v1, 5  ;;  %v4421_v13 = vld [vmem:[%s5349_s26 + $0x10] sm:$0xf]  ;;  %v1141_v19 = vshll.u32 %v4221_v11, 16 }
  0x47   : > { %v1584_v20 = vshrl.u32 %v4419_v12, 16 }
  0x48   : > { %886 = vmatpush.bf16.msrb.mxu3 %v5066_v16  ;;  %1021 = vmatpush.bf16.msrb.mxu0 %v5078_v17  ;;  %v1087_v16 = vrot.slane %v1085_v3, 5  ;;  %v5113_v17 = vld [vmem:[%s6458_s1 + $0x1d8] sm:$0xff] }
  0x49   : > { %v1586_v40 = vrot.slane %v1584_v20, 4 }
  0x4a   : > { %1267 = vmatpush.bf16.msrb.mxu1 %v5086_v41  ;;  %1402 = vmatpush.bf16.msrb.mxu2 %v5098_v42  ;;  %v1088_v27 = vor.u32 %v1087_v16, %v1084_v15  ;;  %v1110_v41 = vshrl.u32 %v4217_v31, 16  ;;  %v1113_v42 = vshll.u32 %v4217_v31, 16  ;;  %v1124_v16 = vshrl.u32 %v4219_v10, 16  ;;  %v5095_v31 = vld [vmem:[%s5349_s26 + $0x1c] sm:$0xf0] }
  0x4b   : > { %887 = vmatmul.bf16.vlgmr.msrb.gmra.mxu3 %v4094_v45  ;;  %1022 = vmatmul.bf16.vlgmr.msrb.gmra.mxu0 %v4166_v46  ;;  %v5110_v46 = vld [vmem:[%s6458_s1 + $0x1c0] sm:$0xff] }
  0x4c   : > { %1530 = vmatpush.bf16.msra.mxu3 %v5117_v32  ;;  %1776 = vmatpush.bf16.msra.mxu0 %v5125_v33  ;;  %v5120_v32 = vld [vmem:[%s6458_s1 + $0x210] sm:$0xff]  ;;  %v1075_v33 = vrot.slane %v1074_v25, 4  ;;  %v1089_v35 = vrot.slane %v1088_v27, 4  ;;  %v1112_v49 = vrot.slane %v1110_v41, 4  ;;  %v1115_v50 = vrot.slane %v1113_v42, 5 }
  0x4d   : > { %521 = vmatmul.bf16.gmra.mxu1 %v3982_v43  ;;  %762 = vmatmul.bf16.gmra.mxu2 %v690_v44  ;;  %v5119_v43 = vld [vmem:[%s6458_s1 + $0x208] sm:$0xff]  ;;  %v5077_v27 = vld [vmem:[%s5349_s26 + $0x10c] sm:$0xf0] }
  0x4e   : > { %v1080_v44 = vsel %vm5383_vm2, %v1075_v33, %v1079_v34  ;;  %v1094_v45 = vsel %vm5383_vm2, %v1089_v35, %v1093_v36  ;;  %v1116_v0 = vor.u32 %v1115_v50, %v1112_v49  ;;  %v5065_v25 = vld [vmem:[%s5349_s26 + $0xc4] sm:$0xf0]  ;;  %v4222_v33 = vld [vmem:[%s5349_s26 + $0xbc] sm:$0x1]  ;;  %v1126_v34 = vrot.slane %v1124_v16, 4 }
  0x4f   : > { %v1197_v59 = vunpack.c.l.b16 %v1094_v45  ;;  %v1147_v48 = vshll.u32 %v4222_v33, 16  ;;  %v4306_v50 = vor.u32 %v5095_v31, %v4305_v30  ;;  %v5096_v30 = vld [vmem:[%s5349_s26 + $0x2c] sm:$0xf0] }
  0x50   : > { %1531 = vmatpush.bf16.msra.mxu3 %v5116_v51  ;;  %1777 = vmatpush.bf16.msra.mxu0 %v5124_v52  ;;  %v5118_v51 = vld [vmem:[%s6458_s1 + $0x200] sm:$0xff]  ;;  %v4101_v52 = vld [vmem:[%s5349_s26 + $0xb0] sm:$0xf]  ;;  %v1117_v8 = vrot.slane %v1116_v0, 4 }
  0x51   : > { %v4102_v2 = vor.u32 %v5064_v55, %v4101_v52  ;;  %v1593_v52 = vshll.u32 %v4420_v38, 16 }
  0x52   : > { %v1122_v15 = vsel %vm5383_vm2, %v1117_v8, %v1121_v9  ;;  %v1629_v8 = vshll.u32 %v4425_v62, 16 }
  0x53   : > { %v1595_v60 = vrot.slane %v1593_v52, 5 }
  0x54   : > { %1532 = vmatpush.bf16.msra.mxu3 %v5115_v57  ;;  %1778 = vmatpush.bf16.msra.mxu0 %v5123_v58  ;;  %v5076_v57 = vld [vmem:[%s5349_s26 + $0xfc] sm:$0xf0]  ;;  %v1196_v58 = vunpack.c.l.b16 %v1080_v44  ;;  %v4422_v44 = vld [vmem:[%s5349_s26 + $0x14] sm:$0x1]  ;;  %v1631_v20 = vrot.slane %v1629_v8, 5 }
  0x55   : > { %v4174_v3 = vor.u32 %v5076_v57, %v4173_v56  ;;  %v1607_v56 = vshll.u32 %v4422_v44, 16 }
  0x58   : > { %1533 = vmatpush.bf16.msra.mxu3 %v5114_v63  ;;  %1779 = vmatpush.bf16.msra.mxu0 %v5122_v4  ;;  %v1105_v63 = vshll.u32 %v4216_v53, 16  ;;  %v1204_v4 = vpack.c.b16 %v1197_v59, %v1196_v58  ;;  %v1149_v58 = vrot.slane %v1147_v48, 5 }
  0x5a   : > { %v1107_v7 = vrot.slane %v1105_v63, 5 }
  0x5b   : > { %892 = vmatmul.bf16.gmra.mxu3 %v4098_v21  ;;  %1027 = vmatmul.bf16.gmra.mxu0 %v4170_v22  ;;  %v1587_v21 = vshll.u32 %v4419_v12, 16  ;;  %v1598_v22 = vshrl.u32 %v4421_v13, 16 }
  0x5c   : > { %1534 = vmatpush.bf16.msra.mxu3 %v5113_v17  ;;  %1780 = vmatpush.bf16.msra.mxu0 %v5121_v18  ;;  %v1108_v14 = vsel %vm5383_vm2, %v1103_v6, %v1107_v7  ;;  %v1127_v17 = vshll.u32 %v4219_v10, 16  ;;  %v1138_v18 = vshrl.u32 %v4221_v11, 16  ;;  %v1615_v6 = vshll.u32 %v4423_v61, 16 }
  0x5d   : > { %526 = vmatmul.bf16.gmra.mxu1 %v3986_v23  ;;  %767 = vmatmul.bf16.gmra.mxu2 %v691_v24  ;;  %v1601_v23 = vshll.u32 %v4421_v13, 16  ;;  %v4105_v24 = vld [vmem:[%s5349_s26 + $0xc0] sm:$0xf]  ;;  %v1198_v28 = vunpack.c.l.b16 %v1108_v14  ;;  %v1589_v41 = vrot.slane %v1587_v21, 5  ;;  %v1600_v42 = vrot.slane %v1598_v22, 4 }
  0x5e   : > { %v1129_v35 = vrot.slane %v1127_v17, 5  ;;  %v1140_v36 = vrot.slane %v1138_v18, 4  ;;  %v4106_v45 = vor.u32 %v5065_v25, %v4105_v24  ;;  %v1626_v7 = vshrl.u32 %v4425_v62, 16  ;;  %v4426_v24 = vld [vmem:[%s5349_s26 + $0x24] sm:$0x1] }
  0x5f   : > { %v1590_v54 = vor.u32 %v1589_v41, %v1586_v40  ;;  %v1617_v18 = vrot.slane %v1615_v6, 5  ;;  %v1635_v41 = vshll.u32 %v4426_v24, 16 }
  0x60   : > { %1535 = vmatpush.bf16.msra.mxu3 %v5112_v29  ;;  %1781 = vmatpush.bf16.msra.mxu0 %v5120_v32  ;;  %v1199_v29 = vunpack.c.l.b16 %v1122_v15  ;;  %v4220_v32 = vld [vmem:[%s5349_s26 + $0xb4] sm:$0x1] }
  0x61   : > { %v1133_v47 = vshll.u32 %v4220_v32, 16  ;;  %v1591_v0 = vrot.slane %v1590_v54, 4  ;;  %v4427_v54 = vld [vmem:[%s5349_s26 + $0x28] sm:$0xf] }
  0x62   : > { %v1205_v49 = vpack.c.b16 %v1199_v29, %v1198_v28  ;;  %v4373_v28 = vld [vmem:[%s5349_s26 + $0x50] sm:$0xf]  ;;  %v5106_v29 = vld [vmem:[%s5349_s26 + $0x54] sm:$0xf0]  ;;  %v1640_v62 = vshrl.u32 %v4427_v54, 16 }
  0x63   : > { %v1135_v57 = vrot.slane %v1133_v47, 5  ;;  %v1596_v11 = vsel %vm5383_vm2, %v1591_v0, %v1595_v60 }
  0x64   : > { %1536 = vmatpush.bf16.msra.mxu3 %v5111_v37  ;;  %1782 = vmatpush.bf16.msra.mxu0 %v5119_v43  ;;  %v1143_v37 = vrot.slane %v1141_v19, 5  ;;  %v1603_v43 = vrot.slane %v1601_v23, 5  ;;  %v1628_v19 = vrot.slane %v1626_v7, 4  ;;  %v1712_v21 = vunpack.c.l.b16 %v1596_v11  ;;  %v4424_v23 = vld [vmem:[%s5349_s26 + $0x1c] sm:$0x1] }
  0x65   : > { %v1621_v38 = vshll.u32 %v4424_v23, 16  ;;  %v5107_v7 = vld [vmem:[%s5349_s26 + $0x64] sm:$0xf0]  ;;  %v1642_v8 = vrot.slane %v1640_v62, 4 }
  0x66   : > { %v1144_v53 = vor.u32 %v1143_v37, %v1140_v36  ;;  %v1604_v55 = vor.u32 %v1603_v43, %v1600_v42  ;;  %v4226_v36 = vld [vmem:[%s5349_s26 + $0xcc] sm:$0x1]  ;;  %v1632_v40 = vor.u32 %v1631_v20, %v1628_v19  ;;  %v4374_v42 = vor.u32 %v5106_v29, %v4373_v28 }
  0x68   : > { %1537 = vmatpush.bf16.msra.mxu3 %v5110_v46  ;;  %1783 = vmatpush.bf16.msra.mxu0 %v5118_v51  ;;  %v4178_v46 = vor.u32 %v5077_v27, %v4177_v26  ;;  %v1130_v51 = vor.u32 %v1129_v35, %v1126_v34  ;;  %v1145_v63 = vrot.slane %v1144_v53, 4  ;;  %v1605_v1 = vrot.slane %v1604_v55, 4  ;;  %v4309_v27 = vld [vmem:[%s5349_s26 + $0x28] sm:$0xf]  ;;  %v4224_v35 = vld [vmem:[%s5349_s26 + $0xc4] sm:$0x1] }
  0x69   : > { %v1161_v47 = vshll.u32 %v4224_v35, 16  ;;  %v1633_v52 = vrot.slane %v1632_v40, 4  ;;  %v1637_v53 = vrot.slane %v1635_v41, 5  ;;  %v4429_v55 = vld [vmem:[%s5349_s26 + $0x30] sm:$0xf] }
  0x6a   : > { %v1131_v59 = vrot.slane %v1130_v51, 4  ;;  %v1150_v10 = vsel %vm5383_vm2, %v1145_v63, %v1149_v58  ;;  %v1623_v51 = vrot.slane %v1621_v38, 5  ;;  %v1643_v63 = vshll.u32 %v4427_v54, 16  ;;  %v4381_v38 = vld [vmem:[%s5349_s26 + $0x70] sm:$0xf] }
  0x6b   : > { %897 = vmatmul.bf16.gmra.mxu3 %v4102_v2  ;;  %1032 = vmatmul.bf16.gmra.mxu0 %v4174_v3  ;;  %v1609_v2 = vrot.slane %v1607_v56, 5  ;;  %v4223_v3 = vld [vmem:[%s5349_s26 + $0xc0] sm:$0xf]  ;;  %v1201_v26 = vunpack.c.l.b16 %v1150_v10  ;;  %v1654_v0 = vshrl.u32 %v4429_v55, 16 }
  0x6c   : > { %v1136_v9 = vsel %vm5383_vm2, %v1131_v59, %v1135_v57  ;;  %v1152_v13 = vshrl.u32 %v4223_v3, 16  ;;  %v1155_v14 = vshll.u32 %v4223_v3, 16  ;;  %v1163_v57 = vrot.slane %v1161_v47, 5  ;;  %v4432_v47 = vld [vmem:[%s5349_s26 + $0x3c] sm:$0x1] }
  0x6d   : > { %1268 = vmatmul.bf16.vlgmr.msrb.gmra.mxu1 %v1204_v4  ;;  %1403 = vmatmul.bf16.vlgmr.msrb.gmra.mxu2 %v4302_v5  ;;  %v4225_v4 = vld [vmem:[%s5349_s26 + $0xc8] sm:$0xf]  ;;  %v1612_v5 = vshrl.u32 %v4423_v61, 16  ;;  %v1610_v12 = vsel %vm5383_vm2, %v1605_v1, %v1609_v2  ;;  %v1200_v25 = vunpack.c.l.b16 %v1136_v9  ;;  %v1638_v61 = vsel %vm5383_vm2, %v1633_v52, %v1637_v53 }
  0x6e   : > { %v1166_v15 = vshrl.u32 %v4225_v4, 16  ;;  %v1169_v16 = vshll.u32 %v4225_v4, 16  ;;  %v1713_v22 = vunpack.c.l.b16 %v1610_v12  ;;  %v1154_v31 = vrot.slane %v1152_v13, 4  ;;  %v4377_v4 = vld [vmem:[%s5349_s26 + $0x60] sm:$0xf] }
  0x6f   : > { %v1614_v17 = vrot.slane %v1612_v5, 4  ;;  %v1157_v32 = vrot.slane %v1155_v14, 5  ;;  %v1206_v44 = vpack.c.b16 %v1201_v26, %v1200_v25  ;;  %v1657_v1 = vshll.u32 %v4429_v55, 16  ;;  %v4428_v14 = vld [vmem:[%s5349_s26 + $0x2c] sm:$0x1] }
  0x70   : > { %v1168_v33 = vrot.slane %v1166_v15, 4  ;;  %v1171_v34 = vrot.slane %v1169_v16, 5  ;;  %v1720_v43 = vpack.c.b16 %v1713_v22, %v1712_v21  ;;  %v1715_v6 = vunpack.c.l.b16 %v1638_v61  ;;  %v4430_v15 = vld [vmem:[%s5349_s26 + $0x34] sm:$0x1]  ;;  %v4313_v16 = vld [vmem:[%s5349_s26 + $0x38] sm:$0xf] }
  0x71   : > { %v1618_v37 = vor.u32 %v1617_v18, %v1614_v17  ;;  %v1645_v9 = vrot.slane %v1643_v63, 5  ;;  %v1656_v10 = vrot.slane %v1654_v0, 4  ;;  %v1659_v11 = vrot.slane %v1657_v1, 5  ;;  %v5097_v17 = vld [vmem:[%s5349_s26 + $0x3c] sm:$0xf0] }
  0x72   : > { %v1172_v48 = vor.u32 %v1171_v34, %v1168_v33  ;;  %v4378_v18 = vor.u32 %v5107_v7, %v4377_v4  ;;  %v1649_v21 = vshll.u32 %v4428_v14, 16  ;;  %v1663_v23 = vshll.u32 %v4430_v15, 16 }
  0x73   : > { %v1646_v20 = vor.u32 %v1645_v9, %v1642_v8  ;;  %v1660_v22 = vor.u32 %v1659_v11, %v1656_v10  ;;  %v4314_v25 = vor.u32 %v5097_v17, %v4313_v16  ;;  %v1677_v53 = vshll.u32 %v4432_v47, 16 }
  0x74   : > { %v1173_v58 = vrot.slane %v1172_v48, 4  ;;  %v1665_v29 = vrot.slane %v1663_v23, 5  ;;  %v4434_v48 = vld [vmem:[%s5349_s26 + $0x44] sm:$0x1] }
  0x75   : > { %v1647_v26 = vrot.slane %v1646_v20, 4  ;;  %v1661_v28 = vrot.slane %v1660_v22, 4  ;;  %v1691_v55 = vshll.u32 %v4434_v48, 16  ;;  %v5165_v48 = vld [vmem:[%s6460_s3 + $0xf8] sm:$0xff] }
  0x76   : > { %2659 = vmatpush.bf16.msrb.mxu0 %v5165_v48  ;;  %v5161_v48 = vld [vmem:[%s6460_s3 + $0xd8] sm:$0xff] }
  0x77   : > { %v1666_v33 = vsel %vm5383_vm2, %v1661_v28, %v1665_v29  ;;  %v5136_v29 = vld [vmem:[%s6460_s3 + $0x30] sm:$0xff] }
  0x78   : > { %v1717_v41 = vunpack.c.l.b16 %v1666_v33 }
  0x7b   : > { %902 = vmatmul.bf16.gmra.mxu3 %v4106_v45  ;;  %1037 = vmatmul.bf16.gmra.mxu0 %v4178_v46  ;;  %v4310_v45 = vor.u32 %v5096_v30, %v4309_v27  ;;  %v1158_v46 = vor.u32 %v1157_v32, %v1154_v31  ;;  %v1651_v27 = vrot.slane %v1649_v21, 5  ;;  %v4431_v30 = vld [vmem:[%s5349_s26 + $0x38] sm:$0xf]  ;;  %v4433_v31 = vld [vmem:[%s5349_s26 + $0x40] sm:$0xf] }
  0x7c   : > { %v1668_v34 = vshrl.u32 %v4431_v30, 16  ;;  %v1671_v35 = vshll.u32 %v4431_v30, 16  ;;  %v5144_v30 = vld [vmem:[%s6460_s3 + $0x70] sm:$0xff] }
  0x7d   : > { %1273 = vmatmul.bf16.gmra.mxu1 %v1205_v49  ;;  %1408 = vmatmul.bf16.gmra.mxu2 %v4306_v50  ;;  %v1175_v49 = vshll.u32 %v4226_v36, 16  ;;  %v1619_v50 = vrot.slane %v1618_v37, 4  ;;  %v1159_v56 = vrot.slane %v1158_v46, 4  ;;  %v1652_v32 = vsel %vm5383_vm2, %v1647_v26, %v1651_v27 }
  0x7e   : > { %v1682_v36 = vshrl.u32 %v4433_v31, 16  ;;  %v1685_v37 = vshll.u32 %v4433_v31, 16  ;;  %v1716_v40 = vunpack.c.l.b16 %v1652_v32 }
  0x7f   : > { %v1177_v59 = vrot.slane %v1175_v49, 5  ;;  %v1624_v60 = vsel %vm5383_vm2, %v1619_v50, %v1623_v51  ;;  %v1164_v2 = vsel %vm5383_vm2, %v1159_v56, %v1163_v57 }
  0x80   : > { %v1714_v5 = vunpack.c.l.b16 %v1624_v60  ;;  %v1202_v12 = vunpack.c.l.b16 %v1164_v2  ;;  %v1687_v46 = vrot.slane %v1685_v37, 5  ;;  %v1722_v50 = vpack.c.b16 %v1717_v41, %v1716_v40  ;;  %v5134_v41 = vld [vmem:[%s6460_s3 + $0x20] sm:$0xff] }
  0x81   : > { %v1178_v3 = vsel %vm5383_vm2, %v1173_v58, %v1177_v59  ;;  %v1679_v58 = vrot.slane %v1677_v53, 5  ;;  %v1693_v60 = vrot.slane %v1691_v55, 5  ;;  %v1868_v55 = vld [vmem:[#allocation2 + $0xc] sm:$0x1] }
  0x82   : > { %v1203_v13 = vunpack.c.l.b16 %v1178_v3  ;;  %v1721_v19 = vpack.c.b16 %v1715_v6, %v1714_v5  ;;  %v4385_v5 = vld [vmem:[%s5349_s26 + $0x80] sm:$0xf]  ;;  %v5109_v6 = vld [vmem:[%s5349_s26 + $0x84] sm:$0xf0] }
  0x83   : > { %v4386_v9 = vor.u32 %v5109_v6, %v4385_v5  ;;  %v5163_v5 = vld [vmem:[%s6460_s3 + $0xe8] sm:$0xff]  ;;  %v5150_v6 = vld [vmem:[%s6460_s3 + $0xa0] sm:$0xff] }
  0x84   : > { %v1207_v24 = vpack.c.b16 %v1203_v13, %v1202_v12 }
  0x8b   : > { %1538 = vmatmul.bf16.vlgmr.msra.gmra.mxu3 %v4374_v42  ;;  %1784 = vmatmul.bf16.vlgmr.msra.gmra.mxu0 %v1720_v43  ;;  %v5108_v42 = vld [vmem:[%s5349_s26 + $0x74] sm:$0xf0]  ;;  %v1670_v43 = vrot.slane %v1668_v34, 4 }
  0x8c   : > { %v4382_v49 = vor.u32 %v5108_v42, %v4381_v38  ;;  %v5142_v42 = vld [vmem:[%s6460_s3 + $0x60] sm:$0xff] }
  0x8d   : > { %1278 = vmatmul.bf16.gmra.mxu1 %v1206_v44  ;;  %1413 = vmatmul.bf16.gmra.mxu2 %v4310_v45  ;;  %v1673_v44 = vrot.slane %v1671_v35, 5  ;;  %v1684_v45 = vrot.slane %v1682_v36, 4  ;;  %v5135_v35 = vld [vmem:[%s6460_s3 + $0x28] sm:$0xff] }
  0x8e   : > { %v5143_v36 = vld [vmem:[%s6460_s3 + $0x68] sm:$0xff] }
  0x8f   : > { %v1674_v52 = vor.u32 %v1673_v44, %v1670_v43  ;;  %v1688_v54 = vor.u32 %v1687_v46, %v1684_v45  ;;  %v5153_v45 = vld [vmem:[%s6460_s3 + $0xb8] sm:$0xff] }
  0x90   : > { %2525 = vmatpush.bf16.msrb.mxu3 %v5153_v45  ;;  %v5131_v45 = vld [vmem:[%s6460_s3 + $0x8] sm:$0xff] }
  0x91   : > { %v1675_v57 = vrot.slane %v1674_v52, 4  ;;  %v1689_v59 = vrot.slane %v1688_v54, 4  ;;  %v1842_v52 = vld [vmem:[#allocation2 + $0x8] sm:$0x1] }
  0x93   : > { %v1680_v0 = vsel %vm5383_vm2, %v1675_v57, %v1679_v58  ;;  %v1694_v1 = vsel %vm5383_vm2, %v1689_v59, %v1693_v60  ;;  %v5164_v57 = vld [vmem:[%s6460_s3 + $0xf0] sm:$0xff]  ;;  %v1843_v58 = vsel %vm5795_vm5, 0, %v1842_v52  ;;  %v5151_v60 = vld [vmem:[%s6460_s3 + $0xa8] sm:$0xff] }
  0x94   : > { %v1718_v3 = vunpack.c.l.b16 %v1680_v0  ;;  %v1719_v4 = vunpack.c.l.b16 %v1694_v1  ;;  %1844 = vst [vmem:[#allocation2 + $0x8] sm:$0x1] %v1843_v58  ;;  %v1869_v1 = vsel %vm5805_vm7, 0, %v1868_v55  ;;  %2660 = vmatpush.bf16.msrb.mxu0 %v5164_v57  ;;  %v5148_v55 = vld [vmem:[%s6460_s3 + $0x90] sm:$0xff] }
  0x95   : > { %1870 = vst [vmem:[#allocation2 + $0xc] sm:$0x1] %v1869_v1  ;;  %v1848_v1 = vld [vmem:[#allocation2 + $0x18] sm:$0x1] }
  0x96   : > { %v1723_v10 = vpack.c.b16 %v1719_v4, %v1718_v3  ;;  %v5133_v4 = vld [vmem:[%s6460_s3 + $0x18] sm:$0xff] }
  0x98   : > { %2661 = vmatpush.bf16.msrb.mxu0 %v5163_v5  ;;  %v1849_v5 = vsel %vm5795_vm5, 0, %v1848_v1 }
  0x99   : > { %1850 = vst [vmem:[#allocation2 + $0x18] sm:$0x1] %v1849_v5 }
  0x9b   : > { %1543 = vmatmul.bf16.gmra.mxu3 %v4378_v18  ;;  %1789 = vmatmul.bf16.gmra.mxu0 %v1721_v19 }
  0x9d   : > { %1283 = vmatmul.bf16.gmra.mxu1 %v1207_v24  ;;  %1418 = vmatmul.bf16.gmra.mxu2 %v4314_v25  ;;  %v5137_v24 = vld [vmem:[%s6460_s3 + $0x38] sm:$0xff] }
  0x9e   : > { %v5145_v25 = vld [vmem:[%s6460_s3 + $0x78] sm:$0xff]  ;;  %2356 = vmatpush.bf16.msra.mxu2 %v5137_v24  ;;  %v1871_v24 = vld [vmem:[#allocation2 + $0x14] sm:$0x1] }
  0x9f   : > { %2255 = vmatpush.bf16.msra.mxu1 %v5145_v25 }
  0xa2   : > { %2357 = vmatpush.bf16.msra.mxu2 %v5136_v29 }
  0xa3   : > { %2256 = vmatpush.bf16.msra.mxu1 %v5144_v30 }
  0xa6   : > { %2358 = vmatpush.bf16.msra.mxu2 %v5135_v35  ;;  %v1872_v35 = vsel %vm5805_vm7, 0, %v1871_v24 }
  0xa7   : > { %2257 = vmatpush.bf16.msra.mxu1 %v5143_v36  ;;  %v5132_v36 = vld [vmem:[%s6460_s3 + $0x10] sm:$0xff]  ;;  %1873 = vst [vmem:[#allocation2 + $0x14] sm:$0x1] %v1872_v35 }
  0xa8   : > { %v5682_v51 = vpop.f32.mrf.mxu0 }
  0xaa   : > { %v5684_v56 = vpop.f32.mrf.mxu1  ;;  %2359 = vmatpush.bf16.msra.mxu2 %v5134_v41  ;;  %v5162_v41 = vld [vmem:[%s6460_s3 + $0xe0] sm:$0xff] }
  0xab   : > { %1548 = vmatmul.bf16.gmra.mxu3 %v4382_v49  ;;  %1794 = vmatmul.bf16.gmra.mxu0 %v1722_v50  ;;  %v5152_v49 = vld [vmem:[%s6460_s3 + $0xb0] sm:$0xff]  ;;  %v513_v25 = vadd.f32 %v5684_v56, %v5682_v51  ;;  %v5149_v51 = vld [vmem:[%s6460_s3 + $0x98] sm:$0xff] }
  0xac   : > { %2258 = vmatpush.bf16.msra.mxu1 %v5142_v42  ;;  %2526 = vmatpush.bf16.msrb.mxu3 %v5152_v49  ;;  %v5141_v56 = vld [vmem:[%s6460_s3 + $0x58] sm:$0xff]  ;;  %v5267_v49 = vmov 0  }
  0xad   : > { %2662 = vmatpush.bf16.msrb.mxu0 %v5162_v41  ;;  %1833 = vst [vmem:[#allocation2] sm:$0xf] %v5267_v49  ;;  %v5159_v41 = vld [vmem:[%s6460_s3 + $0xc8] sm:$0xff] }
  0xae   : > { %v5686_v61 = vpop.f32.mrf.mxu3  ;;  %2360 = vmatpush.bf16.msra.mxu2 %v5133_v4  ;;  %1834 = vst [vmem:[#allocation2 + $0x4] sm:$0x1] %v5267_v49  ;;  %v1874_v4 = vld [vmem:[#allocation2 + $0x1c] sm:$0x1] }
  0xaf   : > { %1836 = vst [vmem:[#allocation2 + $0x48] sm:$0xf] %v5267_v49 }
  0xb0   : > { %v5688_v62 = vpop.f32.mrf.mxu2  ;;  %v5690_v63 = vpop.f32.mrf.mxu0  ;;  %2527 = vmatpush.bf16.msrb.mxu3 %v5151_v60  ;;  %2259 = vmatpush.bf16.msra.mxu1 %v5141_v56  ;;  %1837 = vst [vmem:[#allocation2 + $0x4c] sm:$0x1] %v5267_v49 }
  0xb1   : > { %v773_v52 = vadd.f32 %v5688_v62, %v513_v25  ;;  %2663 = vmatpush.bf16.msrb.mxu0 %v5161_v48  ;;  %v5130_v62 = vld [vmem:[%s6460_s3] sm:$0xff] }
  0xb2   : > { %v5696_v2 = vpop.f32.mrf.mxu1  ;;  %2361 = vmatpush.bf16.msra.mxu2 %v5132_v36  ;;  %v5140_v36 = vld [vmem:[%s6460_s3 + $0x50] sm:$0xff] }
  0xb3   : > { %v515_v25 = vadd.f32 %v5696_v2, %v5690_v63  ;;  %v5146_v63 = vld [vmem:[%s6460_s3 + $0x80] sm:$0xff] }
  0xb4   : > { %2528 = vmatpush.bf16.msrb.mxu3 %v5150_v6  ;;  %v1875_v6 = vsel %vm5805_vm7, 0, %v1874_v4  ;;  %2260 = vmatpush.bf16.msra.mxu1 %v5140_v36 }
  0xb5   : > { %1876 = vst [vmem:[#allocation2 + $0x1c] sm:$0x1] %v1875_v6 }
  0xb6   : > { %v5700_v7 = vpop.f32.mrf.mxu3  ;;  %2362 = vmatpush.bf16.msra.mxu2 %v5131_v45  ;;  %v5139_v45 = vld [vmem:[%s6460_s3 + $0x48] sm:$0xff] }
  0xb8   : > { %v5702_v8 = vpop.f32.mrf.mxu2  ;;  %v5704_v11 = vpop.f32.mrf.mxu0  ;;  %2529 = vmatpush.bf16.msrb.mxu3 %v5149_v51  ;;  %2261 = vmatpush.bf16.msra.mxu1 %v5139_v45 }
  0xb9   : > { %v774_v51 = vadd.f32 %v5702_v8, %v515_v25 }
  0xba   : > { %v5706_v12 = vpop.f32.mrf.mxu1  ;;  %2363 = vmatpush.bf16.msra.mxu2 %v5130_v62  ;;  %v5138_v62 = vld [vmem:[%s6460_s3 + $0x40] sm:$0xff] }
  0xbb   : > { %1553 = vmatmul.bf16.gmra.mxu3 %v4386_v9  ;;  %1799 = vmatmul.bf16.gmra.mxu0 %v1723_v10  ;;  %v1845_v10 = vld [vmem:[#allocation2 + $0x10] sm:$0x1]  ;;  %v518_v48 = vadd.f32 %v5706_v12, %v5704_v11 }
  0xbc   : > { %v1846_v30 = vsel %vm5795_vm5, 0, %v1845_v10  ;;  %2530 = vmatpush.bf16.msrb.mxu3 %v5148_v55  ;;  %v5147_v10 = vld [vmem:[%s6460_s3 + $0x88] sm:$0xff]  ;;  %v5158_v55 = vld [vmem:[%s6460_s3 + $0xc0] sm:$0xff]  ;;  %2262 = vmatpush.bf16.msra.mxu1 %v5138_v62 }
  0xbd   : > { %1847 = vst [vmem:[#allocation2 + $0x10] sm:$0x1] %v1846_v30 }
  0xbe   : > { %v5708_v13 = vpop.f32.mrf.mxu3 }
  0xc0   : > { %v5710_v14 = vpop.f32.mrf.mxu2  ;;  %v5712_v15 = vpop.f32.mrf.mxu0  ;;  %2531 = vmatpush.bf16.msrb.mxu3 %v5147_v10 }
  0xc1   : > { %v775_v5 = vadd.f32 %v5710_v14, %v518_v48 }
  0xc2   : > { %v5714_v16 = vpop.f32.mrf.mxu1 }
  0xc4   : > { %2532 = vmatpush.bf16.msrb.mxu3 %v5146_v63 }
  0xc6   : > { %v5716_v17 = vpop.f32.mrf.mxu3 }
  0xc8   : > { %v5718_v18 = vpop.f32.mrf.mxu2  ;;  %v5720_v19 = vpop.f32.mrf.mxu0 }
  0xca   : > { %v5722_v20 = vpop.f32.mrf.mxu1 }
  0xcb   : > { %v523_v45 = vadd.f32 %v5722_v20, %v5686_v61 }
  0xce   : > { %v5724_v21 = vpop.f32.mrf.mxu3 }
  0xcf   : > { %v908_v58 = vadd.f32 %v5724_v21, %v773_v52  ;;  %v5160_v21 = vld [vmem:[%s6460_s3 + $0xd0] sm:$0xff]  ;;  %v1877_v52 = vld [vmem:[#allocation2 + $0x24] sm:$0x1] }
  0xd0   : > { %v5726_v22 = vpop.f32.mrf.mxu0  ;;  %v5728_v23 = vpop.f32.mrf.mxu2  ;;  %2664 = vmatpush.bf16.msrb.mxu0 %v5160_v21  ;;  %v1878_v11 = vsel %vm5805_vm7, 0, %v1877_v52 }
  0xd1   : > { %v1043_v30 = vadd.f32 %v5720_v19, %v908_v58  ;;  %1879 = vst [vmem:[#allocation2 + $0x24] sm:$0x1] %v1878_v11  ;;  %v1982_v11 = vld [vmem:[#allocation2 + $0x8] sm:$0xf] }
  0xd2   : > { %v5738_v27 = vpop.f32.mrf.mxu1 }
  0xd3   : > { %v525_v48 = vadd.f32 %v5738_v27, %v5700_v7  ;;  %v1985_v7 = vld [vmem:[#allocation2 + $0xc] sm:$0x1]  ;;  %v5943_v27 = vld [vmem:[#allocation2 + $0x4] sm:$0x1] }
  0xd4   : > { %2665 = vmatpush.bf16.msrb.mxu0 %v5159_v41  ;;  %v1854_v41 = vld [vmem:[#allocation2 + $0x28] sm:$0x1] }
  0xd5   : > { %v1855_v14 = vsel %vm5795_vm5, 0, %v1854_v41 }
  0xd6   : > { %v5736_v26 = vpop.f32.mrf.mxu3  ;;  %1856 = vst [vmem:[#allocation2 + $0x28] sm:$0x1] %v1855_v14 }
  0xd7   : > { %v909_v2 = vadd.f32 %v5736_v26, %v774_v51  ;;  %v1880_v51 = vld [vmem:[#allocation2 + $0x2c] sm:$0x1] }
  0xd8   : > { %v5740_v28 = vpop.f32.mrf.mxu0  ;;  %v5748_v31 = vpop.f32.mrf.mxu2  ;;  %2666 = vmatpush.bf16.msrb.mxu0 %v5158_v55 }
  0xd9   : > { %v1044_v1 = vadd.f32 %v5726_v22, %v909_v2  ;;  %v778_v61 = vadd.f32 %v5748_v31, %v525_v48 }
  0xda   : > { %v5754_v34 = vpop.f32.mrf.mxu1 }
  0xde   : > { %v5750_v32 = vpop.f32.mrf.mxu3 }
  0xdf   : > { %v910_v25 = vadd.f32 %v5750_v32, %v775_v5  ;;  %v528_v5 = vadd.f32 %v5754_v34, %v5708_v13  ;;  %v2414_v34 = vrot.slane %v5943_v27, 5 }
  0xe0   : > { %v5752_v33 = vpop.f32.mrf.mxu0  ;;  %v5762_v37 = vpop.f32.mrf.mxu2 }
  0xe1   : > { %v1045_v32 = vadd.f32 %v5740_v28, %v910_v25  ;;  %v779_v48 = vadd.f32 %v5762_v37, %v528_v5 }
  0xe2   : > { %v5774_v43 = vpop.f32.mrf.mxu1 }
  0xe6   : > { %v5764_v38 = vpop.f32.mrf.mxu3 }
  0xe8   : > { %v5766_v40 = vpop.f32.mrf.mxu0  ;;  %v5781_v46 = vpop.f32.mrf.mxu2 }
  0xea   : > { %v5791_v50 = vpop.f32.mrf.mxu1 }
  0xeb   : > { %v1289_v56 = vadd.f32 %v5791_v50, %v1043_v30  ;;  %v1851_v50 = vld [vmem:[#allocation2 + $0x20] sm:$0x1] }
  0xec   : > { %v1852_v58 = vsel %vm5795_vm5, 0, %v1851_v50 }
  0xed   : > { %1853 = vst [vmem:[#allocation2 + $0x20] sm:$0x1] %v1852_v58  ;;  %v777_v58 = vadd.f32 %v5728_v23, %v523_v45  ;;  %v530_v23 = vadd.f32 %v5774_v43, %v5716_v17 }
  0xee   : > { %v5776_v44 = vpop.f32.mrf.mxu3 }
  0xef   : > { %v912_v17 = vadd.f32 %v5776_v44, %v777_v58  ;;  %v1857_v44 = vld [vmem:[#allocation2 + $0x30] sm:$0x1] }
  0xf0   : > { %v5783_v47 = vpop.f32.mrf.mxu0  ;;  %v5816_v3 = vpop.f32.mrf.mxu2 }
  0xf1   : > { %v1424_v19 = vadd.f32 %v5816_v3, %v1289_v56  ;;  %v5904_v3 = vld [vmem:[%s6459_s2] ss:$0 sm:$0xff] }
  0xf2   : > { %v5831_v29 = vpop.f32.mrf.mxu1 }
  0xf3   : > { %v1290_v6 = vadd.f32 %v5831_v29, %v1044_v1  ;;  %v1881_v29 = vsel %vm5805_vm7, 0, %v1880_v51  ;;  %v5173_v51 = vld [vmem:[%s6460_s3 + $0x138] sm:$0xff] }
  0xf4   : > { %1882 = vst [vmem:[#allocation2 + $0x2c] sm:$0x1] %v1881_v29  ;;  %2905 = vmatpush.bf16.msrb.mxu1 %v5173_v51 }
  0xf6   : > { %v5793_v53 = vpop.f32.mrf.mxu3 }
  0xf8   : > { %v5812_v0 = vpop.f32.mrf.mxu0  ;;  %v1406_v57 = vpop.f32.mrf.mxu2 }
  0xf9   : > { %v1425_v30 = vadd.f32 %v1406_v57, %v1290_v6 }
  0xfa   : > { %v1274_v35 = vpop.f32.mrf.mxu1 }
  0xfb   : > { %v1291_v50 = vadd.f32 %v1274_v35, %v1045_v32  ;;  %v1883_v32 = vld [vmem:[#allocation2 + $0x34] sm:$0x1] }
  0xfe   : > { %v5827_v9 = vpop.f32.mrf.mxu3 }
 0x100   : > { %v5843_v42 = vpop.f32.mrf.mxu0  ;;  %v1409_v8 = vpop.f32.mrf.mxu2 }
 0x101   : > { %v1426_v20 = vadd.f32 %v1409_v8, %v1291_v50 }
 0x102   : > { %v5916_v21 = vpop.f32.mrf.mxu1 }
 0x106   : > { %v5862_v60 = vpop.f32.mrf.mxu3 }
 0x108   : > { %v1785_v24 = vpop.f32.mrf.mxu0  ;;  %v5928_v57 = vpop.f32.mrf.mxu2 }
 0x10e   : > { %v1539_v49 = vpop.f32.mrf.mxu3 }
 0x10f   : > { %v1559_v26 = vadd.f32 %v1539_v49, %v1424_v19 }
 0x110   : > { %v1787_v12 = vpop.f32.mrf.mxu0  ;;  %v1414_v14 = vpop.f32.mrf.mxu2 }
 0x111   : > { %v1805_v4 = vadd.f32 %v1785_v24, %v1559_v26  ;;  %v520_v24 = vadd.f32 %v5714_v16, %v5712_v15 }
 0x113   : > { %v1817_v10 = vadd.f32 %v5904_v3, %v1805_v4  ;;  %v776_v2 = vadd.f32 %v5718_v18, %v520_v24  ;;  %v2030_v18 = vld [vmem:[#allocation2] sm:$0xf] }
 0x114   : > { %v2385_v4 = vld [vmem:[#allocation2] sm:$0xe]  ;;  %v2063_v62 = vshrl.u32 %v2030_v18, 16  ;;  %v2066_v6 = vshll.u32 %v2030_v18, 16  ;;  %v1991_v18 = vld [vmem:[#allocation2 + $0x14] sm:$0x1] }
 0x115   : > { %v1825_v22 = vmax.f32 %v1817_v10, 0.0  ;;  %v911_v49 = vadd.f32 %v5764_v38, %v776_v2  ;;  %v5945_v38 = vpop.f32.mrf.mxu1  ;;  %v4579_v13 = vrot.slane %v2385_v4, 9 }
 0x116   : > { %v1541_v36 = vpop.f32.mrf.mxu3  ;;  %v2065_v41 = vrot.slane %v2063_v62, 4  ;;  %v2068_v2 = vrot.slane %v2066_v6, 5 }
 0x117   : > { %v1892_v56 = vpack.c.bf16 %v1825_v22, %v1825_v22  ;;  %v1560_v63 = vadd.f32 %v1541_v36, %v1425_v30  ;;  %v1046_v31 = vadd.f32 %v5752_v33, %v911_v49  ;;  %v5181_v36 = vld [vmem:[%s6460_s3 + $0x178] sm:$0xff]  ;;  %v5979_v49 = vadd.f32 %v5781_v46, %v530_v23 }
 0x118   : > { %v1790_v19 = vpop.f32.mrf.mxu0  ;;  %3079 = vmatpush.bf16.msrb.mxu2 %v5181_v36  ;;  %v2415_v37 = vsel %vm5969_vm12, %v4579_v13, %v2414_v34  ;;  %v2069_v46 = vor.u32 %v2068_v2, %v2065_v41  ;;  %v1994_v36 = vld [vmem:[#allocation2 + $0x18] sm:$0xf] }
 0x119   : > { %v1901_v15 = vshrl.u32 %v1892_v56, 16  ;;  %v1806_v16 = vadd.f32 %v1787_v12, %v1560_v63  ;;  %v1904_v28 = vshll.u32 %v1892_v56, 16  ;;  %v913_v56 = vadd.f32 %v5793_v53, %v778_v61 }
 0x11a   : > { %v1292_v63 = vadd.f32 %v5916_v21, %v1046_v31  ;;  %v1858_v53 = vsel %vm5795_vm5, 0, %v1857_v44  ;;  %v1884_v21 = vsel %vm5805_vm7, 0, %v1883_v32  ;;  %v2072_v61 = vshll.u32 %v5943_v27, 16 }
 0x11b   : > { %v1903_v52 = vrot.slane %v1901_v15, 7  ;;  %v1818_v26 = vadd.f32 %v5904_v3, %v1806_v16  ;;  %1859 = vst [vmem:[#allocation2 + $0x30] sm:$0x1] %v1858_v53  ;;  %v2461_v34 = vunpack.c.l.b16 %v2415_v37 }
 0x11c   : > { %v1427_v50 = vadd.f32 %v5928_v57, %v1292_v63  ;;  %1885 = vst [vmem:[#allocation2 + $0x34] sm:$0x1] %v1884_v21  ;;  %v1416_v63 = vpop.f32.mrf.mxu2 }
 0x11d   : > { %v1906_v35 = vor.u32 %v1904_v28, %v1903_v52  ;;  %v1907_v12 = vrot.slane %v1903_v52, 4  ;;  %v1826_v1 = vmax.f32 %v1818_v26, 0.0  ;;  %v4533_v52 = vld [vmem:[#allocation2] sm:$0xf] }
 0x11e   : > { %v1544_v8 = vpop.f32.mrf.mxu3 }
 0x11f   : > { %v1983_v10 = vsel %vm5936_vm9, %v1906_v35, %v1982_v11  ;;  %v1986_v25 = vsel %vm5795_vm5, %v1907_v12, %v1985_v7  ;;  %v1893_v30 = vpack.c.bf16 %v1826_v1, %v1826_v1  ;;  %v1561_v22 = vadd.f32 %v1544_v8, %v1426_v20  ;;  %v1281_v35 = vpop.f32.mrf.mxu1 }
 0x120   : > { %1984 = vst [vmem:[#allocation2 + $0x8] sm:$0xf] %v1983_v10  ;;  %v1792_v24 = vpop.f32.mrf.mxu0  ;;  %v1047_v20 = vadd.f32 %v5766_v40, %v912_v17  ;;  %v1048_v11 = vadd.f32 %v5783_v47, %v913_v56  ;;  %v5992_v40 = vadd.f32 %v5827_v9, %v779_v48  ;;  %v5180_v9 = vld [vmem:[%s6460_s3 + $0x170] sm:$0xff]  ;;  %v1860_v56 = vld [vmem:[#allocation2 + $0x38] sm:$0x1] }
 0x121   : > { %1987 = vst [vmem:[#allocation2 + $0xc] sm:$0x1] %v1986_v25  ;;  %v1909_v33 = vshrl.u32 %v1893_v30, 16  ;;  %v1807_v43 = vadd.f32 %v1790_v19, %v1561_v22  ;;  %v1912_v29 = vshll.u32 %v1893_v30, 16  ;;  %v1988_v19 = vld [vmem:[#allocation2 + $0x10] sm:$0xf]  ;;  %3080 = vmatpush.bf16.msrb.mxu2 %v5180_v9 }
 0x122   : > { %v1293_v47 = vadd.f32 %v5945_v38, %v1047_v20  ;;  %v2074_v25 = vrot.slane %v2072_v61, 5  ;;  %v5172_v38 = vld [vmem:[%s6460_s3 + $0x130] sm:$0xff]  ;;  %v1861_v32 = vsel %vm5795_vm5, 0, %v1860_v56  ;;  %v1294_v21 = vadd.f32 %v1281_v35, %v1048_v11  ;;  %v2000_v9 = vld [vmem:[#allocation2 + $0x20] sm:$0xf] }
 0x123   : > { %v1911_v15 = vrot.slane %v1909_v33, 7  ;;  %v1819_v16 = vadd.f32 %v5904_v3, %v1807_v43  ;;  %v2070_v33 = vrot.slane %v2069_v46, 4  ;;  %2906 = vmatpush.bf16.msrb.mxu1 %v5172_v38  ;;  %1862 = vst [vmem:[#allocation2 + $0x38] sm:$0x1] %v1861_v32  ;;  %v2003_v38 = vld [vmem:[#allocation2 + $0x24] sm:$0x1] }
 0x124   : > { %v1428_v30 = vadd.f32 %v1414_v14, %v1293_v47  ;;  %v1997_v14 = vld [vmem:[#allocation2 + $0x1c] sm:$0x1] }
 0x125   : > { %v1914_v28 = vor.u32 %v1912_v29, %v1911_v15  ;;  %v1915_v26 = vrot.slane %v1911_v15, 4  ;;  %v1827_v58 = vmax.f32 %v1819_v16, 0.0 }
 0x126   : > { %v1546_v7 = vpop.f32.mrf.mxu3 }
 0x127   : > { %v1989_v57 = vsel %vm5936_vm9, %v1914_v28, %v1988_v19  ;;  %v1992_v12 = vsel %vm5795_vm5, %v1915_v26, %v1991_v18  ;;  %v1894_v1 = vpack.c.bf16 %v1827_v58, %v1827_v58  ;;  %v1562_v4 = vadd.f32 %v1546_v7, %v1427_v50  ;;  %v5126_v27 = vld [vmem:[#allocation2 + $0x4] sm:$0xf0]  ;;  %v1886_v28 = vld [vmem:[#allocation2 + $0x3c] sm:$0x1] }
 0x128   : > { %v2386_v62 = vld [vmem:[#allocation2 + $0x8] sm:$0xe]  ;;  %1990 = vst [vmem:[#allocation2 + $0x10] sm:$0xf] %v1989_v57  ;;  %v4534_v5 = vor.u32 %v5126_v27, %v4533_v52  ;;  %v2055_v23 = vld [vmem:[#allocation2 + $0xc] sm:$0x1]  ;;  %v1795_v13 = vpop.f32.mrf.mxu0  ;;  %v2075_v18 = vsel %vm5383_vm2, %v2070_v33, %v2074_v25 }
 0x129   : > { %v4580_v31 = vrot.slane %v2386_v62, 9  ;;  %1993 = vst [vmem:[#allocation2 + $0x14] sm:$0x1] %v1992_v12  ;;  %v1917_v8 = vshrl.u32 %v1894_v1, 16  ;;  %v1808_v6 = vadd.f32 %v1792_v24, %v1562_v4  ;;  %v2418_v10 = vrot.slane %v2055_v23, 5  ;;  %v1284_v4 = vpop.f32.mrf.mxu1 }
 0x12a   : > { %v1920_v22 = vshll.u32 %v1894_v1, 16  ;;  %2364 = vmatmul.bf16.vlgmr.msra.gmra.mxu2 %v4534_v5  ;;  %v2031_v17 = vld [vmem:[#allocation2 + $0x8] sm:$0xf]  ;;  %v2086_v44 = vshll.u32 %v2055_v23, 16  ;;  %v1887_v12 = vsel %vm5805_vm7, 0, %v1886_v28 }
 0x12b   : > { %v1919_v43 = vrot.slane %v1917_v8, 7  ;;  %v1820_v24 = vadd.f32 %v5904_v3, %v1808_v6  ;;  %v2419_v41 = vsel %vm5969_vm12, %v4580_v31, %v2418_v10  ;;  %v2077_v51 = vshrl.u32 %v2031_v17, 16  ;;  %v4653_v7 = vld [vmem:[#allocation2 + $0x8] sm:$0xf]  ;;  %1888 = vst [vmem:[#allocation2 + $0x3c] sm:$0x1] %v1887_v12 }
 0x12c   : > { %v2462_v29 = vunpack.c.l.b16 %v2419_v41  ;;  %v2080_v2 = vshll.u32 %v2031_v17, 16  ;;  %v2088_v57 = vrot.slane %v2086_v44, 5  ;;  %v5179_v23 = vld [vmem:[%s6460_s3 + $0x168] sm:$0xff]  ;;  %v1049_v31 = vadd.f32 %v5812_v0, %v5992_v40  ;;  %v1863_v33 = vld [vmem:[#allocation2 + $0x40] sm:$0x1]  ;;  %v5193_v0 = vld [vmem:[%s6460_s3 + $0x1b8] sm:$0xff] }
 0x12d   : > { %v1922_v15 = vor.u32 %v1920_v22, %v1919_v43  ;;  %v1923_v19 = vrot.slane %v1919_v43, 4  ;;  %v1828_v16 = vmax.f32 %v1820_v24, 0.0  ;;  %v2079_v53 = vrot.slane %v2077_v51, 4  ;;  %3081 = vmatpush.bf16.msrb.mxu2 %v5179_v23  ;;  %v5171_v17 = vld [vmem:[%s6460_s3 + $0x128] sm:$0xff]  ;;  %3214 = vmatpush.bf16.msra.mxu3 %v5193_v0 }
 0x12e   : > { %v1549_v48 = vpop.f32.mrf.mxu3  ;;  %v2469_v50 = vpack.c.b16 %v2462_v29, %v2461_v34  ;;  %v2082_v52 = vrot.slane %v2080_v2, 5  ;;  %v2191_v6 = vunpack.c.l.b16 %v2075_v18  ;;  %v1295_v40 = vadd.f32 %v1284_v4, %v1049_v31  ;;  %2907 = vmatpush.bf16.msrb.mxu1 %v5171_v17  ;;  %v1419_v29 = vpop.f32.mrf.mxu2  ;;  %v2006_v4 = vld [vmem:[#allocation2 + $0x28] sm:$0xf] }
 0x12f   : > { %v1995_v26 = vsel %vm5936_vm9, %v1922_v15, %v1994_v36  ;;  %v1998_v58 = vsel %vm5795_vm5, %v1923_v19, %v1997_v14  ;;  %v1895_v61 = vpack.c.bf16 %v1828_v16, %v1828_v16  ;;  %v1563_v20 = vadd.f32 %v1549_v48, %v1428_v30  ;;  %v5154_v37 = vld [vmem:[#allocation2 + $0xc] sm:$0xf0]  ;;  %v1889_v16 = vld [vmem:[#allocation2 + $0x44] sm:$0x1] }
 0x130   : > { %v2387_v46 = vld [vmem:[#allocation2 + $0x10] sm:$0xe]  ;;  %1996 = vst [vmem:[#allocation2 + $0x18] sm:$0xf] %v1995_v26  ;;  %2533 = vmatmul.bf16.vlgmr.msrb.gmra.mxu3 %v2469_v50  ;;  %v4654_v11 = vor.u32 %v5154_v37, %v4653_v7  ;;  %v2083_v35 = vor.u32 %v2082_v52, %v2079_v53  ;;  %v6014_v1 = vld [vmem:[#allocation2 + $0x14] sm:$0x1]  ;;  %v1429_v30 = vadd.f32 %v1416_v63, %v1294_v21  ;;  %v1797_v43 = vpop.f32.mrf.mxu0 }
 0x131   : > { %1999 = vst [vmem:[#allocation2 + $0x1c] sm:$0x1] %v1998_v58  ;;  %v1925_v27 = vshrl.u32 %v1895_v61, 16  ;;  %v1928_v62 = vshll.u32 %v1895_v61, 16  ;;  %v1809_v47 = vadd.f32 %v1795_v13, %v1563_v20  ;;  %v4581_v5 = vrot.slane %v2387_v46, 9  ;;  %v5201_v53 = vld [vmem:[%s6460_s3 + $0x1f8] sm:$0xff]  ;;  %v1286_v17 = vpop.f32.mrf.mxu1 }
 0x132   : > { %2667 = vmatmul.bf16.vlgmr.msrb.gmra.mxu0 %v4654_v11  ;;  %v2084_v8 = vrot.slane %v2083_v35, 4  ;;  %v2422_v10 = vrot.slane %v6014_v1, 5  ;;  %v2032_v25 = vld [vmem:[#allocation2 + $0x10] sm:$0xf]  ;;  %v2100_v41 = vshll.u32 %v6014_v1, 16  ;;  %v1864_v19 = vsel %vm5795_vm5, 0, %v1863_v33 }
 0x133   : > { %v1927_v22 = vrot.slane %v1925_v27, 7  ;;  %v1821_v34 = vadd.f32 %v5904_v3, %v1809_v47  ;;  %v2091_v13 = vshrl.u32 %v2032_v25, 16  ;;  %v2094_v24 = vshll.u32 %v2032_v25, 16  ;;  %v4537_v52 = vld [vmem:[#allocation2 + $0x10] sm:$0xf]  ;;  %3460 = vmatpush.bf16.msra.mxu0 %v5201_v53 }
 0x134   : > { %v2089_v36 = vsel %vm5383_vm2, %v2084_v8, %v2088_v57  ;;  %v6034_v44 = vsel %vm5969_vm12, %v4581_v5, %v2422_v10  ;;  %v5192_v46 = vld [vmem:[%s6460_s3 + $0x1b0] sm:$0xff]  ;;  %v915_v11 = vadd.f32 %v5862_v60, %v5979_v49  ;;  %v1430_v35 = vadd.f32 %v1419_v29, %v1295_v40  ;;  %v2009_v27 = vld [vmem:[#allocation2 + $0x2c] sm:$0x1]  ;;  %v5178_v60 = vld [vmem:[%s6460_s3 + $0x160] sm:$0xff]  ;;  %1865 = vst [vmem:[#allocation2 + $0x40] sm:$0x1] %v1864_v19 }
 0x135   : > { %v1930_v51 = vor.u32 %v1928_v62, %v1927_v22  ;;  %v1931_v56 = vrot.slane %v1927_v22, 4  ;;  %v1829_v63 = vmax.f32 %v1821_v34, 0.0  ;;  %v2192_v14 = vunpack.c.l.b16 %v2089_v36  ;;  %3215 = vmatpush.bf16.msra.mxu3 %v5192_v46  ;;  %3082 = vmatpush.bf16.msrb.mxu2 %v5178_v60  ;;  %v5177_v34 = vld [vmem:[%s6460_s3 + $0x158] sm:$0xff]  ;;  %v5199_v29 = vld [vmem:[%s6460_s3 + $0x1e8] sm:$0xff] }
 0x136   : > { %v1551_v2 = vpop.f32.mrf.mxu3  ;;  %v2093_v32 = vrot.slane %v2091_v13, 4  ;;  %v2096_v15 = vrot.slane %v2094_v24, 5  ;;  %v1890_v12 = vsel %vm5805_vm7, 0, %v1889_v16  ;;  %v2463_v31 = vunpack.c.l.b16 %v6034_v44  ;;  %v5200_v13 = vld [vmem:[%s6460_s3 + $0x1f0] sm:$0xff]  ;;  %v5190_v16 = vld [vmem:[%s6460_s3 + $0x1a0] sm:$0xff]  ;;  %v1421_v53 = vpop.f32.mrf.mxu2 }
 0x137   : > { %v2001_v21 = vsel %vm5936_vm9, %v1930_v51, %v2000_v9  ;;  %v2004_v48 = vsel %vm5795_vm5, %v1931_v56, %v2003_v38  ;;  %v1896_v50 = vpack.c.bf16 %v1829_v63, %v1829_v63  ;;  %v2199_v18 = vpack.c.b16 %v2192_v14, %v2191_v6  ;;  %v5127_v28 = vld [vmem:[#allocation2 + $0x14] sm:$0xf0]  ;;  %v5170_v6 = vld [vmem:[%s6460_s3 + $0x120] sm:$0xff]  ;;  %1891 = vst [vmem:[#allocation2 + $0x44] sm:$0x1] %v1890_v12 }
 0x138   : > { %v2388_v26 = vld [vmem:[#allocation2 + $0x18] sm:$0xe]  ;;  %2002 = vst [vmem:[#allocation2 + $0x20] sm:$0xf] %v2001_v21  ;;  %v1564_v58 = vadd.f32 %v1551_v2, %v1429_v30  ;;  %v4538_v61 = vor.u32 %v5127_v28, %v4537_v52  ;;  %v6045_v20 = vld [vmem:[#allocation2 + $0x1c] sm:$0x1]  ;;  %v2097_v37 = vor.u32 %v2096_v15, %v2093_v32  ;;  %2908 = vmatpush.bf16.msrb.mxu1 %v5170_v6 }
 0x139   : > { %v4582_v7 = vrot.slane %v2388_v26, 9  ;;  %2005 = vst [vmem:[#allocation2 + $0x24] sm:$0x1] %v2004_v48  ;;  %v1933_v57 = vshrl.u32 %v1896_v50, 16  ;;  %2263 = vmatmul.bf16.vlgmr.msra.gmra.mxu1 %v2199_v18  ;;  %v1936_v1 = vshll.u32 %v1896_v50, 16  ;;  %v2426_v47 = vrot.slane %v6045_v20, 5  ;;  %3461 = vmatpush.bf16.msra.mxu0 %v5200_v13 }
 0x13a   : > { %v1810_v62 = vadd.f32 %v1797_v43, %v1564_v58  ;;  %2369 = vmatmul.bf16.gmra.mxu2 %v4538_v61  ;;  %v2033_v5 = vld [vmem:[#allocation2 + $0x18] sm:$0xf]  ;;  %v6055_v23 = vrot.slane %v2097_v37, 4  ;;  %v2102_v30 = vrot.slane %v2100_v41, 5  ;;  %v2114_v22 = vshll.u32 %v6045_v20, 16  ;;  %v5191_v43 = vld [vmem:[%s6460_s3 + $0x1a8] sm:$0xff]  ;;  %v1800_v41 = vpop.f32.mrf.mxu0 }
 0x13b   : > { %v1935_v49 = vrot.slane %v1933_v57, 7  ;;  %v2105_v59 = vshrl.u32 %v2033_v5, 16  ;;  %v2108_v8 = vshll.u32 %v2033_v5, 16  ;;  %v2427_v25 = vsel %vm5969_vm12, %v4582_v7, %v2426_v47  ;;  %v5169_v38 = vld [vmem:[%s6460_s3 + $0x118] sm:$0xff]  ;;  %3216 = vmatpush.bf16.msra.mxu3 %v5191_v43  ;;  %3083 = vmatpush.bf16.msrb.mxu2 %v5177_v34  ;;  %v5176_v28 = vld [vmem:[%s6460_s3 + $0x150] sm:$0xff] }
 0x13c   : > { %v1822_v10 = vadd.f32 %v5904_v3, %v1810_v62  ;;  %v2464_v40 = vunpack.c.l.b16 %v2427_v25  ;;  %v1050_v36 = vadd.f32 %v5843_v42, %v915_v11  ;;  %v4657_v56 = vld [vmem:[#allocation2 + $0x18] sm:$0xf]  ;;  %v2103_v63 = vsel %vm5383_vm2, %v6055_v23, %v2102_v30  ;;  %2909 = vmatpush.bf16.msrb.mxu1 %v5169_v38  ;;  %v5168_v7 = vld [vmem:[%s6460_s3 + $0x110] sm:$0xff]  ;;  %v5198_v62 = vld [vmem:[%s6460_s3 + $0x1e0] sm:$0xff] }
 0x13d   : > { %v1938_v33 = vor.u32 %v1936_v1, %v1935_v49  ;;  %v1939_v0 = vrot.slane %v1935_v49, 4  ;;  %v2107_v9 = vrot.slane %v2105_v59, 4  ;;  %v2110_v14 = vrot.slane %v2108_v8, 5  ;;  %v2012_v12 = vld [vmem:[#allocation2 + $0x30] sm:$0xf]  ;;  %3462 = vmatpush.bf16.msra.mxu0 %v5199_v29  ;;  %v5189_v49 = vld [vmem:[%s6460_s3 + $0x198] sm:$0xff] }
 0x13e   : > { %v1830_v24 = vmax.f32 %v1822_v10, 0.0  ;;  %v1554_v51 = vpop.f32.mrf.mxu3  ;;  %v2470_v32 = vpack.c.b16 %v2464_v40, %v2463_v31  ;;  %v2116_v18 = vrot.slane %v2114_v22, 5  ;;  %v1296_v26 = vadd.f32 %v1286_v17, %v1050_v36  ;;  %v5175_v31 = vld [vmem:[%s6460_s3 + $0x148] sm:$0xff]  ;;  %v2015_v59 = vld [vmem:[#allocation2 + $0x34] sm:$0x1]  ;;  %v5197_v36 = vld [vmem:[%s6460_s3 + $0x1d8] sm:$0xff] }
 0x13f   : > { %v2007_v2 = vsel %vm5936_vm9, %v1938_v33, %v2006_v4  ;;  %v2010_v42 = vsel %vm5795_vm5, %v1939_v0, %v2009_v27  ;;  %v1565_v44 = vadd.f32 %v1554_v51, %v1430_v35  ;;  %v5155_v15 = vld [vmem:[#allocation2 + $0x1c] sm:$0xf0]  ;;  %v2111_v50 = vor.u32 %v2110_v14, %v2107_v9  ;;  %3217 = vmatpush.bf16.msra.mxu3 %v5190_v16  ;;  %v2018_v16 = vld [vmem:[#allocation2 + $0x38] sm:$0xf] }
 0x140   : > { %v2389_v19 = vld [vmem:[#allocation2 + $0x20] sm:$0xe]  ;;  %2008 = vst [vmem:[#allocation2 + $0x28] sm:$0xf] %v2007_v2  ;;  %v1897_v21 = vpack.c.bf16 %v1830_v24, %v1830_v24  ;;  %v4658_v48 = vor.u32 %v5155_v15, %v4657_v56  ;;  %v6094_v52 = vld [vmem:[#allocation2 + $0x24] sm:$0x1]  ;;  %2538 = vmatmul.bf16.gmra.mxu3 %v2470_v32  ;;  %v1431_v57 = vadd.f32 %v1421_v53, %v1296_v26  ;;  %v2193_v4 = vunpack.c.l.b16 %v2103_v63 }
 0x141   : > { %2011 = vst [vmem:[#allocation2 + $0x2c] sm:$0x1] %v2010_v42  ;;  %v1811_v58 = vadd.f32 %v1800_v41, %v1565_v44  ;;  %v4583_v61 = vrot.slane %v2389_v19, 9  ;;  %v2034_v20 = vld [vmem:[#allocation2 + $0x20] sm:$0xf]  ;;  %v2112_v46 = vrot.slane %v2111_v50, 4  ;;  %3084 = vmatpush.bf16.msrb.mxu2 %v5176_v28  ;;  %2910 = vmatpush.bf16.msrb.mxu1 %v5168_v7 }
 0x142   : > { %v1941_v37 = vshrl.u32 %v1897_v21, 16  ;;  %2672 = vmatmul.bf16.gmra.mxu0 %v4658_v48  ;;  %v2430_v11 = vrot.slane %v6094_v52, 5  ;;  %v2119_v35 = vshrl.u32 %v2034_v20, 16  ;;  %v2122_v27 = vshll.u32 %v2034_v20, 16  ;;  %v4541_v13 = vld [vmem:[#allocation2 + $0x20] sm:$0xf]  ;;  %v1802_v51 = vpop.f32.mrf.mxu0 }
 0x143   : > { %v1823_v1 = vadd.f32 %v5904_v3, %v1811_v58  ;;  %v1944_v5 = vshll.u32 %v1897_v21, 16  ;;  %v2117_v23 = vsel %vm5383_vm2, %v2112_v46, %v2116_v18  ;;  %v2128_v25 = vshll.u32 %v6094_v52, 16  ;;  %3463 = vmatpush.bf16.msra.mxu0 %v5198_v62  ;;  %3218 = vmatpush.bf16.msra.mxu3 %v5189_v49  ;;  %v5188_v2 = vld [vmem:[%s6460_s3 + $0x190] sm:$0xff]  ;;  %v5167_v19 = vld [vmem:[%s6460_s3 + $0x108] sm:$0xff]  ;;  %v2021_v28 = vld [vmem:[#allocation2 + $0x3c] sm:$0x1] }
 0x144   : > { %v1943_v47 = vrot.slane %v1941_v37, 7  ;;  %v2121_v60 = vrot.slane %v2119_v35, 4  ;;  %v2194_v6 = vunpack.c.l.b16 %v2117_v23  ;;  %v2124_v10 = vrot.slane %v2122_v27, 5  ;;  %v5196_v20 = vld [vmem:[%s6460_s3 + $0x1d0] sm:$0xff]  ;;  %v5166_v35 = vld [vmem:[%s6460_s3 + $0x100] sm:$0xff]  ;;  %v5195_v49 = vld [vmem:[%s6460_s3 + $0x1c8] sm:$0xff] }
 0x145   : > { %v1831_v8 = vmax.f32 %v1823_v1, 0.0  ;;  %v2431_v17 = vsel %vm5969_vm12, %v4583_v61, %v2430_v11  ;;  %3085 = vmatpush.bf16.msrb.mxu2 %v5175_v31  ;;  %v2130_v15 = vrot.slane %v2128_v25, 5  ;;  %2911 = vmatpush.bf16.msrb.mxu1 %v5167_v19  ;;  %v5174_v61 = vld [vmem:[%s6460_s3 + $0x140] sm:$0xff]  ;;  %v3251_v19 = vld [vmem:[#allocation2 + $0x10] sm:$0xf] }
 0x146   : > { %v1946_v30 = vor.u32 %v1944_v5, %v1943_v47  ;;  %v1947_v22 = vrot.slane %v1943_v47, 4  ;;  %v1556_v34 = vpop.f32.mrf.mxu3  ;;  %v2200_v0 = vpack.c.b16 %v2194_v6, %v2193_v4  ;;  %v2125_v43 = vor.u32 %v2124_v10, %v2121_v60  ;;  %v5186_v31 = vld [vmem:[%s6460_s3 + $0x180] sm:$0xff] }
 0x147   : > { %v1898_v33 = vpack.c.bf16 %v1831_v8, %v1831_v8  ;;  %v1566_v40 = vadd.f32 %v1556_v34, %v1431_v57  ;;  %v5128_v9 = vld [vmem:[#allocation2 + $0x24] sm:$0xf0]  ;;  %v2465_v53 = vunpack.c.l.b16 %v2431_v17  ;;  %3464 = vmatpush.bf16.msra.mxu0 %v5197_v36  ;;  %3219 = vmatpush.bf16.msra.mxu3 %v5188_v2 }
 0x148   : > { %v2390_v38 = vld [vmem:[#allocation2 + $0x28] sm:$0xe]  ;;  %v2013_v24 = vsel %vm5936_vm9, %v1946_v30, %v2012_v12  ;;  %v2016_v41 = vsel %vm5795_vm5, %v1947_v22, %v2015_v59  ;;  %v4542_v56 = vor.u32 %v5128_v9, %v4541_v13  ;;  %v2059_v63 = vld [vmem:[#allocation2 + $0x2c] sm:$0x1]  ;;  %v2126_v21 = vrot.slane %v2125_v43, 4 }
 0x149   : > { %v4584_v14 = vrot.slane %v2390_v38, 9  ;;  %v2035_v29 = vld [vmem:[#allocation2 + $0x28] sm:$0xf]  ;;  %2014 = vst [vmem:[#allocation2 + $0x30] sm:$0xf] %v2013_v24  ;;  %v1949_v42 = vshrl.u32 %v1898_v33, 16  ;;  %2268 = vmatmul.bf16.gmra.mxu1 %v2200_v0  ;;  %v1812_v44 = vadd.f32 %v1802_v51, %v1566_v40  ;;  %3086 = vmatpush.bf16.msrb.mxu2 %v5174_v61 }
 0x14a   : > { %v2434_v32 = vrot.slane %v2059_v63, 5  ;;  %2017 = vst [vmem:[#allocation2 + $0x34] sm:$0x1] %v2016_v41  ;;  %2374 = vmatmul.bf16.gmra.mxu2 %v4542_v56  ;;  %v2133_v48 = vshrl.u32 %v2035_v29, 16  ;;  %v2136_v50 = vshll.u32 %v2035_v29, 16  ;;  %v1952_v52 = vshll.u32 %v1898_v33, 16  ;;  %2912 = vmatpush.bf16.msrb.mxu1 %v5166_v35 }
 0x14b   : > { %v1951_v18 = vrot.slane %v1949_v42, 7  ;;  %v1824_v26 = vadd.f32 %v5904_v3, %v1812_v44  ;;  %v2142_v11 = vshll.u32 %v2059_v63, 16  ;;  %v5187_v3 = vld [vmem:[%s6460_s3 + $0x188] sm:$0xff]  ;;  %v2131_v27 = vsel %vm5383_vm2, %v2126_v21, %v2130_v15  ;;  %3465 = vmatpush.bf16.msra.mxu0 %v5196_v20  ;;  %v6158_v22 = vld [vmem:[#allocation2 + $0x10] sm:$0xe]  ;;  %v5221_v24 = vld [vmem:[%s6462_s5 + $0x38] sm:$0xff] }
 0x14c   : > { %v2435_v58 = vsel %vm5969_vm12, %v4584_v14, %v2434_v32  ;;  %v2135_v37 = vrot.slane %v2133_v48, 4  ;;  %v2138_v46 = vrot.slane %v2136_v50, 5  ;;  %v4661_v60 = vld [vmem:[#allocation2 + $0x28] sm:$0xf]  ;;  %3220 = vmatpush.bf16.msra.mxu3 %v5187_v3  ;;  %v2195_v13 = vunpack.c.l.b16 %v2131_v27  ;;  %v2024_v9 = vld [vmem:[#allocation2 + $0x40] sm:$0xf] }
 0x14d   : > { %v2466_v7 = vunpack.c.l.b16 %v2435_v58  ;;  %v1954_v57 = vor.u32 %v1952_v52, %v1951_v18  ;;  %v1955_v12 = vrot.slane %v1951_v18, 4  ;;  %v1832_v1 = vmax.f32 %v1824_v26, 0.0  ;;  %v2027_v41 = vld [vmem:[#allocation2 + $0x44] sm:$0x1]  ;;  %v6171_v42 = vld [vmem:[#allocation2 + $0x14] sm:$0x1]  ;;  %3783 = vmatpush.bf16.msra.mxu2 %v5221_v24 }
 0x14e   : > { %v2139_v62 = vor.u32 %v2138_v46, %v2135_v37  ;;  %v2144_v6 = vrot.slane %v2142_v11, 5  ;;  %v5194_v63 = vld [vmem:[%s6460_s3 + $0x1c0] sm:$0xff]  ;;  %v4748_v44 = vrot.slane %v6158_v22, 9  ;;  %v6180_v20 = vld [vmem:[#allocation2 + $0xc] sm:$0x1]  ;;  %v2972_v55 = vrot.slane %v6171_v42, 5 }
 0x14f   : > { %v2471_v4 = vpack.c.b16 %v2466_v7, %v2465_v53  ;;  %v2019_v47 = vsel %vm5936_vm9, %v1954_v57, %v2018_v16  ;;  %v2022_v5 = vsel %vm5795_vm5, %v1955_v12, %v2021_v28  ;;  %v1899_v23 = vpack.c.bf16 %v1832_v1, %v1832_v1  ;;  %3466 = vmatpush.bf16.msra.mxu0 %v5195_v49  ;;  %v3253_v16 = vld [vmem:[#allocation2 + $0x18] sm:$0xf]  ;;  %v6182_v7 = vld [vmem:[#allocation2 + $0x8] sm:$0xe]  ;;  %v5220_v1 = vld [vmem:[%s6462_s5 + $0x30] sm:$0xff] }
 0x150   : > { %2020 = vst [vmem:[#allocation2 + $0x38] sm:$0xf] %v2019_v47  ;;  %v5156_v59 = vld [vmem:[#allocation2 + $0x2c] sm:$0xf0]  ;;  %v2140_v8 = vrot.slane %v2139_v62, 4  ;;  %3221 = vmatpush.bf16.msra.mxu3 %v5186_v31  ;;  %v3268_v57 = vshrl.u32 %v3251_v19, 16 }
 0x151   : > { %2023 = vst [vmem:[#allocation2 + $0x3c] sm:$0x1] %v2022_v5  ;;  %v1957_v10 = vshrl.u32 %v1899_v23, 16  ;;  %v1960_v25 = vshll.u32 %v1899_v23, 16  ;;  %2543 = vmatmul.bf16.gmra.mxu3 %v2471_v4  ;;  %v4662_v30 = vor.u32 %v5156_v59, %v4661_v60  ;;  %v6162_v17 = vld [vmem:[#allocation2 + $0x34] sm:$0x1]  ;;  %3784 = vmatpush.bf16.msra.mxu2 %v5220_v1 }
 0x152   : > { %v2145_v34 = vsel %vm5383_vm2, %v2140_v8, %v2144_v6  ;;  %v2391_v33 = vld [vmem:[#allocation2 + $0x30] sm:$0xe]  ;;  %v2438_v36 = vrot.slane %v6162_v17, 5  ;;  %v2156_v46 = vshll.u32 %v6162_v17, 16  ;;  %v5209_v12 = vld [vmem:[%s6460_s3 + $0x238] sm:$0xff]  ;;  %v3282_v47 = vshrl.u32 %v3253_v16, 16 }
 0x153   : > { %v2036_v0 = vld [vmem:[#allocation2 + $0x30] sm:$0xf]  ;;  %v1959_v40 = vrot.slane %v1957_v10, 7  ;;  %2677 = vmatmul.bf16.gmra.mxu0 %v4662_v30  ;;  %v2196_v38 = vunpack.c.l.b16 %v2145_v34  ;;  %v4585_v43 = vrot.slane %v2391_v33, 9  ;;  %v3271_v49 = vshll.u32 %v3251_v19, 16  ;;  %5230 = vmatpush.bf16.msra.mxu1 %v5209_v12 }
 0x154   : > { %v2147_v51 = vshrl.u32 %v2036_v0, 16  ;;  %v2150_v56 = vshll.u32 %v2036_v0, 16  ;;  %5238 = vmatpush.bf16.msrb.mxu3 %v5221_v24  ;;  %v4545_v48 = vld [vmem:[#allocation2 + $0x30] sm:$0xf]  ;;  %3467 = vmatpush.bf16.msra.mxu0 %v5194_v63  ;;  %v2158_v31 = vrot.slane %v2156_v46, 5  ;;  %v4747_v59 = vrot.slane %v6182_v7, 9 }
 0x155   : > { %v1962_v14 = vor.u32 %v1960_v25, %v1959_v40  ;;  %v1963_v29 = vrot.slane %v1959_v40, 4  ;;  %v2201_v2 = vpack.c.b16 %v2196_v38, %v2195_v13  ;;  %v2439_v52 = vsel %vm5969_vm12, %v4585_v43, %v2438_v36  ;;  %v5208_v6 = vld [vmem:[%s6460_s3 + $0x230] sm:$0xff]  ;;  %v2696_v34 = vld [vmem:[#allocation2 + $0x8] sm:$0xf] }
 0x156   : > { %v2149_v32 = vrot.slane %v2147_v51, 4  ;;  %v2152_v15 = vrot.slane %v2150_v56, 5  ;;  %v2467_v11 = vunpack.c.l.b16 %v2439_v52  ;;  %v2968_v8 = vrot.slane %v6180_v20, 5  ;;  %v2698_v13 = vld [vmem:[#allocation2 + $0x10] sm:$0xf] }
 0x157   : > { %v2025_v53 = vsel %vm5936_vm9, %v1962_v14, %v2024_v9  ;;  %v2028_v21 = vsel %vm5795_vm5, %v1963_v29, %v2027_v41  ;;  %v5129_v50 = vld [vmem:[#allocation2 + $0x34] sm:$0xf0]  ;;  %v3284_v30 = vrot.slane %v3282_v47, 4  ;;  %v3285_v22 = vshll.u32 %v3253_v16, 16  ;;  %5231 = vmatpush.bf16.msra.mxu1 %v5208_v6  ;;  %v6203_v51 = vld [vmem:[#allocation2 + $0x1c] sm:$0x1] }
 0x158   : > { %v2392_v18 = vld [vmem:[#allocation2 + $0x38] sm:$0xe]  ;;  %2026 = vst [vmem:[#allocation2 + $0x40] sm:$0xf] %v2025_v53  ;;  %v4546_v28 = vor.u32 %v5129_v50, %v4545_v48  ;;  %v2061_v26 = vld [vmem:[#allocation2 + $0x3c] sm:$0x1]  ;;  %v2153_v61 = vor.u32 %v2152_v15, %v2149_v32  ;;  %3634 = vmatpush.bf16.msrb.mxu0 %v5209_v12  ;;  %5239 = vmatpush.bf16.msrb.mxu3 %v5220_v1 }
 0x159   : > { %v4586_v58 = vrot.slane %v2392_v18, 9  ;;  %2029 = vst [vmem:[#allocation2 + $0x44] sm:$0x1] %v2028_v21  ;;  %2273 = vmatmul.bf16.gmra.mxu1 %v2201_v2  ;;  %v2442_v54 = vrot.slane %v2061_v26, 5  ;;  %v2037_v37 = vld [vmem:[#allocation2 + $0x38] sm:$0xf]  ;;  %v2973_v9 = vsel %vm5969_vm12, %v4748_v44, %v2972_v55  ;;  %v2969_v16 = vsel %vm5969_vm12, %v4747_v59, %v2968_v8 }
 0x15a   : > { %2379 = vmatmul.bf16.gmra.mxu2 %v4546_v28  ;;  %v2161_v3 = vshrl.u32 %v2037_v37, 16  ;;  %v2164_v35 = vshll.u32 %v2037_v37, 16  ;;  %v2154_v27 = vrot.slane %v2153_v61, 4  ;;  %v2170_v62 = vshll.u32 %v2061_v26, 16  ;;  %v4665_v17 = vld [vmem:[#allocation2 + $0x38] sm:$0xf] }
 0x15b   : > { %v2443_v4 = vsel %vm5969_vm12, %v4586_v58, %v2442_v54  ;;  %v3270_v38 = vrot.slane %v3268_v57, 4  ;;  %v3273_v24 = vrot.slane %v3271_v49, 5  ;;  %v3287_v41 = vrot.slane %v3285_v22, 5  ;;  %v5219_v14 = vld [vmem:[%s6462_s5 + $0x28] sm:$0xff]  ;;  %v6212_v21 = vld [vmem:[#allocation2 + $0x14] sm:$0x1] }
 0x15c   : > { %v2468_v5 = vunpack.c.l.b16 %v2443_v4  ;;  %v2163_v23 = vrot.slane %v2161_v3, 4  ;;  %v2166_v60 = vrot.slane %v2164_v35, 5  ;;  %v2159_v0 = vsel %vm5383_vm2, %v2154_v27, %v2158_v31  ;;  %3635 = vmatpush.bf16.msrb.mxu0 %v5208_v6  ;;  %3785 = vmatpush.bf16.msra.mxu2 %v5219_v14  ;;  %v2945_v37 = vld [vmem:[#allocation2 + $0x20] sm:$0xe]  ;;  %v6216_v57 = vld [vmem:[#allocation2 + $0x24] sm:$0x1] }
 0x15d   : > { %v2172_v40 = vrot.slane %v2170_v62, 5  ;;  %v2713_v56 = vshrl.u32 %v2696_v34, 16  ;;  %v2716_v63 = vshll.u32 %v2696_v34, 16  ;;  %v3288_v2 = vor.u32 %v3287_v41, %v3284_v30  ;;  %5240 = vmatpush.bf16.msrb.mxu3 %v5219_v14  ;;  %v3257_v12 = vld [vmem:[#allocation2 + $0x28] sm:$0xf]  ;;  %v5218_v47 = vld [vmem:[%s6462_s5 + $0x20] sm:$0xff] }
 0x15e   : > { %v2472_v10 = vpack.c.b16 %v2468_v5, %v2467_v11  ;;  %v2167_v25 = vor.u32 %v2166_v60, %v2163_v23  ;;  %v2727_v44 = vshrl.u32 %v2698_v13, 16  ;;  %v2730_v32 = vshll.u32 %v2698_v13, 16  ;;  %v5182_v11 = vld [vmem:[#allocation2 + $0x14] sm:$0xf0]  ;;  %v3255_v27 = vld [vmem:[#allocation2 + $0x20] sm:$0xf] }
 0x15f   : > { %v5157_v33 = vld [vmem:[#allocation2 + $0x3c] sm:$0xf0]  ;;  %v2197_v15 = vunpack.c.l.b16 %v2159_v0  ;;  %v3016_v53 = vunpack.c.l.b16 %v2973_v9  ;;  %v3274_v48 = vor.u32 %v3273_v24, %v3270_v38  ;;  %v3291_v50 = vshll.u32 %v6203_v51, 16  ;;  %v5207_v62 = vld [vmem:[%s6460_s3 + $0x228] sm:$0xff]  ;;  %v6228_v49 = vld [vmem:[#allocation2 + $0x1c] sm:$0x1] }
 0x160   : > { %v4666_v43 = vor.u32 %v5157_v33, %v4665_v17  ;;  %v2168_v36 = vrot.slane %v2167_v25, 4  ;;  %v2729_v18 = vrot.slane %v2727_v44, 4  ;;  %v2732_v52 = vrot.slane %v2730_v32, 5  ;;  %v2944_v59 = vld [vmem:[#allocation2 + $0x18] sm:$0xe]  ;;  %5232 = vmatpush.bf16.msra.mxu1 %v5207_v62  ;;  %3786 = vmatpush.bf16.msra.mxu2 %v5218_v47 }
 0x161   : > { %2548 = vmatmul.bf16.gmra.mxu3 %v2472_v10  ;;  %v2715_v26 = vrot.slane %v2713_v56, 4  ;;  %v2718_v58 = vrot.slane %v2716_v63, 5  ;;  %v3015_v61 = vunpack.c.l.b16 %v2969_v16  ;;  %v3277_v7 = vshll.u32 %v6212_v21, 16  ;;  %v4821_v25 = vld [vmem:[#allocation2 + $0x10] sm:$0xf]  ;;  %3636 = vmatpush.bf16.msrb.mxu0 %v5207_v62 }
 0x162   : > { %v2173_v29 = vsel %vm5383_vm2, %v2168_v36, %v2172_v40  ;;  %v3289_v55 = vrot.slane %v3288_v2, 4  ;;  %v2733_v54 = vor.u32 %v2732_v52, %v2729_v18  ;;  %v3275_v3 = vrot.slane %v3274_v48, 4  ;;  %5241 = vmatpush.bf16.msrb.mxu3 %v5218_v47  ;;  %v2702_v40 = vld [vmem:[#allocation2 + $0x20] sm:$0xf]  ;;  %v2700_v14 = vld [vmem:[#allocation2 + $0x18] sm:$0xf] }
 0x163   : > { %2682 = vmatmul.bf16.gmra.mxu0 %v4666_v43  ;;  %v2198_v19 = vunpack.c.l.b16 %v2173_v29  ;;  %v3023_v46 = vpack.c.b16 %v3016_v53, %v3015_v61  ;;  %v3293_v35 = vrot.slane %v3291_v50, 5  ;;  %v2719_v1 = vor.u32 %v2718_v58, %v2715_v26  ;;  %v6243_v16 = vld [vmem:[#allocation2 + $0x2c] sm:$0x1]  ;;  %v5217_v53 = vld [vmem:[%s6462_s5 + $0x18] sm:$0xff]  ;;  %v6250_v50 = vld [vmem:[#allocation2 + $0x24] sm:$0x1] }
 0x164   : > { %v2736_v4 = vshll.u32 %v6171_v42, 16  ;;  %v3279_v5 = vrot.slane %v3277_v7, 5  ;;  %v2722_v60 = vshll.u32 %v6180_v20, 16  ;;  %v4750_v31 = vrot.slane %v2945_v37, 9  ;;  %v5206_v20 = vld [vmem:[%s6460_s3 + $0x220] sm:$0xff]  ;;  %3787 = vmatpush.bf16.msra.mxu2 %v5217_v53 }
 0x165   : > { %v2202_v28 = vpack.c.b16 %v2198_v19, %v2197_v15  ;;  %v3294_v23 = vsel %vm5383_vm2, %v3289_v55, %v3293_v35  ;;  %v2734_v42 = vrot.slane %v2733_v54, 4  ;;  %v2980_v8 = vrot.slane %v6216_v57, 5  ;;  %5233 = vmatpush.bf16.msra.mxu1 %v5206_v20  ;;  %3637 = vmatpush.bf16.msrb.mxu0 %v5206_v20  ;;  %v5183_v62 = vld [vmem:[#allocation2 + $0x24] sm:$0xf0]  ;;  %v6254_v47 = vld [vmem:[#allocation2 + $0x34] sm:$0x1] }
 0x166   : > { %v3310_v6 = vshrl.u32 %v3257_v12, 16  ;;  %v3313_v10 = vshll.u32 %v3257_v12, 16  ;;  %v3280_v30 = vsel %vm5383_vm2, %v3275_v3, %v3279_v5  ;;  %v3296_v22 = vshrl.u32 %v3255_v27, 16  ;;  %5242 = vmatpush.bf16.msrb.mxu3 %v5217_v53  ;;  %v3261_v5 = vld [vmem:[#allocation2 + $0x38] sm:$0xf] }
 0x167   : > { %v3299_v34 = vshll.u32 %v3255_v27, 16  ;;  %v4822_v13 = vor.u32 %v5182_v11, %v4821_v25  ;;  %v3397_v17 = vunpack.c.l.b16 %v3294_v23  ;;  %v2720_v33 = vrot.slane %v2719_v1, 4  ;;  %v3259_v1 = vld [vmem:[#allocation2 + $0x30] sm:$0xf]  ;;  %v5205_v25 = vld [vmem:[%s6460_s3 + $0x218] sm:$0xff] }
 0x168   : > { %v2738_v0 = vrot.slane %v2736_v4, 5  ;;  %v4749_v9 = vrot.slane %v2944_v59, 9  ;;  %v2976_v38 = vrot.slane %v6228_v49, 5  ;;  %v3312_v43 = vrot.slane %v3310_v6, 4  ;;  %v2947_v59 = vld [vmem:[#allocation2 + $0x30] sm:$0xe] }
 0x169   : > { %2278 = vmatmul.bf16.gmra.mxu1 %v2202_v28  ;;  %v3315_v36 = vrot.slane %v3313_v10, 5  ;;  %v3396_v24 = vunpack.c.l.b16 %v3280_v30  ;;  %v2724_v41 = vrot.slane %v2722_v60, 5  ;;  %v2981_v63 = vsel %vm5969_vm12, %v4750_v31, %v2980_v8  ;;  %v5216_v30 = vld [vmem:[%s6462_s5 + $0x10] sm:$0xff]  ;;  %3638 = vmatpush.bf16.msrb.mxu0 %v5205_v25 }
 0x16a   : > { %3087 = vmatmul.bf16.vlgmr.msrb.gmra.mxu2 %v3023_v46  ;;  %v2739_v56 = vsel %vm5383_vm2, %v2734_v42, %v2738_v0  ;;  %v3298_v29 = vrot.slane %v3296_v22, 4  ;;  %v3301_v2 = vrot.slane %v3299_v34, 5  ;;  %v2755_v44 = vshrl.u32 %v2702_v40, 16  ;;  %v4825_v22 = vld [vmem:[#allocation2 + $0x20] sm:$0xf]  ;;  %5234 = vmatpush.bf16.msra.mxu1 %v5205_v25 }
 0x16b   : > { %v2758_v32 = vshll.u32 %v2702_v40, 16  ;;  %v3404_v15 = vpack.c.b16 %v3397_v17, %v3396_v24  ;;  %v2725_v19 = vsel %vm5383_vm2, %v2720_v33, %v2724_v41  ;;  %v2977_v48 = vsel %vm5969_vm12, %v4749_v9, %v2976_v38  ;;  %v6265_v0 = vld [vmem:[#allocation2 + $0x2c] sm:$0x1]  ;;  %3788 = vmatpush.bf16.msra.mxu2 %v5216_v30  ;;  %v2704_v41 = vld [vmem:[#allocation2 + $0x28] sm:$0xf]  ;;  %5243 = vmatpush.bf16.msrb.mxu3 %v5216_v30 }
 0x16c   : > { %v3316_v18 = vor.u32 %v3315_v36, %v3312_v43  ;;  %v2741_v52 = vshrl.u32 %v2700_v14, 16  ;;  %v2744_v28 = vshll.u32 %v2700_v14, 16  ;;  %v2842_v26 = vunpack.c.l.b16 %v2739_v56  ;;  %v5204_v56 = vld [vmem:[%s6460_s3 + $0x210] sm:$0xff] }
 0x16d   : > { %v3018_v58 = vunpack.c.l.b16 %v2981_v63  ;;  %v3302_v61 = vor.u32 %v3301_v2, %v3298_v29  ;;  %v3319_v7 = vshll.u32 %v6243_v16, 16  ;;  %v2757_v55 = vrot.slane %v2755_v44, 4  ;;  %v2706_v44 = vld [vmem:[#allocation2 + $0x30] sm:$0xf]  ;;  %3639 = vmatpush.bf16.msrb.mxu0 %v5204_v56 }
 0x16e   : > { %v2760_v54 = vrot.slane %v2758_v32, 5  ;;  %v2841_v37 = vunpack.c.l.b16 %v2725_v19  ;;  %v3017_v46 = vunpack.c.l.b16 %v2977_v48  ;;  %v3305_v11 = vshll.u32 %v6250_v50, 16  ;;  %5235 = vmatpush.bf16.msra.mxu1 %v5204_v56 }
 0x16f   : > { %v3317_v3 = vrot.slane %v3316_v18, 4  ;;  %v2743_v35 = vrot.slane %v2741_v52, 4  ;;  %v2746_v12 = vrot.slane %v2744_v28, 5  ;;  %v3303_v23 = vrot.slane %v3302_v61, 4 }
 0x170   : > { %v2849_v4 = vpack.c.b16 %v2842_v26, %v2841_v37  ;;  %v3024_v27 = vpack.c.b16 %v3018_v58, %v3017_v46  ;;  %v3321_v60 = vrot.slane %v3319_v7, 5  ;;  %v2761_v31 = vor.u32 %v2760_v54, %v2757_v55  ;;  %v6279_v58 = vld [vmem:[#allocation2 + $0x34] sm:$0x1]  ;;  %v6281_v54 = vld [vmem:[#allocation2 + $0x3c] sm:$0x1]  ;;  %v5215_v46 = vld [vmem:[%s6462_s5 + $0x8] sm:$0xff] }
 0x171   : > { %3222 = vmatmul.bf16.vlgmr.msra.gmra.mxu3 %v4822_v13  ;;  %v2764_v42 = vshll.u32 %v6216_v57, 16  ;;  %v3307_v8 = vrot.slane %v3305_v11, 5  ;;  %v3324_v6 = vshrl.u32 %v3259_v1, 16  ;;  %v3327_v10 = vshll.u32 %v3259_v1, 16  ;;  %v2946_v57 = vld [vmem:[#allocation2 + $0x28] sm:$0xe]  ;;  %3789 = vmatpush.bf16.msra.mxu2 %v5215_v46 }
 0x172   : > { %v3322_v34 = vsel %vm5383_vm2, %v3317_v3, %v3321_v60  ;;  %v2747_v20 = vor.u32 %v2746_v12, %v2743_v35  ;;  %v3338_v13 = vshrl.u32 %v3261_v5, 16  ;;  %v3341_v17 = vshll.u32 %v3261_v5, 16  ;;  %5244 = vmatpush.bf16.msrb.mxu3 %v5215_v46  ;;  %v2710_v46 = vld [vmem:[#allocation2 + $0x40] sm:$0xf] }
 0x173   : > { %3468 = vmatmul.bf16.vlgmr.msra.gmra.mxu0 %v3404_v15  ;;  %v4826_v33 = vor.u32 %v5183_v62, %v4825_v22  ;;  %v4752_v40 = vrot.slane %v2947_v59, 9  ;;  %v2988_v9 = vrot.slane %v6254_v47, 5  ;;  %v3308_v38 = vsel %vm5383_vm2, %v3303_v23, %v3307_v8  ;;  %v6294_v8 = vld [vmem:[#allocation2 + $0x30] sm:$0xf]  ;;  %v2948_v22 = vld [vmem:[#allocation2 + $0x38] sm:$0xe] }
 0x174   : > { %v2750_v43 = vshll.u32 %v6228_v49, 16  ;;  %v2762_v36 = vrot.slane %v2761_v31, 4  ;;  %v2766_v24 = vrot.slane %v2764_v42, 5  ;;  %v3399_v63 = vunpack.c.l.b16 %v3322_v34  ;;  %v3263_v34 = vld [vmem:[#allocation2 + $0x40] sm:$0xf] }
 0x175   : > { %v4751_v14 = vrot.slane %v2946_v57, 9  ;;  %v3326_v29 = vrot.slane %v3324_v6, 4  ;;  %v3329_v2 = vrot.slane %v3327_v10, 5  ;;  %v2748_v32 = vrot.slane %v2747_v20, 4  ;;  %v6296_v10 = vld [vmem:[#allocation2 + $0x3c] sm:$0x1] }
 0x176   : > { %v2984_v15 = vrot.slane %v6265_v0, 5  ;;  %v3340_v19 = vrot.slane %v3338_v13, 4  ;;  %v3343_v53 = vrot.slane %v3341_v17, 5  ;;  %v3398_v49 = vunpack.c.l.b16 %v3308_v38  ;;  %v3497_v20 = vld [vmem:[#allocation2 + $0x10] sm:$0xe] }
 0x177   : > { %v2989_v48 = vsel %vm5969_vm12, %v4752_v40, %v2988_v9  ;;  %v2769_v18 = vshrl.u32 %v2704_v41, 16  ;;  %v2772_v52 = vshll.u32 %v2704_v41, 16  ;;  %v2752_v28 = vrot.slane %v2750_v43, 5  ;;  %v6300_v40 = vld [vmem:[#allocation2 + $0x44] sm:$0x1] }
 0x178   : > { %v2767_v26 = vsel %vm5383_vm2, %v2762_v36, %v2766_v24  ;;  %v2783_v61 = vshrl.u32 %v2706_v44, 16  ;;  %v2786_v7 = vshll.u32 %v2706_v44, 16  ;;  %v3405_v55 = vpack.c.b16 %v3399_v63, %v3398_v49  ;;  %v3265_v9 = vld [vmem:[#allocation2 + $0x48] sm:$0xf]  ;;  %v2949_v41 = vld [vmem:[#allocation2 + $0x40] sm:$0xe] }
 0x179   : > { %2913 = vmatmul.bf16.vlgmr.msrb.gmra.mxu1 %v2849_v4  ;;  %v3330_v37 = vor.u32 %v3329_v2, %v3326_v29  ;;  %v2753_v11 = vsel %vm5383_vm2, %v2748_v32, %v2752_v28  ;;  %v2985_v3 = vsel %vm5969_vm12, %v4751_v14, %v2984_v15  ;;  %v3020_v35 = vunpack.c.l.b16 %v2989_v48  ;;  %v6290_v4 = vld [vmem:[#allocation2 + $0x34] sm:$0xf0]  ;;  %v5203_v2 = vld [vmem:[%s6460_s3 + $0x208] sm:$0xff]  ;;  %v5214_v44 = vld [vmem:[%s6462_s5] sm:$0xff] }
 0x17a   : > { %3092 = vmatmul.bf16.gmra.mxu2 %v3024_v27  ;;  %v3344_v12 = vor.u32 %v3343_v53, %v3340_v19  ;;  %v2844_v1 = vunpack.c.l.b16 %v2767_v26  ;;  %v3333_v27 = vshll.u32 %v6279_v58, 16  ;;  %v2771_v62 = vrot.slane %v2769_v18, 4  ;;  %5236 = vmatpush.bf16.msra.mxu1 %v5203_v2  ;;  %v3498_v48 = vld [vmem:[#allocation2 + $0x18] sm:$0xe] }
 0x17b   : > { %v2774_v5 = vrot.slane %v2772_v52, 5  ;;  %v3347_v23 = vshll.u32 %v6281_v54, 16  ;;  %v2785_v60 = vrot.slane %v2783_v61, 4  ;;  %v2788_v31 = vrot.slane %v2786_v7, 5  ;;  %3790 = vmatpush.bf16.msra.mxu2 %v5214_v44  ;;  %3640 = vmatpush.bf16.msrb.mxu0 %v5203_v2 }
 0x17c   : > { %v2843_v42 = vunpack.c.l.b16 %v2753_v11  ;;  %v3019_v59 = vunpack.c.l.b16 %v2985_v3  ;;  %v3331_v6 = vrot.slane %v3330_v37, 4  ;;  %v4830_v25 = vor.u32 %v6290_v4, %v6294_v8  ;;  %5245 = vmatpush.bf16.msrb.mxu3 %v5214_v44  ;;  %v5202_v11 = vld [vmem:[%s6460_s3 + $0x200] sm:$0xff] }
 0x17d   : > { %v3345_v30 = vrot.slane %v3344_v12, 4  ;;  %v3335_v17 = vrot.slane %v3333_v27, 5  ;;  %v3349_v38 = vrot.slane %v3347_v23, 5  ;;  %v2778_v43 = vshll.u32 %v6265_v0, 16 }
 0x17e   : > { %v2850_v57 = vpack.c.b16 %v2844_v1, %v2843_v42  ;;  %v3025_v13 = vpack.c.b16 %v3020_v35, %v3019_v59  ;;  %v2789_v36 = vor.u32 %v2788_v31, %v2785_v60  ;;  %v2792_v24 = vshll.u32 %v6254_v47, 16  ;;  %v2708_v60 = vld [vmem:[#allocation2 + $0x38] sm:$0xf]  ;;  %5237 = vmatpush.bf16.msra.mxu1 %v5202_v11  ;;  %v6331_v42 = vld [vmem:[#allocation2 + $0x4c] sm:$0x1] }
 0x17f   : > { %v3336_v56 = vsel %vm5383_vm2, %v3331_v6, %v3335_v17  ;;  %v4753_v63 = vrot.slane %v2948_v22, 9  ;;  %v3352_v14 = vshrl.u32 %v3263_v34, 16  ;;  %v3355_v29 = vshll.u32 %v3263_v34, 16  ;;  %3641 = vmatpush.bf16.msrb.mxu0 %v5202_v11  ;;  %v6338_v22 = vld [vmem:[#allocation2 + $0x44] sm:$0x1] }
 0x180   : > { %v3350_v47 = vsel %vm5383_vm2, %v3345_v30, %v3349_v38  ;;  %v2992_v0 = vrot.slane %v6296_v10, 5  ;;  %v3366_v32 = vshrl.u32 %v3265_v9, 16  ;;  %v3369_v15 = vshll.u32 %v3265_v9, 16 }
 0x181   : > { %3227 = vmatmul.bf16.gmra.mxu3 %v4826_v33  ;;  %v2775_v33 = vor.u32 %v2774_v5, %v2771_v62  ;;  %v4754_v53 = vrot.slane %v2949_v41, 9  ;;  %v2996_v49 = vrot.slane %v6300_v40, 5  ;;  %v4915_v18 = vrot.slane %v3497_v20, 9 }
 0x182   : > { %v3400_v52 = vunpack.c.l.b16 %v3336_v56  ;;  %v2780_v28 = vrot.slane %v2778_v43, 5  ;;  %v2790_v26 = vrot.slane %v2789_v36, 4  ;;  %v2794_v61 = vrot.slane %v2792_v24, 5 }
 0x183   : > { %3473 = vmatmul.bf16.gmra.mxu0 %v3405_v55  ;;  %v2776_v19 = vrot.slane %v2775_v33, 4  ;;  %v3401_v7 = vunpack.c.l.b16 %v3350_v47  ;;  %v3354_v55 = vrot.slane %v3352_v14, 4  ;;  %v3357_v37 = vrot.slane %v3355_v29, 5 }
 0x184   : > { %v3523_v3 = vrot.slane %v6212_v21, 5  ;;  %v3368_v35 = vrot.slane %v3366_v32, 4  ;;  %v3371_v12 = vrot.slane %v3369_v15, 5  ;;  %v4916_v1 = vrot.slane %v3498_v48, 9  ;;  %v4833_v48 = vld [vmem:[#allocation2 + $0x40] sm:$0xf] }
 0x185   : > { %v3527_v27 = vrot.slane %v6203_v51, 5  ;;  %v2781_v62 = vsel %vm5383_vm2, %v2776_v19, %v2780_v28  ;;  %v2993_v5 = vsel %vm5969_vm12, %v4753_v63, %v2992_v0  ;;  %v2997_v23 = vsel %vm5969_vm12, %v4754_v53, %v2996_v49 }
 0x186   : > { %v3524_v31 = vsel %vm5969_vm12, %v4915_v18, %v3523_v3  ;;  %v2795_v21 = vsel %vm5383_vm2, %v2790_v26, %v2794_v61  ;;  %v2811_v51 = vshrl.u32 %v2710_v46, 16  ;;  %v2814_v59 = vshll.u32 %v2710_v46, 16  ;;  %v5185_v18 = vld [vmem:[#allocation2 + $0x44] sm:$0xf0] }
 0x187   : > { %v3528_v6 = vsel %vm5969_vm12, %v4916_v1, %v3527_v27  ;;  %v3406_v30 = vpack.c.b16 %v3401_v7, %v3400_v52  ;;  %v3375_v34 = vshll.u32 %v6331_v42, 16  ;;  %v3570_v20 = vunpack.c.l.b16 %v3524_v31  ;;  %v3499_v31 = vld [vmem:[#allocation2 + $0x20] sm:$0xe] }
 0x188   : > { %v3372_v17 = vor.u32 %v3371_v12, %v3368_v35  ;;  %v2797_v33 = vshrl.u32 %v2708_v60, 16  ;;  %v2800_v9 = vshll.u32 %v2708_v60, 16  ;;  %v2846_v38 = vunpack.c.l.b16 %v2795_v21  ;;  %v5210_v12 = vld [vmem:[%s5349_s26 + $0xdc] sm:$0xf0]  ;;  %v5213_v60 = vld [vmem:[%s5349_s26 + $0x10c] sm:$0xf0] }
 0x189   : > { %2918 = vmatmul.bf16.gmra.mxu1 %v2850_v57  ;;  %v3571_v57 = vunpack.c.l.b16 %v3528_v6  ;;  %v3022_v36 = vunpack.c.l.b16 %v2997_v23  ;;  %v3361_v24 = vshll.u32 %v6338_v22, 16  ;;  %v2813_v41 = vrot.slane %v2811_v51, 4  ;;  %v4993_v23 = vld [vmem:[%s5349_s26 + $0x108] sm:$0xf] }
 0x18a   : > { %3097 = vmatmul.bf16.gmra.mxu2 %v3025_v13  ;;  %v3358_v13 = vor.u32 %v3357_v37, %v3354_v55  ;;  %v2816_v4 = vrot.slane %v2814_v59, 5  ;;  %v2845_v8 = vunpack.c.l.b16 %v2781_v62  ;;  %v3377_v56 = vrot.slane %v3375_v34, 5 }
 0x18b   : > { %v3578_v43 = vpack.c.b16 %v3571_v57, %v3570_v20  ;;  %v3373_v14 = vrot.slane %v3372_v17, 4  ;;  %v2799_v29 = vrot.slane %v2797_v33, 4  ;;  %v2802_v2 = vrot.slane %v2800_v9, 5  ;;  %v4985_v33 = vld [vmem:[%s5349_s26 + $0xe8] sm:$0xf] }
 0x18c   : > { %v3359_v63 = vrot.slane %v3358_v13, 4  ;;  %v2851_v44 = vpack.c.b16 %v2846_v38, %v2845_v8  ;;  %v3363_v0 = vrot.slane %v3361_v24, 5  ;;  %v2817_v32 = vor.u32 %v2816_v4, %v2813_v41  ;;  %v5211_v9 = vld [vmem:[%s5349_s26 + $0xec] sm:$0xf0] }
 0x18d   : > { %v3378_v19 = vsel %vm5383_vm2, %v3373_v14, %v3377_v56  ;;  %v2803_v53 = vor.u32 %v2802_v2, %v2799_v29  ;;  %v2820_v49 = vshll.u32 %v6300_v40, 16  ;;  %v2806_v52 = vshll.u32 %v6296_v10, 16  ;;  %v4981_v10 = vld [vmem:[%s5349_s26 + $0xd8] sm:$0xf] }
 0x18e   : > { %v3364_v15 = vsel %vm5383_vm2, %v3359_v63, %v3363_v0  ;;  %v2818_v28 = vrot.slane %v2817_v32, 4  ;;  %v3403_v61 = vunpack.c.l.b16 %v3378_v19  ;;  %v4834_v37 = vor.u32 %v5185_v18, %v4833_v48  ;;  %v3501_v63 = vld [vmem:[#allocation2 + $0x30] sm:$0xe]  ;;  %v4989_v48 = vld [vmem:[%s5349_s26 + $0xf8] sm:$0xf] }
 0x18f   : > { %v3402_v26 = vunpack.c.l.b16 %v3364_v15  ;;  %v2804_v7 = vrot.slane %v2803_v53, 4  ;;  %v2822_v55 = vrot.slane %v2820_v49, 5  ;;  %v2808_v46 = vrot.slane %v2806_v52, 5  ;;  %v5212_v18 = vld [vmem:[%s5349_s26 + $0xfc] sm:$0xf0] }
 0x190   : > { %v4982_v27 = vor.u32 %v5210_v12, %v4981_v10  ;;  %v3535_v21 = vrot.slane %v6243_v16, 5  ;;  %v4994_v59 = vor.u32 %v5213_v60, %v4993_v23  ;;  %v3531_v6 = vrot.slane %v6250_v50, 5 }
 0x191   : > { %3232 = vmatmul.bf16.gmra.mxu3 %v4830_v25  ;;  %v3021_v25 = vunpack.c.l.b16 %v2993_v5  ;;  %v2823_v11 = vsel %vm5383_vm2, %v2818_v28, %v2822_v55  ;;  %v3407_v40 = vpack.c.b16 %v3403_v61, %v3402_v26  ;;  %v2809_v3 = vsel %vm5383_vm2, %v2804_v7, %v2808_v46  ;;  %v3500_v5 = vld [vmem:[#allocation2 + $0x28] sm:$0xe]  ;;  %v3503_v46 = vld [vmem:[#allocation2 + $0x40] sm:$0xe] }
 0x192   : > { %v2848_v35 = vunpack.c.l.b16 %v2823_v11  ;;  %v2847_v1 = vunpack.c.l.b16 %v2809_v3  ;;  %v4918_v51 = vrot.slane %v3500_v5, 9  ;;  %v4986_v24 = vor.u32 %v5211_v9, %v4985_v33  ;;  %v3504_v11 = vld [vmem:[#allocation2 + $0x48] sm:$0xe] }
 0x193   : > { %3478 = vmatmul.bf16.gmra.mxu0 %v3406_v30  ;;  %v3026_v47 = vpack.c.b16 %v3022_v36, %v3021_v25  ;;  %v4917_v30 = vrot.slane %v3499_v31, 9  ;;  %v3502_v25 = vld [vmem:[#allocation2 + $0x38] sm:$0xe]  ;;  %v4990_v61 = vor.u32 %v5212_v18, %v4989_v48  ;;  %v4921_v3 = vrot.slane %v3503_v46, 9 }
 0x194   : > { %v2852_v62 = vpack.c.b16 %v2848_v35, %v2847_v1  ;;  %v3536_v20 = vsel %vm5969_vm12, %v4918_v51, %v3535_v21  ;;  %v4920_v14 = vrot.slane %v3502_v25, 9  ;;  %v3547_v35 = vrot.slane %v6338_v22, 5 }
 0x195   : > { %v3532_v57 = vsel %vm5969_vm12, %v4917_v30, %v3531_v6  ;;  %v3573_v17 = vunpack.c.l.b16 %v3536_v20  ;;  %v4922_v10 = vrot.slane %v3504_v11, 9  ;;  %v3551_v12 = vrot.slane %v6331_v42, 5 }
 0x196   : > { %v3572_v38 = vunpack.c.l.b16 %v3532_v57  ;;  %v3548_v23 = vsel %vm5969_vm12, %v4921_v3, %v3547_v35 }
 0x197   : > { %v3552_v60 = vsel %vm5969_vm12, %v4922_v10, %v3551_v12  ;;  %v3576_v51 = vunpack.c.l.b16 %v3548_v23 }
 0x198   : > { %v3579_v50 = vpack.c.b16 %v3573_v17, %v3572_v38 }
 0x199   : > { %2923 = vmatmul.bf16.gmra.mxu1 %v2851_v44  ;;  %v4919_v44 = vrot.slane %v3501_v63, 9 }
 0x19a   : > { %3102 = vmatmul.bf16.gmra.mxu2 %v3026_v47  ;;  %v3539_v47 = vrot.slane %v6279_v58, 5 }
 0x19c   : > { %v3540_v53 = vsel %vm5969_vm12, %v4919_v44, %v3539_v47 }
 0x1a1   : > { %3237 = vmatmul.bf16.gmra.mxu3 %v4834_v37 }
 0x1a3   : > { %3483 = vmatmul.bf16.gmra.mxu0 %v3407_v40 }
 0x1a9   : > { %2928 = vmatmul.bf16.gmra.mxu1 %v2852_v62 }
 0x1aa   : > { %3791 = vmatmul.bf16.vlgmr.msra.gmra.mxu2 %v4982_v27 }
 0x1ad   : > { %v2365_v39 = vpop.f32.mrf.mxu2 }
 0x1af   : > { %v2668_v34 = vpop.f32.mrf.mxu0 }
 0x1b1   : > { %3806 = vmatmul.bf16.vlgmr.msrb.gmra.mxu3 %v4994_v59 }
 0x1b3   : > { %v2534_v13 = vpop.f32.mrf.mxu3  ;;  %3642 = vmatmul.bf16.vlgmr.msrb.gmra.mxu0 %v3578_v43  ;;  %v3543_v43 = vrot.slane %v6281_v54, 5  ;;  %v3574_v54 = vunpack.c.l.b16 %v3540_v53 }
 0x1b5   : > { %v2367_v16 = vpop.f32.mrf.mxu2  ;;  %v3544_v15 = vsel %vm5969_vm12, %v4920_v14, %v3543_v43 }
 0x1b6   : > { %v2264_v36 = vpop.f32.mrf.mxu1  ;;  %v3575_v49 = vunpack.c.l.b16 %v3544_v15 }
 0x1b7   : > { %v2366_v41 = vadd.f32 %v2365_v39, %v2264_v36  ;;  %v2670_v4 = vpop.f32.mrf.mxu0  ;;  %v3577_v39 = vunpack.c.l.b16 %v3552_v60 }
 0x1b8   : > { %v3580_v55 = vpack.c.b16 %v3575_v49, %v3574_v54 }
 0x1b9   : > { %v2554_v8 = vadd.f32 %v2534_v13, %v2366_v41  ;;  %3647 = vmatmul.bf16.vlgmr.msra.gmra.mxu1 %v3579_v50  ;;  %v3581_v20 = vpack.c.b16 %v3577_v39, %v3576_v51  ;;  %v6403_v39 = vld [vmem:[%s6463_s6] ss:$0 sm:$0xff] }
 0x1ba   : > { %3796 = vmatmul.bf16.gmra.mxu2 %v4986_v24 }
 0x1bb   : > { %v2536_v56 = vpop.f32.mrf.mxu3  ;;  %v2688_v21 = vadd.f32 %v2668_v34, %v2554_v8 }
 0x1bd   : > { %v2370_v29 = vpop.f32.mrf.mxu2 }
 0x1be   : > { %v2266_v2 = vpop.f32.mrf.mxu1 }
 0x1bf   : > { %v2368_v0 = vadd.f32 %v2367_v16, %v2266_v2  ;;  %v2673_v32 = vpop.f32.mrf.mxu0 }
 0x1c1   : > { %v2555_v19 = vadd.f32 %v2536_v56, %v2368_v0 }
 0x1c3   : > { %v2539_v52 = vpop.f32.mrf.mxu3  ;;  %v2689_v13 = vadd.f32 %v2670_v4, %v2555_v19 }
 0x1c5   : > { %v2372_v28 = vpop.f32.mrf.mxu2 }
 0x1c6   : > { %v2269_v26 = vpop.f32.mrf.mxu1 }
 0x1c7   : > { %v2371_v7 = vadd.f32 %v2370_v29, %v2269_v26  ;;  %v2675_v58 = vpop.f32.mrf.mxu0 }
 0x1c9   : > { %v2556_v37 = vadd.f32 %v2539_v52, %v2371_v7  ;;  %3652 = vmatmul.bf16.gmra.mxu1 %v3580_v55 }
 0x1ca   : > { %3801 = vmatmul.bf16.gmra.mxu2 %v4990_v61 }
 0x1cb   : > { %v2541_v40 = vpop.f32.mrf.mxu3  ;;  %v2690_v36 = vadd.f32 %v2673_v32, %v2556_v37 }
 0x1cd   : > { %v2375_v1 = vpop.f32.mrf.mxu2 }
 0x1ce   : > { %v2271_v27 = vpop.f32.mrf.mxu1 }
 0x1cf   : > { %v2373_v62 = vadd.f32 %v2372_v28, %v2271_v27 }
 0x1d0   : > { %v2678_v5 = vpop.f32.mrf.mxu0 }
 0x1d1   : > { %v2557_v31 = vadd.f32 %v2541_v40, %v2373_v62 }
 0x1d3   : > { %v2691_v56 = vadd.f32 %v2675_v58, %v2557_v31 }
 0x1d4   : > { %v2544_v59 = vpop.f32.mrf.mxu3 }
 0x1d5   : > { %v2377_v6 = vpop.f32.mrf.mxu2 }
 0x1d6   : > { %v2274_v22 = vpop.f32.mrf.mxu1 }
 0x1d7   : > { %v2376_v30 = vadd.f32 %v2375_v1, %v2274_v22 }
 0x1d8   : > { %v2680_v42 = vpop.f32.mrf.mxu0 }
 0x1d9   : > { %v2558_v57 = vadd.f32 %v2544_v59, %v2376_v30  ;;  %3657 = vmatmul.bf16.gmra.mxu1 %v3581_v20  ;;  %v6410_v20 = vld [vmem:[%s6461_s4] ss:$0 sm:$0xff] }
 0x1db   : > { %v6378_v44 = vadd.f32 %v2678_v5, %v2558_v57 }
 0x1dc   : > { %v2546_v17 = vpop.f32.mrf.mxu3 }
 0x1dd   : > { %v2380_v33 = vpop.f32.mrf.mxu2 }
 0x1de   : > { %v2276_v9 = vpop.f32.mrf.mxu1 }
 0x1df   : > { %v2378_v16 = vadd.f32 %v2377_v6, %v2276_v9 }
 0x1e0   : > { %v2683_v38 = vpop.f32.mrf.mxu0 }
 0x1e1   : > { %v2559_v45 = vadd.f32 %v2546_v17, %v2378_v16 }
 0x1e3   : > { %v6380_v19 = vadd.f32 %v2680_v42, %v2559_v45 }
 0x1e4   : > { %v2549_v41 = vpop.f32.mrf.mxu3 }
 0x1e5   : > { %v2382_v24 = vpop.f32.mrf.mxu2 }
 0x1e6   : > { %v2279_v34 = vpop.f32.mrf.mxu1 }
 0x1e7   : > { %v2381_v50 = vadd.f32 %v2380_v33, %v2279_v34 }
 0x1e8   : > { %v2685_v8 = vpop.f32.mrf.mxu0 }
 0x1e9   : > { %v2560_v25 = vadd.f32 %v2549_v41, %v2381_v50 }
 0x1eb   : > { %v6382_v48 = vadd.f32 %v2683_v38, %v2560_v25 }
 0x1ec   : > { %v2551_v29 = vpop.f32.mrf.mxu3 }
 0x1ed   : > { %v3088_v63 = vpop.f32.mrf.mxu2 }
 0x1ee   : > { %v2281_v14 = vpop.f32.mrf.mxu1 }
 0x1ef   : > { %v2383_v43 = vadd.f32 %v2382_v24, %v2281_v14 }
 0x1f0   : > { %v3469_v2 = vpop.f32.mrf.mxu0 }
 0x1f1   : > { %v2561_v4 = vadd.f32 %v2551_v29, %v2383_v43 }
 0x1f3   : > { %v6384_v26 = vadd.f32 %v2685_v8, %v2561_v4 }
 0x1f4   : > { %v3223_v52 = vpop.f32.mrf.mxu3 }
 0x1f5   : > { %v3090_v47 = vpop.f32.mrf.mxu2 }
 0x1f6   : > { %v2914_v0 = vpop.f32.mrf.mxu1 }
 0x1f7   : > { %v2934_v12 = vadd.f32 %v2914_v0, %v2688_v21 }
 0x1f8   : > { %v3471_v15 = vpop.f32.mrf.mxu0 }
 0x1f9   : > { %v3108_v5 = vadd.f32 %v3088_v63, %v2934_v12 }
 0x1fb   : > { %v3243_v60 = vadd.f32 %v3223_v52, %v3108_v5 }
 0x1fc   : > { %v3225_v55 = vpop.f32.mrf.mxu3 }
 0x1fd   : > { %v3093_v32 = vpop.f32.mrf.mxu2  ;;  %v3489_v30 = vadd.f32 %v3469_v2, %v3243_v60 }
 0x1fe   : > { %v2916_v53 = vpop.f32.mrf.mxu1 }
 0x1ff   : > { %v2935_v31 = vadd.f32 %v2916_v53, %v2689_v13 }
 0x200   : > { %v3474_v49 = vpop.f32.mrf.mxu0 }
 0x201   : > { %v3109_v21 = vadd.f32 %v3090_v47, %v2935_v31 }
 0x203   : > { %v3244_v33 = vadd.f32 %v3225_v55, %v3109_v21 }
 0x204   : > { %v3228_v40 = vpop.f32.mrf.mxu3 }
 0x205   : > { %v3095_v18 = vpop.f32.mrf.mxu2  ;;  %v3490_v41 = vadd.f32 %v3471_v15, %v3244_v33 }
 0x206   : > { %v2919_v28 = vpop.f32.mrf.mxu1 }
 0x207   : > { %v2936_v51 = vadd.f32 %v2919_v28, %v2690_v36 }
 0x208   : > { %v3476_v54 = vpop.f32.mrf.mxu0 }
 0x209   : > { %v3110_v42 = vadd.f32 %v3093_v32, %v2936_v51 }
 0x20b   : > { %v3245_v16 = vadd.f32 %v3228_v40, %v3110_v42 }
 0x20c   : > { %v3230_v1 = vpop.f32.mrf.mxu3 }
 0x20d   : > { %v3098_v61 = vpop.f32.mrf.mxu2  ;;  %v3491_v25 = vadd.f32 %v3474_v49, %v3245_v16 }
 0x20e   : > { %v2921_v7 = vpop.f32.mrf.mxu1 }
 0x20f   : > { %v2937_v38 = vadd.f32 %v2921_v7, %v2691_v56 }
 0x210   : > { %v6386_v58 = vpop.f32.mrf.mxu0 }
 0x211   : > { %v3111_v50 = vadd.f32 %v3095_v18, %v2937_v38 }
 0x213   : > { %v3246_v2 = vadd.f32 %v3230_v1, %v3111_v50 }
 0x214   : > { %v3233_v6 = vpop.f32.mrf.mxu3 }
 0x215   : > { %v6388_v37 = vpop.f32.mrf.mxu2  ;;  %v3492_v52 = vadd.f32 %v3476_v54, %v3246_v2 }
 0x216   : > { %v2924_v46 = vpop.f32.mrf.mxu1 }
 0x217   : > { %v2938_v4 = vadd.f32 %v2924_v46, %v6378_v44 }
 0x218   : > { %v6390_v11 = vpop.f32.mrf.mxu0 }
 0x219   : > { %v3112_v18 = vadd.f32 %v3098_v61, %v2938_v4 }
 0x21b   : > { %v3247_v12 = vadd.f32 %v3233_v6, %v3112_v18 }
 0x21c   : > { %v3235_v8 = vpop.f32.mrf.mxu3 }
 0x21d   : > { %v6392_v3 = vpop.f32.mrf.mxu2  ;;  %v3493_v54 = vadd.f32 %v6386_v58, %v3247_v12 }
 0x21e   : > { %v2926_v35 = vpop.f32.mrf.mxu1 }
 0x21f   : > { %v2939_v44 = vadd.f32 %v2926_v35, %v6380_v19 }
 0x220   : > { %v6394_v10 = vpop.f32.mrf.mxu0 }
 0x221   : > { %v3113_v31 = vadd.f32 %v6388_v37, %v2939_v44 }
 0x223   : > { %v3248_v6 = vadd.f32 %v3235_v8, %v3113_v31 }
 0x224   : > { %v3238_v7 = vpop.f32.mrf.mxu3 }
 0x225   : > { %v6396_v27 = vpop.f32.mrf.mxu2  ;;  %v3494_v37 = vadd.f32 %v6390_v11, %v3248_v6 }
 0x226   : > { %v2929_v62 = vpop.f32.mrf.mxu1 }
 0x227   : > { %v2940_v51 = vadd.f32 %v2929_v62, %v6382_v48 }
 0x228   : > { %v6398_v23 = vpop.f32.mrf.mxu0 }
 0x229   : > { %v3114_v19 = vadd.f32 %v6392_v3, %v2940_v51 }
 0x22d   : > { %v3792_v59 = vpop.f32.mrf.mxu2 }
 0x22e   : > { %v6405_v22 = vpop.f32.mrf.mxu1  ;;  %v3793_v13 = vadd.f32 %v6403_v39, %v3792_v59 }
 0x22f   : > { %v2941_v48 = vadd.f32 %v6405_v22, %v6384_v26 }
 0x230   : > { %v3643_v57 = vpop.f32.mrf.mxu0 }
 0x231   : > { %v3663_v17 = vadd.f32 %v3643_v57, %v3489_v30  ;;  %v3240_v30 = vpop.f32.mrf.mxu3  ;;  %v3115_v3 = vadd.f32 %v6396_v27, %v2941_v48 }
 0x233   : > { %v3675_v9 = vadd.f32 %v6410_v20, %v3663_v17  ;;  %v3249_v17 = vadd.f32 %v3238_v7, %v3114_v19  ;;  %v3250_v22 = vadd.f32 %v3240_v30, %v3115_v3 }
 0x235   : > { %v3812_v45 = vadd.f32 %v3793_v13, %v3675_v9  ;;  %v3794_v36 = vpop.f32.mrf.mxu2  ;;  %v3495_v16 = vadd.f32 %v6394_v10, %v3249_v17  ;;  %v3496_v10 = vadd.f32 %v6398_v23, %v3250_v22 }
 0x236   : > { %v3648_v24 = vpop.f32.mrf.mxu1  ;;  %v3795_v56 = vadd.f32 %v6403_v39, %v3794_v36 }
 0x237   : > { %v3820_v34 = vmax.f32 %v3812_v45, 0.0  ;;  %v3665_v43 = vadd.f32 %v3648_v24, %v3491_v25 }
 0x238   : > { %v3645_v63 = vpop.f32.mrf.mxu0 }
 0x239   : > { %3828 = vst [vmem:[%s6418_s18] sm:$0xff] %v3820_v34  ;;  %v3664_v14 = vadd.f32 %v3645_v63, %v3490_v41  ;;  %v3677_v15 = vadd.f32 %v6410_v20, %v3665_v43  ;;  %v3807_v9 = vpop.f32.mrf.mxu3 }
 0x23a   : > { %v3808_v24 = vadd.f32 %v6403_v39, %v3807_v9 }
 0x23b   : > { %v3676_v29 = vadd.f32 %v6410_v20, %v3664_v14 }
 0x23d   : > { %v3813_v47 = vadd.f32 %v3795_v56, %v3676_v29  ;;  %v3797_v0 = vpop.f32.mrf.mxu2 }
 0x23e   : > { %v3650_v32 = vpop.f32.mrf.mxu1  ;;  %v3798_v53 = vadd.f32 %v6403_v39, %v3797_v0 }
 0x23f   : > { %v3821_v49 = vmax.f32 %v3813_v47, 0.0  ;;  %v3666_v55 = vadd.f32 %v3650_v32, %v3492_v52 }
 0x240   : > { %v3814_v28 = vadd.f32 %v3798_v53, %v3677_v15 }
 0x241   : > { %3829 = vst [vmem:[%s6418_s18 + $0x8] sm:$0xff] %v3821_v49  ;;  %v3678_v1 = vadd.f32 %v6410_v20, %v3666_v55  ;;  %v3809_v25 = vpop.f32.mrf.mxu3 }
 0x242   : > { %v3822_v40 = vmax.f32 %v3814_v28, 0.0  ;;  %v3810_v43 = vadd.f32 %v6403_v39, %v3809_v25 }
 0x244   : > { %3830 = vst [vmem:[%s6418_s18 + $0x10] sm:$0xff] %v3822_v40 }
 0x245   : > { %v3799_v46 = vpop.f32.mrf.mxu2 }
 0x246   : > { %v3653_v5 = vpop.f32.mrf.mxu1  ;;  %v3800_v60 = vadd.f32 %v6403_v39, %v3799_v46 }
 0x247   : > { %v3667_v59 = vadd.f32 %v3653_v5, %v3493_v54 }
 0x248   : > { %v3815_v61 = vadd.f32 %v3800_v60, %v3678_v1 }
 0x249   : > { %v3679_v42 = vadd.f32 %v6410_v20, %v3667_v59 }
 0x24a   : > { %v3823_v21 = vmax.f32 %v3815_v61, 0.0 }
 0x24c   : > { %3831 = vst [vmem:[%s6418_s18 + $0x18] sm:$0xff] %v3823_v21 }
 0x24d   : > { %v3802_v35 = vpop.f32.mrf.mxu2 }
 0x24e   : > { %v3655_v57 = vpop.f32.mrf.mxu1  ;;  %v3803_v13 = vadd.f32 %v6403_v39, %v3802_v35 }
 0x24f   : > { %v3668_v62 = vadd.f32 %v3655_v57, %v3494_v37 }
 0x250   : > { %v3816_v58 = vadd.f32 %v3803_v13, %v3679_v42 }
 0x251   : > { %v3680_v45 = vadd.f32 %v6410_v20, %v3668_v62 }
 0x252   : > { %v3824_v33 = vmax.f32 %v3816_v58, 0.0 }
 0x254   : > { %3832 = vst [vmem:[%s6418_s18 + $0x20] sm:$0xff] %v3824_v33 }
 0x255   : > { %v3804_v38 = vpop.f32.mrf.mxu2 }
 0x256   : > { %v3658_v36 = vpop.f32.mrf.mxu1  ;;  %v3805_v11 = vadd.f32 %v6403_v39, %v3804_v38 }
 0x257   : > { %v3669_v34 = vadd.f32 %v3658_v36, %v3495_v16 }
 0x258   : > { %v3817_v26 = vadd.f32 %v3805_v11, %v3680_v45 }
 0x259   : > { %v3681_v41 = vadd.f32 %v6410_v20, %v3669_v34 }
 0x25a   : > { %v3825_v50 = vmax.f32 %v3817_v26, 0.0 }
 0x25b   : > { %v3818_v8 = vadd.f32 %v3808_v24, %v3681_v41 }
 0x25c   : > { %3833 = vst [vmem:[%s6418_s18 + $0x28] sm:$0xff] %v3825_v50 }
 0x25d   : > { %v3826_v27 = vmax.f32 %v3818_v8, 0.0 }
 0x25e   : > { %v3660_v63 = vpop.f32.mrf.mxu1 }
 0x25f   : > { %3834 = vst [vmem:[%s6418_s18 + $0x30] sm:$0xff] %v3826_v27  ;;  %v3670_v14 = vadd.f32 %v3660_v63, %v3496_v10 }
 0x261   : > { %v3682_v56 = vadd.f32 %v6410_v20, %v3670_v14 }
 0x263   : > { %v3819_v29 = vadd.f32 %v3810_v43, %v3682_v56 }
 0x265   : > { %v3827_v2 = vmax.f32 %v3819_v29, 0.0 }
 0x267   : > { %3835 = vst [vmem:[%s6418_s18 + $0x38] sm:$0xff] %v3827_v2 }
 0x268 PF: > { %s17_s24 = sadd.s32 1, %s5265_s24  }
 0x269   : > { %p14_p4 = scmp.ge.s32.totalorder %s17_s24, 4  }
 0x26b   :  { %16 = sbr.rel (!%p14_p4) target bundleno = 1 (0x1), region = 102 }

</bundles_post_ra>
